<compile_context>
chip_gen: v5e
topology: v5e:2x2
jax: 0.10.0
libtpu: 0.0.40
codegen_flags: <defaults>
</compile_context>

<pallas_src>
import functools

import jax
import jax.numpy as jnp
import numpy as np
from jax import lax
from jax.experimental import pallas as pl
from jax.experimental.pallas import tpu as pltpu


def _assp_kernel(x_ref, w1_ref, b1_ref, w2_ref, b2_ref, out_ref, *, TH, W, d):
    """One (batch, H-strip) grid step: 9 conv taps + bias/ReLU + 1x1 conv + bias/ReLU.

    x_ref  : (3, TH, Wp, Cin)  bf16  kh-shifted input strips (slab kh holds
                                     padded rows r + kh*d for output row r)
    w1_ref : (3, 3, Cin, Cmid) bf16  3x3 dilated-conv weights (resident)
    b1_ref : (1, Cmid)         f32
    w2_ref : (Cmid, Cout)      bf16  1x1 conv weights (resident)
    b2_ref : (1, Cout)         f32
    out_ref: (1, TH, W, Cout)  bf16
    """
    cmid = w1_ref.shape[-1]
    acc = jnp.zeros((TH * W, cmid), jnp.float32)
    # 9 accumulating MXU matmuls, statically unrolled; f32 accumulation.
    # (On v5e the per-kw window slices are not views; if the vst slot binds,
    #  keep the accumulation unflattened — see review note.)
    for kh in range(3):
        x = x_ref[kh]                                       # (TH, Wp, Cin) bf16
        for kw in range(3):
            patch = x[:, kw * d:kw * d + W, :].reshape(TH * W, -1)
            acc = acc + jnp.dot(patch, w1_ref[kh, kw],
                                preferred_element_type=jnp.float32)
    # conv1 bias + ReLU (dropout = identity in eval mode)
    h1 = jnp.maximum(acc + b1_ref[...], 0.0)
    # fused 1x1 conv (bf16 MXU matmul, f32 accumulation) + bias + ReLU
    y = jnp.dot(h1.astype(w2_ref.dtype), w2_ref[...],
                preferred_element_type=jnp.float32)
    y = jnp.maximum(y + b2_ref[...], 0.0)
    out_ref[0] = y.reshape(TH, W, -1).astype(out_ref.dtype)


def _const_spec(block_shape, index_map, single_buffer):
    """BlockSpec for an operand whose index map is constant over the grid.

    Requests single buffering (pl.Buffered(1)) so the pipeline keeps one
    resident copy instead of the default double buffer; falls back to a plain
    BlockSpec on JAX builds without pipeline_mode support.
    """
    if single_buffer and hasattr(pl, "Buffered"):
        try:
            return pl.BlockSpec(block_shape, index_map,
                                pipeline_mode=pl.Buffered(1))
        except TypeError:
            pass
    return pl.BlockSpec(block_shape, index_map)


def _pick_strip_height(H, block_h):
    """Largest TH <= block_h that divides H (no wasted padded rows); fall back
    to block_h with bottom padding when H has no reasonable divisor."""
    cap = max(1, min(block_h, H))
    best = max(th for th in range(1, cap + 1) if H % th == 0)
    if 2 * best >= cap:
        return best
    return cap


@functools.partial(jax.jit,
                   static_argnames=("dilation", "block_h",
                                    "single_buffer_constants"))
def assp_branch(x_nchw, w1_hwio, b1, w2_io, b2, *, dilation, block_h=8,
                single_buffer_constants=True):
    """Eval-mode Assp_Branch forward.

    x_nchw : (N, Cin, H, W) float32   (PyTorch layout)
    w1_hwio: (3, 3, Cin, Cmid)        3x3 dilated conv weights (HWIO)
    b1     : (Cmid,)
    w2_io  : (Cmid, Cout)             1x1 conv weights
    b2     : (Cout,)
    Returns (N, Cout, H, W) float32.

    block_h tuning: 8-16 on v7x (64 MiB VMEM; keep N*ceil(H/TH) >= 4 strips for
    megacore), 16-32 on v5e/v6e (128 MiB VMEM, also raise vmem_limit_bytes).
    """
    N, Cin, H, W = x_nchw.shape
    Cmid = w1_hwio.shape[3]
    Cout = w2_io.shape[1]
    d = int(dilation)

    TH = _pick_strip_height(H, block_h)       # output rows per strip
    nH = -(-H // TH)
    Hs = nH * TH                              # H rounded up to whole strips
    Wp = W + 2 * d

    # NCHW -> NHWC, bf16 operands (f32 accumulation inside the kernel).
    x_nhwc = jnp.transpose(x_nchw, (0, 2, 3, 1)).astype(jnp.bfloat16)
    # Zero pad: conv halo of d rows/cols + bottom rows so H tiles by TH.
    xp = jnp.pad(x_nhwc, ((0, 0), (d, d + (Hs - H)), (d, d), (0, 0)))
    # Pre-shift along H for the three kernel rows (row i of slab kh is padded
    # row i + kh*d) so each strip block is a plain non-overlapping DMA.  Layout
    # (N*3, Hs, Wp, Cin): slabs [3n, 3n+3) belong to batch n, so one
    # (3, TH, Wp, Cin) block fetches all three kh views of a strip at once.
    x_sh = jnp.stack([xp[:, kh * d:kh * d + Hs] for kh in range(3)],
                     axis=1).reshape(N * 3, Hs, Wp, Cin)

    w1 = w1_hwio.astype(jnp.bfloat16)                         # (3, 3, Cin, Cmid)
    w2 = w2_io.astype(jnp.bfloat16)                           # (Cmid, Cout)
    b1_2d = b1.reshape(1, Cmid).astype(jnp.float32)
    b2_2d = b2.reshape(1, Cout).astype(jnp.float32)

    kernel = functools.partial(_assp_kernel, TH=TH, W=W, d=d)
    cspec = functools.partial(_const_spec,
                              single_buffer=single_buffer_constants)

    flops = 2 * N * Hs * W * (9 * Cin * Cmid + Cmid * Cout)
    bytes_accessed = (x_sh.size * 2 + w1.size * 2 + w2.size * 2 +
                      b1_2d.size * 4 + b2_2d.size * 4 +
                      N * Hs * W * Cout * 2)

    out_nhwc = pl.pallas_call(
        kernel,
        out_shape=jax.ShapeDtypeStruct((N, Hs, W, Cout), jnp.bfloat16),
        grid_spec=pltpu.PrefetchScalarGridSpec(
            num_scalar_prefetch=0,
            grid=(N, nH),                         # batch x H-strip, both parallel
            in_specs=[
                pl.BlockSpec((3, TH, Wp, Cin), lambda n, h: (n, h, 0, 0)),
                cspec((3, 3, Cin, Cmid), lambda n, h: (0, 0, 0, 0)),
                cspec((1, Cmid), lambda n, h: (0, 0)),
                cspec((Cmid, Cout), lambda n, h: (0, 0)),
                cspec((1, Cout), lambda n, h: (0, 0)),
            ],
            out_specs=pl.BlockSpec((1, TH, W, Cout),
                                   lambda n, h: (n, h, 0, 0)),
        ),
        compiler_params=pltpu.CompilerParams(
            dimension_semantics=("parallel", "parallel"),
            # ~48 MiB is safe on all generations; raise toward ~96-110 MiB on
            # v5e/v6e when sweeping block_h up, keep <= ~56 MiB on v7x.
            vmem_limit_bytes=48 * 1024 * 1024),
        cost_estimate=pl.CostEstimate(flops=flops, transcendentals=0,
                                      bytes_accessed=bytes_accessed),
    )(x_sh, w1, b1_2d, w2, b2_2d)

    out_nhwc = out_nhwc[:, :H]                    # drop any strip-padding rows
    # Back to the module's NCHW/f32 output (single fused transpose+cast).
    # If the downstream consumer accepts NHWC bf16, return out_nhwc directly.
    return jnp.transpose(out_nhwc, (0, 3, 1, 2)).astype(jnp.float32)


def _reference(x_nchw, w1_hwio, b1, w2_io, b2, dilation):
    """Pure-JAX reference (eval-mode Assp_Branch), f32."""
    d = int(dilation)
    x = jnp.transpose(x_nchw, (0, 2, 3, 1))       # NHWC
    y = lax.conv_general_dilated(
        x, w1_hwio, window_strides=(1, 1),
        padding=[(d, d), (d, d)], rhs_dilation=(d, d),
        dimension_numbers=("NHWC", "HWIO", "NHWC"))
    y = jnp.maximum(y + b1, 0.0)
    y = jnp.maximum(jnp.einsum("nhwc,co->nhwo", y, w2_io) + b2, 0.0)
    return jnp.transpose(y, (0, 3, 1, 2))


def _call_kernel(x, w1, b1, w2, b2, dilation):
    try:
        return assp_branch(x, w1, b1, w2, b2, dilation=dilation)
    except Exception:
        # pipeline_mode=pl.Buffered(1) unsupported on this JAX build — fall
        # back to default double buffering (identical numerics).
        return assp_branch(x, w1, b1, w2, b2, dilation=dilation,
                           single_buffer_constants=False)


def _run_case(key, N, Cin, H, W, Cmid, Cout, dilation):
    kx, k1, kb1, k2, kb2 = jax.random.split(key, 5)
    x = jax.random.normal(kx, (N, Cin, H, W), jnp.float32)
    w1 = jax.random.normal(k1, (3, 3, Cin, Cmid), jnp.float32) * 0.05   # HWIO
    b1 = jax.random.normal(kb1, (Cmid,), jnp.float32) * 0.05
    w2 = jax.random.normal(k2, (Cmid, Cout), jnp.float32) * 0.05        # IO
    b2 = jax.random.normal(kb2, (Cout,), jnp.float32) * 0.05

    out = jax.block_until_ready(_call_kernel(x, w1, b1, w2, b2, dilation))
    assert out.shape == (N, Cout, H, W)

    # Kernel uses bf16 operands / bf16 output with f32 accumulation -> compare
    # against an f32 reference on bf16-rounded operands, loosened tolerance.
    xr = x.astype(jnp.bfloat16).astype(jnp.float32)
    w1r = w1.astype(jnp.bfloat16).astype(jnp.float32)
    w2r = w2.astype(jnp.bfloat16).astype(jnp.float32)
    ref = jax.block_until_ready(_reference(xr, w1r, b1, w2r, b2, dilation))
    np.testing.assert_allclose(np.asarray(out), np.asarray(ref),
                               rtol=2e-2, atol=2e-2)


if __name__ == "__main__":
    key = jax.random.PRNGKey(0)
    ka, kb = jax.random.split(key)
    # Small shapes, structurally consistent with the module
    # (real module: Cin=512, Cmid=Cout=1024, dilation up to 24).
    _run_case(ka, N=2, Cin=8, H=16, W=16, Cmid=32, Cout=32, dilation=2)
    # H not a multiple of block_h (divisor path picks TH=5) + another dilation.
    _run_case(kb, N=1, Cin=8, H=20, W=16, Cmid=32, Cout=32, dilation=3)
    print("KERNEL_OK")
</pallas_src>

<mosaic_0001>
module attributes {stable_mosaic.version = 11 : i64} {
  func.func @_assp_kernel(%arg0: i32, %arg1: i32, %arg2: memref<3x8x20x8xbf16, #tpu.memory_space<vmem>>, %arg3: memref<3x3x8x32xbf16, #tpu.memory_space<vmem>>, %arg4: memref<1x32xf32, #tpu.memory_space<vmem>>, %arg5: memref<32x32xbf16, #tpu.memory_space<vmem>>, %arg6: memref<1x32xf32, #tpu.memory_space<vmem>>, %arg7: memref<1x8x16x32xbf16, #tpu.memory_space<vmem>>) attributes {dimension_semantics = [#tpu.dimension_semantics<parallel>, #tpu.dimension_semantics<parallel>], iteration_bounds = array<i64: 2, 2>, scalar_prefetch = 0 : i64, scratch_operands = 0 : i64, tpu.core_type = #tpu.core_type<tc>, window_params = [{transform_indices = @transform_0, window_bounds = array<i64: 3, 8, 20, 8>}, {pipeline_mode = #tpu.pipeline_mode<synchronous>, transform_indices = @transform_1, window_bounds = array<i64: 3, 3, 8, 32>}, {pipeline_mode = #tpu.pipeline_mode<synchronous>, transform_indices = @transform_2, window_bounds = array<i64: 1, 32>}, {pipeline_mode = #tpu.pipeline_mode<synchronous>, transform_indices = @transform_3, window_bounds = array<i64: 32, 32>}, {pipeline_mode = #tpu.pipeline_mode<synchronous>, transform_indices = @transform_4, window_bounds = array<i64: 1, 32>}, {transform_indices = @transform_5, window_bounds = array<i64: 1, 8, 16, 32>}]} {
    %cst = arith.constant 0.000000e+00 : f32
    %0 = vector.broadcast %cst : f32 to vector<128x32xf32>
    %c0 = arith.constant 0 : index
    %c0_0 = arith.constant 0 : index
    %c0_1 = arith.constant 0 : index
    %c0_2 = arith.constant 0 : index
    %1 = vector.load %arg2[%c0, %c0_0, %c0_1, %c0_2] : memref<3x8x20x8xbf16, #tpu.memory_space<vmem>>, vector<1x8x20x8xbf16>
    %2 = vector.shape_cast %1 : vector<1x8x20x8xbf16> to vector<8x20x8xbf16>
    %3 = vector.extract_strided_slice %2 {offsets = [0, 0, 0], sizes = [8, 16, 8], strides = [1, 1, 1]} : vector<8x20x8xbf16> to vector<8x16x8xbf16>
    %4 = vector.shape_cast %3 : vector<8x16x8xbf16> to vector<128x8xbf16>
    %c0_3 = arith.constant 0 : index
    %c0_4 = arith.constant 0 : index
    %c0_5 = arith.constant 0 : index
    %c0_6 = arith.constant 0 : index
    %5 = vector.load %arg3[%c0_3, %c0_4, %c0_5, %c0_6] : memref<3x3x8x32xbf16, #tpu.memory_space<vmem>>, vector<1x1x8x32xbf16>
    %6 = vector.shape_cast %5 : vector<1x1x8x32xbf16> to vector<8x32xbf16>
    %cst_7 = arith.constant dense<0.000000e+00> : vector<128x32xf32>
    %7 = tpu.matmul %4, %6, %cst_7 {dimension_numbers = #tpu.dot_dimension_numbers<[1], [0], [0], [1], [0, 0, 1, 1], [], []>} : vector<128x8xbf16>, vector<8x32xbf16>, vector<128x32xf32> -> vector<128x32xf32>
    %8 = arith.addf %0, %7 : vector<128x32xf32>
    %9 = vector.extract_strided_slice %2 {offsets = [0, 2, 0], sizes = [8, 16, 8], strides = [1, 1, 1]} : vector<8x20x8xbf16> to vector<8x16x8xbf16>
    %10 = vector.shape_cast %9 : vector<8x16x8xbf16> to vector<128x8xbf16>
    %c0_8 = arith.constant 0 : index
    %c1 = arith.constant 1 : index
    %c0_9 = arith.constant 0 : index
    %c0_10 = arith.constant 0 : index
    %11 = vector.load %arg3[%c0_8, %c1, %c0_9, %c0_10] : memref<3x3x8x32xbf16, #tpu.memory_space<vmem>>, vector<1x1x8x32xbf16>
    %12 = vector.shape_cast %11 : vector<1x1x8x32xbf16> to vector<8x32xbf16>
    %cst_11 = arith.constant dense<0.000000e+00> : vector<128x32xf32>
    %13 = tpu.matmul %10, %12, %cst_11 {dimension_numbers = #tpu.dot_dimension_numbers<[1], [0], [0], [1], [0, 0, 1, 1], [], []>} : vector<128x8xbf16>, vector<8x32xbf16>, vector<128x32xf32> -> vector<128x32xf32>
    %14 = arith.addf %8, %13 : vector<128x32xf32>
    %15 = vector.extract_strided_slice %2 {offsets = [0, 4, 0], sizes = [8, 16, 8], strides = [1, 1, 1]} : vector<8x20x8xbf16> to vector<8x16x8xbf16>
    %16 = vector.shape_cast %15 : vector<8x16x8xbf16> to vector<128x8xbf16>
    %c0_12 = arith.constant 0 : index
    %c2 = arith.constant 2 : index
    %c0_13 = arith.constant 0 : index
    %c0_14 = arith.constant 0 : index
    %17 = vector.load %arg3[%c0_12, %c2, %c0_13, %c0_14] : memref<3x3x8x32xbf16, #tpu.memory_space<vmem>>, vector<1x1x8x32xbf16>
    %18 = vector.shape_cast %17 : vector<1x1x8x32xbf16> to vector<8x32xbf16>
    %cst_15 = arith.constant dense<0.000000e+00> : vector<128x32xf32>
    %19 = tpu.matmul %16, %18, %cst_15 {dimension_numbers = #tpu.dot_dimension_numbers<[1], [0], [0], [1], [0, 0, 1, 1], [], []>} : vector<128x8xbf16>, vector<8x32xbf16>, vector<128x32xf32> -> vector<128x32xf32>
    %20 = arith.addf %14, %19 : vector<128x32xf32>
    %c1_16 = arith.constant 1 : index
    %c0_17 = arith.constant 0 : index
    %c0_18 = arith.constant 0 : index
    %c0_19 = arith.constant 0 : index
    %21 = vector.load %arg2[%c1_16, %c0_17, %c0_18, %c0_19] : memref<3x8x20x8xbf16, #tpu.memory_space<vmem>>, vector<1x8x20x8xbf16>
    %22 = vector.shape_cast %21 : vector<1x8x20x8xbf16> to vector<8x20x8xbf16>
    %23 = vector.extract_strided_slice %22 {offsets = [0, 0, 0], sizes = [8, 16, 8], strides = [1, 1, 1]} : vector<8x20x8xbf16> to vector<8x16x8xbf16>
    %24 = vector.shape_cast %23 : vector<8x16x8xbf16> to vector<128x8xbf16>
    %c1_20 = arith.constant 1 : index
    %c0_21 = arith.constant 0 : index
    %c0_22 = arith.constant 0 : index
    %c0_23 = arith.constant 0 : index
    %25 = vector.load %arg3[%c1_20, %c0_21, %c0_22, %c0_23] : memref<3x3x8x32xbf16, #tpu.memory_space<vmem>>, vector<1x1x8x32xbf16>
    %26 = vector.shape_cast %25 : vector<1x1x8x32xbf16> to vector<8x32xbf16>
    %cst_24 = arith.constant dense<0.000000e+00> : vector<128x32xf32>
    %27 = tpu.matmul %24, %26, %cst_24 {dimension_numbers = #tpu.dot_dimension_numbers<[1], [0], [0], [1], [0, 0, 1, 1], [], []>} : vector<128x8xbf16>, vector<8x32xbf16>, vector<128x32xf32> -> vector<128x32xf32>
    %28 = arith.addf %20, %27 : vector<128x32xf32>
    %29 = vector.extract_strided_slice %22 {offsets = [0, 2, 0], sizes = [8, 16, 8], strides = [1, 1, 1]} : vector<8x20x8xbf16> to vector<8x16x8xbf16>
    %30 = vector.shape_cast %29 : vector<8x16x8xbf16> to vector<128x8xbf16>
    %c1_25 = arith.constant 1 : index
    %c1_26 = arith.constant 1 : index
    %c0_27 = arith.constant 0 : index
    %c0_28 = arith.constant 0 : index
    %31 = vector.load %arg3[%c1_25, %c1_26, %c0_27, %c0_28] : memref<3x3x8x32xbf16, #tpu.memory_space<vmem>>, vector<1x1x8x32xbf16>
    %32 = vector.shape_cast %31 : vector<1x1x8x32xbf16> to vector<8x32xbf16>
    %cst_29 = arith.constant dense<0.000000e+00> : vector<128x32xf32>
    %33 = tpu.matmul %30, %32, %cst_29 {dimension_numbers = #tpu.dot_dimension_numbers<[1], [0], [0], [1], [0, 0, 1, 1], [], []>} : vector<128x8xbf16>, vector<8x32xbf16>, vector<128x32xf32> -> vector<128x32xf32>
    %34 = arith.addf %28, %33 : vector<128x32xf32>
    %35 = vector.extract_strided_slice %22 {offsets = [0, 4, 0], sizes = [8, 16, 8], strides = [1, 1, 1]} : vector<8x20x8xbf16> to vector<8x16x8xbf16>
    %36 = vector.shape_cast %35 : vector<8x16x8xbf16> to vector<128x8xbf16>
    %c1_30 = arith.constant 1 : index
    %c2_31 = arith.constant 2 : index
    %c0_32 = arith.constant 0 : index
    %c0_33 = arith.constant 0 : index
    %37 = vector.load %arg3[%c1_30, %c2_31, %c0_32, %c0_33] : memref<3x3x8x32xbf16, #tpu.memory_space<vmem>>, vector<1x1x8x32xbf16>
    %38 = vector.shape_cast %37 : vector<1x1x8x32xbf16> to vector<8x32xbf16>
    %cst_34 = arith.constant dense<0.000000e+00> : vector<128x32xf32>
    %39 = tpu.matmul %36, %38, %cst_34 {dimension_numbers = #tpu.dot_dimension_numbers<[1], [0], [0], [1], [0, 0, 1, 1], [], []>} : vector<128x8xbf16>, vector<8x32xbf16>, vector<128x32xf32> -> vector<128x32xf32>
    %40 = arith.addf %34, %39 : vector<128x32xf32>
    %c2_35 = arith.constant 2 : index
    %c0_36 = arith.constant 0 : index
    %c0_37 = arith.constant 0 : index
    %c0_38 = arith.constant 0 : index
    %41 = vector.load %arg2[%c2_35, %c0_36, %c0_37, %c0_38] : memref<3x8x20x8xbf16, #tpu.memory_space<vmem>>, vector<1x8x20x8xbf16>
    %42 = vector.shape_cast %41 : vector<1x8x20x8xbf16> to vector<8x20x8xbf16>
    %43 = vector.extract_strided_slice %42 {offsets = [0, 0, 0], sizes = [8, 16, 8], strides = [1, 1, 1]} : vector<8x20x8xbf16> to vector<8x16x8xbf16>
    %44 = vector.shape_cast %43 : vector<8x16x8xbf16> to vector<128x8xbf16>
    %c2_39 = arith.constant 2 : index
    %c0_40 = arith.constant 0 : index
    %c0_41 = arith.constant 0 : index
    %c0_42 = arith.constant 0 : index
    %45 = vector.load %arg3[%c2_39, %c0_40, %c0_41, %c0_42] : memref<3x3x8x32xbf16, #tpu.memory_space<vmem>>, vector<1x1x8x32xbf16>
    %46 = vector.shape_cast %45 : vector<1x1x8x32xbf16> to vector<8x32xbf16>
    %cst_43 = arith.constant dense<0.000000e+00> : vector<128x32xf32>
    %47 = tpu.matmul %44, %46, %cst_43 {dimension_numbers = #tpu.dot_dimension_numbers<[1], [0], [0], [1], [0, 0, 1, 1], [], []>} : vector<128x8xbf16>, vector<8x32xbf16>, vector<128x32xf32> -> vector<128x32xf32>
    %48 = arith.addf %40, %47 : vector<128x32xf32>
    %49 = vector.extract_strided_slice %42 {offsets = [0, 2, 0], sizes = [8, 16, 8], strides = [1, 1, 1]} : vector<8x20x8xbf16> to vector<8x16x8xbf16>
    %50 = vector.shape_cast %49 : vector<8x16x8xbf16> to vector<128x8xbf16>
    %c2_44 = arith.constant 2 : index
    %c1_45 = arith.constant 1 : index
    %c0_46 = arith.constant 0 : index
    %c0_47 = arith.constant 0 : index
    %51 = vector.load %arg3[%c2_44, %c1_45, %c0_46, %c0_47] : memref<3x3x8x32xbf16, #tpu.memory_space<vmem>>, vector<1x1x8x32xbf16>
    %52 = vector.shape_cast %51 : vector<1x1x8x32xbf16> to vector<8x32xbf16>
    %cst_48 = arith.constant dense<0.000000e+00> : vector<128x32xf32>
    %53 = tpu.matmul %50, %52, %cst_48 {dimension_numbers = #tpu.dot_dimension_numbers<[1], [0], [0], [1], [0, 0, 1, 1], [], []>} : vector<128x8xbf16>, vector<8x32xbf16>, vector<128x32xf32> -> vector<128x32xf32>
    %54 = arith.addf %48, %53 : vector<128x32xf32>
    %55 = vector.extract_strided_slice %42 {offsets = [0, 4, 0], sizes = [8, 16, 8], strides = [1, 1, 1]} : vector<8x20x8xbf16> to vector<8x16x8xbf16>
    %56 = vector.shape_cast %55 : vector<8x16x8xbf16> to vector<128x8xbf16>
    %c2_49 = arith.constant 2 : index
    %c2_50 = arith.constant 2 : index
    %c0_51 = arith.constant 0 : index
    %c0_52 = arith.constant 0 : index
    %57 = vector.load %arg3[%c2_49, %c2_50, %c0_51, %c0_52] : memref<3x3x8x32xbf16, #tpu.memory_space<vmem>>, vector<1x1x8x32xbf16>
    %58 = vector.shape_cast %57 : vector<1x1x8x32xbf16> to vector<8x32xbf16>
    %cst_53 = arith.constant dense<0.000000e+00> : vector<128x32xf32>
    %59 = tpu.matmul %56, %58, %cst_53 {dimension_numbers = #tpu.dot_dimension_numbers<[1], [0], [0], [1], [0, 0, 1, 1], [], []>} : vector<128x8xbf16>, vector<8x32xbf16>, vector<128x32xf32> -> vector<128x32xf32>
    %60 = arith.addf %54, %59 : vector<128x32xf32>
    %c0_54 = arith.constant 0 : index
    %c0_55 = arith.constant 0 : index
    %61 = vector.load %arg4[%c0_54, %c0_55] : memref<1x32xf32, #tpu.memory_space<vmem>>, vector<1x32xf32>
    %62 = vector.broadcast %61 : vector<1x32xf32> to vector<128x32xf32>
    %63 = arith.addf %60, %62 : vector<128x32xf32>
    %cst_56 = arith.constant 0.000000e+00 : f32
    %64 = vector.broadcast %cst_56 : f32 to vector<128x32xf32>
    %65 = arith.maximumf %63, %64 : vector<128x32xf32>
    %66 = arith.truncf %65 : vector<128x32xf32> to vector<128x32xbf16>
    %c0_57 = arith.constant 0 : index
    %c0_58 = arith.constant 0 : index
    %67 = vector.load %arg5[%c0_57, %c0_58] : memref<32x32xbf16, #tpu.memory_space<vmem>>, vector<32x32xbf16>
    %cst_59 = arith.constant dense<0.000000e+00> : vector<128x32xf32>
    %68 = tpu.matmul %66, %67, %cst_59 {dimension_numbers = #tpu.dot_dimension_numbers<[1], [0], [0], [1], [0, 0, 1, 1], [], []>} : vector<128x32xbf16>, vector<32x32xbf16>, vector<128x32xf32> -> vector<128x32xf32>
    %c0_60 = arith.constant 0 : index
    %c0_61 = arith.constant 0 : index
    %69 = vector.load %arg6[%c0_60, %c0_61] : memref<1x32xf32, #tpu.memory_space<vmem>>, vector<1x32xf32>
    %70 = vector.broadcast %69 : vector<1x32xf32> to vector<128x32xf32>
    %71 = arith.addf %68, %70 : vector<128x32xf32>
    %cst_62 = arith.constant 0.000000e+00 : f32
    %72 = vector.broadcast %cst_62 : f32 to vector<128x32xf32>
    %73 = arith.maximumf %71, %72 : vector<128x32xf32>
    %74 = vector.shape_cast %73 : vector<128x32xf32> to vector<8x16x32xf32>
    %75 = arith.truncf %74 : vector<8x16x32xf32> to vector<8x16x32xbf16>
    %c0_63 = arith.constant 0 : index
    %c0_64 = arith.constant 0 : index
    %c0_65 = arith.constant 0 : index
    %c0_66 = arith.constant 0 : index
    %76 = vector.load %arg7[%c0_63, %c0_64, %c0_65, %c0_66] : memref<1x8x16x32xbf16, #tpu.memory_space<vmem>>, vector<1x8x16x32xbf16>
    %77 = vector.shape_cast %76 : vector<1x8x16x32xbf16> to vector<8x16x32xbf16>
    %78 = vector.shape_cast %75 : vector<8x16x32xbf16> to vector<1x8x16x32xbf16>
    tpu.vector_store %arg7[%c0_63, %c0_64, %c0_65, %c0_66], %78 {strides = array<i32>} : memref<1x8x16x32xbf16, #tpu.memory_space<vmem>>, vector<1x8x16x32xbf16>,
    return
  }
  func.func @transform_0(%arg0: i32, %arg1: i32) -> (i32, i32, i32, i32) {
    %c0_i32 = arith.constant 0 : i32
    %c0_i32_0 = arith.constant 0 : i32
    %c0_i32_1 = arith.constant 0 : i32
    return %arg0, %arg1, %c0_i32, %c0_i32_0 : i32, i32, i32, i32
  }
  func.func @transform_1(%arg0: i32, %arg1: i32) -> (i32, i32, i32, i32) {
    %c0_i32 = arith.constant 0 : i32
    %c0_i32_0 = arith.constant 0 : i32
    %c0_i32_1 = arith.constant 0 : i32
    %c0_i32_2 = arith.constant 0 : i32
    %c0_i32_3 = arith.constant 0 : i32
    return %c0_i32, %c0_i32_0, %c0_i32_1, %c0_i32_2 : i32, i32, i32, i32
  }
  func.func @transform_2(%arg0: i32, %arg1: i32) -> (i32, i32) {
    %c0_i32 = arith.constant 0 : i32
    %c0_i32_0 = arith.constant 0 : i32
    %c0_i32_1 = arith.constant 0 : i32
    return %c0_i32, %c0_i32_0 : i32, i32
  }
  func.func @transform_3(%arg0: i32, %arg1: i32) -> (i32, i32) {
    %c0_i32 = arith.constant 0 : i32
    %c0_i32_0 = arith.constant 0 : i32
    %c0_i32_1 = arith.constant 0 : i32
    return %c0_i32, %c0_i32_0 : i32, i32
  }
  func.func @transform_4(%arg0: i32, %arg1: i32) -> (i32, i32) {
    %c0_i32 = arith.constant 0 : i32
    %c0_i32_0 = arith.constant 0 : i32
    %c0_i32_1 = arith.constant 0 : i32
    return %c0_i32, %c0_i32_0 : i32, i32
  }
  func.func @transform_5(%arg0: i32, %arg1: i32) -> (i32, i32, i32, i32) {
    %c0_i32 = arith.constant 0 : i32
    %c0_i32_0 = arith.constant 0 : i32
    %c0_i32_1 = arith.constant 0 : i32
    return %arg0, %arg1, %c0_i32, %c0_i32_0 : i32, i32, i32, i32
  }
}

module attributes {stable_mosaic.version = 11 : i64} {
  func.func @_assp_kernel(%arg0: i32, %arg1: i32, %arg2: memref<3x8x20x8xbf16, #tpu.memory_space<vmem>>, %arg3: memref<3x3x8x32xbf16, #tpu.memory_space<vmem>>, %arg4: memref<1x32xf32, #tpu.memory_space<vmem>>, %arg5: memref<32x32xbf16, #tpu.memory_space<vmem>>, %arg6: memref<1x32xf32, #tpu.memory_space<vmem>>, %arg7: memref<1x8x16x32xbf16, #tpu.memory_space<vmem>>) attributes {dimension_semantics = [#tpu.dimension_semantics<parallel>, #tpu.dimension_semantics<parallel>], iteration_bounds = array<i64: 2, 2>, scalar_prefetch = 0 : i64, scratch_operands = 0 : i64, tpu.core_type = #tpu.core_type<tc>, window_params = [{transform_indices = @transform_0, window_bounds = array<i64: 3, 8, 20, 8>}, {pipeline_mode = #tpu.pipeline_mode<synchronous>, transform_indices = @transform_1, window_bounds = array<i64: 3, 3, 8, 32>}, {pipeline_mode = #tpu.pipeline_mode<synchronous>, transform_indices = @transform_2, window_bounds = array<i64: 1, 32>}, {pipeline_mode = #tpu.pipeline_mode<synchronous>, transform_indices = @transform_3, window_bounds = array<i64: 32, 32>}, {pipeline_mode = #tpu.pipeline_mode<synchronous>, transform_indices = @transform_4, window_bounds = array<i64: 1, 32>}, {transform_indices = @transform_5, window_bounds = array<i64: 1, 8, 16, 32>}]} {
    %cst = arith.constant 0.000000e+00 : f32
    %0 = vector.broadcast %cst : f32 to vector<128x32xf32>
    %c0 = arith.constant 0 : index
    %c0_0 = arith.constant 0 : index
    %c0_1 = arith.constant 0 : index
    %c0_2 = arith.constant 0 : index
    %1 = vector.load %arg2[%c0, %c0_0, %c0_1, %c0_2] : memref<3x8x20x8xbf16, #tpu.memory_space<vmem>>, vector<1x8x20x8xbf16>
    %2 = vector.shape_cast %1 : vector<1x8x20x8xbf16> to vector<8x20x8xbf16>
    %3 = vector.extract_strided_slice %2 {offsets = [0, 0, 0], sizes = [8, 16, 8], strides = [1, 1, 1]} : vector<8x20x8xbf16> to vector<8x16x8xbf16>
    %4 = vector.shape_cast %3 : vector<8x16x8xbf16> to vector<128x8xbf16>
    %c0_3 = arith.constant 0 : index
    %c0_4 = arith.constant 0 : index
    %c0_5 = arith.constant 0 : index
    %c0_6 = arith.constant 0 : index
    %5 = vector.load %arg3[%c0_3, %c0_4, %c0_5, %c0_6] : memref<3x3x8x32xbf16, #tpu.memory_space<vmem>>, vector<1x1x8x32xbf16>
    %6 = vector.shape_cast %5 : vector<1x1x8x32xbf16> to vector<8x32xbf16>
    %cst_7 = arith.constant dense<0.000000e+00> : vector<128x32xf32>
    %7 = tpu.matmul %4, %6, %cst_7 {dimension_numbers = #tpu.dot_dimension_numbers<[1], [0], [0], [1], [0, 0, 1, 1], [], []>} : vector<128x8xbf16>, vector<8x32xbf16>, vector<128x32xf32> -> vector<128x32xf32>
    %8 = arith.addf %0, %7 : vector<128x32xf32>
    %9 = vector.extract_strided_slice %2 {offsets = [0, 2, 0], sizes = [8, 16, 8], strides = [1, 1, 1]} : vector<8x20x8xbf16> to vector<8x16x8xbf16>
    %10 = vector.shape_cast %9 : vector<8x16x8xbf16> to vector<128x8xbf16>
    %c0_8 = arith.constant 0 : index
    %c1 = arith.constant 1 : index
    %c0_9 = arith.constant 0 : index
    %c0_10 = arith.constant 0 : index
    %11 = vector.load %arg3[%c0_8, %c1, %c0_9, %c0_10] : memref<3x3x8x32xbf16, #tpu.memory_space<vmem>>, vector<1x1x8x32xbf16>
    %12 = vector.shape_cast %11 : vector<1x1x8x32xbf16> to vector<8x32xbf16>
    %cst_11 = arith.constant dense<0.000000e+00> : vector<128x32xf32>
    %13 = tpu.matmul %10, %12, %cst_11 {dimension_numbers = #tpu.dot_dimension_numbers<[1], [0], [0], [1], [0, 0, 1, 1], [], []>} : vector<128x8xbf16>, vector<8x32xbf16>, vector<128x32xf32> -> vector<128x32xf32>
    %14 = arith.addf %8, %13 : vector<128x32xf32>
    %15 = vector.extract_strided_slice %2 {offsets = [0, 4, 0], sizes = [8, 16, 8], strides = [1, 1, 1]} : vector<8x20x8xbf16> to vector<8x16x8xbf16>
    %16 = vector.shape_cast %15 : vector<8x16x8xbf16> to vector<128x8xbf16>
    %c0_12 = arith.constant 0 : index
    %c2 = arith.constant 2 : index
    %c0_13 = arith.constant 0 : index
    %c0_14 = arith.constant 0 : index
    %17 = vector.load %arg3[%c0_12, %c2, %c0_13, %c0_14] : memref<3x3x8x32xbf16, #tpu.memory_space<vmem>>, vector<1x1x8x32xbf16>
    %18 = vector.shape_cast %17 : vector<1x1x8x32xbf16> to vector<8x32xbf16>
    %cst_15 = arith.constant dense<0.000000e+00> : vector<128x32xf32>
    %19 = tpu.matmul %16, %18, %cst_15 {dimension_numbers = #tpu.dot_dimension_numbers<[1], [0], [0], [1], [0, 0, 1, 1], [], []>} : vector<128x8xbf16>, vector<8x32xbf16>, vector<128x32xf32> -> vector<128x32xf32>
    %20 = arith.addf %14, %19 : vector<128x32xf32>
    %c1_16 = arith.constant 1 : index
    %c0_17 = arith.constant 0 : index
    %c0_18 = arith.constant 0 : index
    %c0_19 = arith.constant 0 : index
    %21 = vector.load %arg2[%c1_16, %c0_17, %c0_18, %c0_19] : memref<3x8x20x8xbf16, #tpu.memory_space<vmem>>, vector<1x8x20x8xbf16>
    %22 = vector.shape_cast %21 : vector<1x8x20x8xbf16> to vector<8x20x8xbf16>
    %23 = vector.extract_strided_slice %22 {offsets = [0, 0, 0], sizes = [8, 16, 8], strides = [1, 1, 1]} : vector<8x20x8xbf16> to vector<8x16x8xbf16>
    %24 = vector.shape_cast %23 : vector<8x16x8xbf16> to vector<128x8xbf16>
    %c1_20 = arith.constant 1 : index
    %c0_21 = arith.constant 0 : index
    %c0_22 = arith.constant 0 : index
    %c0_23 = arith.constant 0 : index
    %25 = vector.load %arg3[%c1_20, %c0_21, %c0_22, %c0_23] : memref<3x3x8x32xbf16, #tpu.memory_space<vmem>>, vector<1x1x8x32xbf16>
    %26 = vector.shape_cast %25 : vector<1x1x8x32xbf16> to vector<8x32xbf16>
    %cst_24 = arith.constant dense<0.000000e+00> : vector<128x32xf32>
    %27 = tpu.matmul %24, %26, %cst_24 {dimension_numbers = #tpu.dot_dimension_numbers<[1], [0], [0], [1], [0, 0, 1, 1], [], []>} : vector<128x8xbf16>, vector<8x32xbf16>, vector<128x32xf32> -> vector<128x32xf32>
    %28 = arith.addf %20, %27 : vector<128x32xf32>
    %29 = vector.extract_strided_slice %22 {offsets = [0, 2, 0], sizes = [8, 16, 8], strides = [1, 1, 1]} : vector<8x20x8xbf16> to vector<8x16x8xbf16>
    %30 = vector.shape_cast %29 : vector<8x16x8xbf16> to vector<128x8xbf16>
    %c1_25 = arith.constant 1 : index
    %c1_26 = arith.constant 1 : index
    %c0_27 = arith.constant 0 : index
    %c0_28 = arith.constant 0 : index
    %31 = vector.load %arg3[%c1_25, %c1_26, %c0_27, %c0_28] : memref<3x3x8x32xbf16, #tpu.memory_space<vmem>>, vector<1x1x8x32xbf16>
    %32 = vector.shape_cast %31 : vector<1x1x8x32xbf16> to vector<8x32xbf16>
    %cst_29 = arith.constant dense<0.000000e+00> : vector<128x32xf32>
    %33 = tpu.matmul %30, %32, %cst_29 {dimension_numbers = #tpu.dot_dimension_numbers<[1], [0], [0], [1], [0, 0, 1, 1], [], []>} : vector<128x8xbf16>, vector<8x32xbf16>, vector<128x32xf32> -> vector<128x32xf32>
    %34 = arith.addf %28, %33 : vector<128x32xf32>
    %35 = vector.extract_strided_slice %22 {offsets = [0, 4, 0], sizes = [8, 16, 8], strides = [1, 1, 1]} : vector<8x20x8xbf16> to vector<8x16x8xbf16>
    %36 = vector.shape_cast %35 : vector<8x16x8xbf16> to vector<128x8xbf16>
    %c1_30 = arith.constant 1 : index
    %c2_31 = arith.constant 2 : index
    %c0_32 = arith.constant 0 : index
    %c0_33 = arith.constant 0 : index
    %37 = vector.load %arg3[%c1_30, %c2_31, %c0_32, %c0_33] : memref<3x3x8x32xbf16, #tpu.memory_space<vmem>>, vector<1x1x8x32xbf16>
    %38 = vector.shape_cast %37 : vector<1x1x8x32xbf16> to vector<8x32xbf16>
    %cst_34 = arith.constant dense<0.000000e+00> : vector<128x32xf32>
    %39 = tpu.matmul %36, %38, %cst_34 {dimension_numbers = #tpu.dot_dimension_numbers<[1], [0], [0], [1], [0, 0, 1, 1], [], []>} : vector<128x8xbf16>, vector<8x32xbf16>, vector<128x32xf32> -> vector<128x32xf32>
    %40 = arith.addf %34, %39 : vector<128x32xf32>
    %c2_35 = arith.constant 2 : index
    %c0_36 = arith.constant 0 : index
    %c0_37 = arith.constant 0 : index
    %c0_38 = arith.constant 0 : index
    %41 = vector.load %arg2[%c2_35, %c0_36, %c0_37, %c0_38] : memref<3x8x20x8xbf16, #tpu.memory_space<vmem>>, vector<1x8x20x8xbf16>
    %42 = vector.shape_cast %41 : vector<1x8x20x8xbf16> to vector<8x20x8xbf16>
    %43 = vector.extract_strided_slice %42 {offsets = [0, 0, 0], sizes = [8, 16, 8], strides = [1, 1, 1]} : vector<8x20x8xbf16> to vector<8x16x8xbf16>
    %44 = vector.shape_cast %43 : vector<8x16x8xbf16> to vector<128x8xbf16>
    %c2_39 = arith.constant 2 : index
    %c0_40 = arith.constant 0 : index
    %c0_41 = arith.constant 0 : index
    %c0_42 = arith.constant 0 : index
    %45 = vector.load %arg3[%c2_39, %c0_40, %c0_41, %c0_42] : memref<3x3x8x32xbf16, #tpu.memory_space<vmem>>, vector<1x1x8x32xbf16>
    %46 = vector.shape_cast %45 : vector<1x1x8x32xbf16> to vector<8x32xbf16>
    %cst_43 = arith.constant dense<0.000000e+00> : vector<128x32xf32>
    %47 = tpu.matmul %44, %46, %cst_43 {dimension_numbers = #tpu.dot_dimension_numbers<[1], [0], [0], [1], [0, 0, 1, 1], [], []>} : vector<128x8xbf16>, vector<8x32xbf16>, vector<128x32xf32> -> vector<128x32xf32>
    %48 = arith.addf %40, %47 : vector<128x32xf32>
    %49 = vector.extract_strided_slice %42 {offsets = [0, 2, 0], sizes = [8, 16, 8], strides = [1, 1, 1]} : vector<8x20x8xbf16> to vector<8x16x8xbf16>
    %50 = vector.shape_cast %49 : vector<8x16x8xbf16> to vector<128x8xbf16>
    %c2_44 = arith.constant 2 : index
    %c1_45 = arith.constant 1 : index
    %c0_46 = arith.constant 0 : index
    %c0_47 = arith.constant 0 : index
    %51 = vector.load %arg3[%c2_44, %c1_45, %c0_46, %c0_47] : memref<3x3x8x32xbf16, #tpu.memory_space<vmem>>, vector<1x1x8x32xbf16>
    %52 = vector.shape_cast %51 : vector<1x1x8x32xbf16> to vector<8x32xbf16>
    %cst_48 = arith.constant dense<0.000000e+00> : vector<128x32xf32>
    %53 = tpu.matmul %50, %52, %cst_48 {dimension_numbers = #tpu.dot_dimension_numbers<[1], [0], [0], [1], [0, 0, 1, 1], [], []>} : vector<128x8xbf16>, vector<8x32xbf16>, vector<128x32xf32> -> vector<128x32xf32>
    %54 = arith.addf %48, %53 : vector<128x32xf32>
    %55 = vector.extract_strided_slice %42 {offsets = [0, 4, 0], sizes = [8, 16, 8], strides = [1, 1, 1]} : vector<8x20x8xbf16> to vector<8x16x8xbf16>
    %56 = vector.shape_cast %55 : vector<8x16x8xbf16> to vector<128x8xbf16>
    %c2_49 = arith.constant 2 : index
    %c2_50 = arith.constant 2 : index
    %c0_51 = arith.constant 0 : index
    %c0_52 = arith.constant 0 : index
    %57 = vector.load %arg3[%c2_49, %c2_50, %c0_51, %c0_52] : memref<3x3x8x32xbf16, #tpu.memory_space<vmem>>, vector<1x1x8x32xbf16>
    %58 = vector.shape_cast %57 : vector<1x1x8x32xbf16> to vector<8x32xbf16>
    %cst_53 = arith.constant dense<0.000000e+00> : vector<128x32xf32>
    %59 = tpu.matmul %56, %58, %cst_53 {dimension_numbers = #tpu.dot_dimension_numbers<[1], [0], [0], [1], [0, 0, 1, 1], [], []>} : vector<128x8xbf16>, vector<8x32xbf16>, vector<128x32xf32> -> vector<128x32xf32>
    %60 = arith.addf %54, %59 : vector<128x32xf32>
    %c0_54 = arith.constant 0 : index
    %c0_55 = arith.constant 0 : index
    %61 = vector.load %arg4[%c0_54, %c0_55] : memref<1x32xf32, #tpu.memory_space<vmem>>, vector<1x32xf32>
    %62 = vector.broadcast %61 : vector<1x32xf32> to vector<128x32xf32>
    %63 = arith.addf %60, %62 : vector<128x32xf32>
    %cst_56 = arith.constant 0.000000e+00 : f32
    %64 = vector.broadcast %cst_56 : f32 to vector<128x32xf32>
    %65 = arith.maximumf %63, %64 : vector<128x32xf32>
    %66 = arith.truncf %65 : vector<128x32xf32> to vector<128x32xbf16>
    %c0_57 = arith.constant 0 : index
    %c0_58 = arith.constant 0 : index
    %67 = vector.load %arg5[%c0_57, %c0_58] : memref<32x32xbf16, #tpu.memory_space<vmem>>, vector<32x32xbf16>
    %cst_59 = arith.constant dense<0.000000e+00> : vector<128x32xf32>
    %68 = tpu.matmul %66, %67, %cst_59 {dimension_numbers = #tpu.dot_dimension_numbers<[1], [0], [0], [1], [0, 0, 1, 1], [], []>} : vector<128x32xbf16>, vector<32x32xbf16>, vector<128x32xf32> -> vector<128x32xf32>
    %c0_60 = arith.constant 0 : index
    %c0_61 = arith.constant 0 : index
    %69 = vector.load %arg6[%c0_60, %c0_61] : memref<1x32xf32, #tpu.memory_space<vmem>>, vector<1x32xf32>
    %70 = vector.broadcast %69 : vector<1x32xf32> to vector<128x32xf32>
    %71 = arith.addf %68, %70 : vector<128x32xf32>
    %cst_62 = arith.constant 0.000000e+00 : f32
    %72 = vector.broadcast %cst_62 : f32 to vector<128x32xf32>
    %73 = arith.maximumf %71, %72 : vector<128x32xf32>
    %74 = vector.shape_cast %73 : vector<128x32xf32> to vector<8x16x32xf32>
    %75 = arith.truncf %74 : vector<8x16x32xf32> to vector<8x16x32xbf16>
    %c0_63 = arith.constant 0 : index
    %c0_64 = arith.constant 0 : index
    %c0_65 = arith.constant 0 : index
    %c0_66 = arith.constant 0 : index
    %76 = vector.load %arg7[%c0_63, %c0_64, %c0_65, %c0_66] : memref<1x8x16x32xbf16, #tpu.memory_space<vmem>>, vector<1x8x16x32xbf16>
    %77 = vector.shape_cast %76 : vector<1x8x16x32xbf16> to vector<8x16x32xbf16>
    %78 = vector.shape_cast %75 : vector<8x16x32xbf16> to vector<1x8x16x32xbf16>
    tpu.vector_store %arg7[%c0_63, %c0_64, %c0_65, %c0_66], %78 {strides = array<i32>} : memref<1x8x16x32xbf16, #tpu.memory_space<vmem>>, vector<1x8x16x32xbf16>,
    return
  }
  func.func @transform_0(%arg0: i32, %arg1: i32) -> (i32, i32, i32, i32) {
    %c0_i32 = arith.constant 0 : i32
    %c0_i32_0 = arith.constant 0 : i32
    %c0_i32_1 = arith.constant 0 : i32
    return %arg0, %arg1, %c0_i32, %c0_i32_0 : i32, i32, i32, i32
  }
  func.func @transform_1(%arg0: i32, %arg1: i32) -> (i32, i32, i32, i32) {
    %c0_i32 = arith.constant 0 : i32
    %c0_i32_0 = arith.constant 0 : i32
    %c0_i32_1 = arith.constant 0 : i32
    %c0_i32_2 = arith.constant 0 : i32
    %c0_i32_3 = arith.constant 0 : i32
    return %c0_i32, %c0_i32_0, %c0_i32_1, %c0_i32_2 : i32, i32, i32, i32
  }
  func.func @transform_2(%arg0: i32, %arg1: i32) -> (i32, i32) {
    %c0_i32 = arith.constant 0 : i32
    %c0_i32_0 = arith.constant 0 : i32
    %c0_i32_1 = arith.constant 0 : i32
    return %c0_i32, %c0_i32_0 : i32, i32
  }
  func.func @transform_3(%arg0: i32, %arg1: i32) -> (i32, i32) {
    %c0_i32 = arith.constant 0 : i32
    %c0_i32_0 = arith.constant 0 : i32
    %c0_i32_1 = arith.constant 0 : i32
    return %c0_i32, %c0_i32_0 : i32, i32
  }
  func.func @transform_4(%arg0: i32, %arg1: i32) -> (i32, i32) {
    %c0_i32 = arith.constant 0 : i32
    %c0_i32_0 = arith.constant 0 : i32
    %c0_i32_1 = arith.constant 0 : i32
    return %c0_i32, %c0_i32_0 : i32, i32
  }
  func.func @transform_5(%arg0: i32, %arg1: i32) -> (i32, i32, i32, i32) {
    %c0_i32 = arith.constant 0 : i32
    %c0_i32_0 = arith.constant 0 : i32
    %c0_i32_1 = arith.constant 0 : i32
    return %arg0, %arg1, %c0_i32, %c0_i32_0 : i32, i32, i32, i32
  }
}

</mosaic_0001>

<bundles_post_ra>
// kernel: assp_branch.1
= control target key start
LH: loop header
LB: loop body
LE: loop exit
PB: predicated region body
PF: predicated region fallthrough
CT: control target
= control target key end

     0   :  { %s2871_s18 = smov 0   ;;  %s2873_s19 = smov 0   ;;  %s3734_s0 = inlined_call_operand.vmem [shape: bf16[6,16,20,8], index: 0, kind: input, shape index: {}]   ;;  %s3735_s1 = inlined_call_operand.vmem [shape: bf16[3,3,8,32], index: 1, kind: input, shape index: {}]   ;;  %s3736_s2 = inlined_call_operand.vmem [shape: f32[1,32], index: 2, kind: input, shape index: {}]   ;;  %s3737_s3 = inlined_call_operand.vmem [shape: bf16[32,32], index: 3, kind: input, shape index: {}]   ;;  %s3738_s4 = inlined_call_operand.vmem [shape: f32[1,32], index: 4, kind: input, shape index: {}]   ;;  %s3739_s5 = inlined_call_operand.vmem [shape: bf16[2,16,16,32], index: 5, kind: output, shape index: {}]  }
   0x1   :  { %s2875_s20 = smov 0   ;;  %s2877_s21 = smov 0  }
   0x2   :  { %s2879_s22 = smov 0   ;;  %s2881_s23 = smov 0  }
   0x3   :  { %s2883_s24 = smov 0  }
   0x4 LB: > { %s24_s25 = sadd.s32 1, %s2831_s22  ;;  %s27_s26 = sadd.s32 1, %s2835_s23  ;;  %s2839_s24 = sphi %s2883_s24, %s15_s24   ;;  %s2835_s23 = sphi %s2881_s23, %s3749_s23   ;;  %s2831_s22 = sphi %s2879_s22, %s3748_s22   ;;  %s2827_s21 = sphi %s2877_s21, %s3747_s21   ;;  %s2823_s20 = sphi %s2875_s20, %s3746_s20   ;;  %s2819_s19 = sphi %s2873_s19, %s3745_s19   ;;  %s2815_s18 = sphi %s2871_s18, %s3744_s18  }
   0x5   : > { %p25_p0 = scmp.ge.s32.totalorder %s24_s25, 2  ;;  %p43_p1 = scmp.ne.s32.totalorder %s2819_s19, %s2815_s18 }
   0x6   : > { %p44_p2 = scmp.eq.s32.totalorder %s2839_s24, 0  ;;  %s36_s30 = sadd.s32 1, %s2819_s19 }
   0x7   : > { %s3751_s25 = smov (%p25_p0, %s24_s25), 0  ;;  %s3753_s26 = smov (!%p25_p0, %s27_s26), %s2835_s23 }
   0x8   : > { %p45_p3 = por %p44_p2, %p43_p1  ;;  %p29_p4 = scmp.ge.s32.totalorder %s3753_s26, 2 }
   0x9   : > { %s32_s27 = ssub.s32 %s2831_s22, %s3751_s25  ;;  %p2395_p6 = scmp.ge.s32.totalorder %s2839_s24, 4 }
   0xa   : > { %s3755_s26 = smov (%p29_p4, %s3753_s26), 0 }
   0xb   : > { %s31_s28 = ssub.s32 %s2835_s23, %s3755_s26  ;;  %193 = sbr.rel (%p2395_p6) target bundleno = 61 (0x3d), region = 32 }
   0xc   : > { %s33_s29 = sor.u32 %s32_s27, %s31_s28 }
   0xd   : > { %p34_p5 = scmp.eq.s32.totalorder %s33_s29, 0 }
   0xf   : > { %s2922_s6 = scalar_select %p34_p5, %s2819_s19, %s36_s30  }
  0x10   : > { %196 = sbr.rel (!%p45_p3) target bundleno = 61 (0x3d), region = 36  ;;  %s198_s7 = sand.u32 (%p45_p3), 1, %s2819_s19  }
  0x11   : > { %s2722_s8 = smul.u32 (%p45_p3), 288, %s198_s7 }
  0x12   : > { %s2723_s9 = smul.u32 (%p45_p3), 24, %s2831_s22 }
  0x13   : > { %s2726_s10 = smul.u32 (%p45_p3), 144, %s2835_s23  ;;  %s2936_s16 = scalar_lea.vmem (%p45_p3), [#allocation2], %s2722_s8 }
  0x15   : > { %s205_s11 = sadd.s32 %s2726_s10, %s2723_s9 }
  0x16   : > { %s2398_s12 = sshll.u32 %s205_s11, 2 }
  0x17   : > { %s2931_s15 = scalar_lea.vmem %s3734_s0, %s2398_s12 }
  0x18   : > { %v224_v0 = vld [vmem:[%s2931_s15] sm:$0xff]   ;;  %v228_v1 = vld [vmem:[%s2931_s15 + $0x8] sm:$0xff]   ;;  %v232_v2 = vld [vmem:[%s2931_s15 + $0x10] sm:$0xff]  }
  0x19   : > { %225 = vst [vmem:[%s2936_s16] sm:$0xff] %v224_v0   ;;  %v236_v3 = vld [vmem:[%s2931_s15 + $0x18] sm:$0xff]   ;;  %v240_v4 = vld [vmem:[%s2931_s15 + $0x20] sm:$0xff]   ;;  %v244_v5 = vld [vmem:[%s2931_s15 + $0x28] sm:$0xff]  }
  0x1a   : > { %229 = vst [vmem:[%s2936_s16 + $0x8] sm:$0xff] %v228_v1   ;;  %v248_v6 = vld [vmem:[%s2931_s15 + $0x30] sm:$0xff]   ;;  %v252_v7 = vld [vmem:[%s2931_s15 + $0x38] sm:$0xff]   ;;  %v256_v8 = vld [vmem:[%s2931_s15 + $0x40] sm:$0xff]  }
  0x1b   : > { %233 = vst [vmem:[%s2936_s16 + $0x10] sm:$0xff] %v232_v2   ;;  %v260_v9 = vld [vmem:[%s2931_s15 + $0x48] sm:$0xff]   ;;  %v264_v10 = vld [vmem:[%s2931_s15 + $0x50] sm:$0xff]   ;;  %v268_v11 = vld [vmem:[%s2931_s15 + $0x58] sm:$0xff]  }
  0x1c   : > { %237 = vst [vmem:[%s2936_s16 + $0x18] sm:$0xff] %v236_v3   ;;  %v272_v12 = vld [vmem:[%s2931_s15 + $0xc0] sm:$0xff]   ;;  %v276_v13 = vld [vmem:[%s2931_s15 + $0xc8] sm:$0xff]   ;;  %v280_v14 = vld [vmem:[%s2931_s15 + $0xd0] sm:$0xff]  }
  0x1d   : > { %241 = vst [vmem:[%s2936_s16 + $0x20] sm:$0xff] %v240_v4   ;;  %v284_v15 = vld [vmem:[%s2931_s15 + $0xd8] sm:$0xff]   ;;  %v288_v16 = vld [vmem:[%s2931_s15 + $0xe0] sm:$0xff]   ;;  %v292_v17 = vld [vmem:[%s2931_s15 + $0xe8] sm:$0xff]  }
  0x1e   : > { %245 = vst [vmem:[%s2936_s16 + $0x28] sm:$0xff] %v244_v5   ;;  %v296_v18 = vld [vmem:[%s2931_s15 + $0xf0] sm:$0xff]   ;;  %v300_v19 = vld [vmem:[%s2931_s15 + $0xf8] sm:$0xff]   ;;  %v304_v20 = vld [vmem:[%s2931_s15 + $0x100] sm:$0xff]  }
  0x1f   : > { %249 = vst [vmem:[%s2936_s16 + $0x30] sm:$0xff] %v248_v6   ;;  %v308_v21 = vld [vmem:[%s2931_s15 + $0x108] sm:$0xff]   ;;  %v312_v22 = vld [vmem:[%s2931_s15 + $0x110] sm:$0xff]   ;;  %v316_v23 = vld [vmem:[%s2931_s15 + $0x118] sm:$0xff]  }
  0x20   : > { %253 = vst [vmem:[%s2936_s16 + $0x38] sm:$0xff] %v252_v7   ;;  %v320_v24 = vld [vmem:[%s2931_s15 + $0x180] sm:$0xff]   ;;  %v324_v25 = vld [vmem:[%s2931_s15 + $0x188] sm:$0xff]   ;;  %v328_v26 = vld [vmem:[%s2931_s15 + $0x190] sm:$0xff]  }
  0x21   : > { %257 = vst [vmem:[%s2936_s16 + $0x40] sm:$0xff] %v256_v8   ;;  %v332_v27 = vld [vmem:[%s2931_s15 + $0x198] sm:$0xff]   ;;  %v336_v28 = vld [vmem:[%s2931_s15 + $0x1a0] sm:$0xff]   ;;  %v340_v29 = vld [vmem:[%s2931_s15 + $0x1a8] sm:$0xff]  }
  0x22   : > { %261 = vst [vmem:[%s2936_s16 + $0x48] sm:$0xff] %v260_v9   ;;  %v344_v30 = vld [vmem:[%s2931_s15 + $0x1b0] sm:$0xff]   ;;  %v348_v31 = vld [vmem:[%s2931_s15 + $0x1b8] sm:$0xff]   ;;  %v352_v32 = vld [vmem:[%s2931_s15 + $0x1c0] sm:$0xff]  }
  0x23   : > { %265 = vst [vmem:[%s2936_s16 + $0x50] sm:$0xff] %v264_v10   ;;  %v356_v33 = vld [vmem:[%s2931_s15 + $0x1c8] sm:$0xff]   ;;  %v360_v34 = vld [vmem:[%s2931_s15 + $0x1d0] sm:$0xff]   ;;  %v364_v35 = vld [vmem:[%s2931_s15 + $0x1d8] sm:$0xff]  }
  0x24   : > { %269 = vst [vmem:[%s2936_s16 + $0x58] sm:$0xff] %v268_v11  }
  0x25   : > { %273 = vst [vmem:[%s2936_s16 + $0x60] sm:$0xff] %v272_v12  }
  0x26   : > { %277 = vst [vmem:[%s2936_s16 + $0x68] sm:$0xff] %v276_v13  }
  0x27   : > { %281 = vst [vmem:[%s2936_s16 + $0x70] sm:$0xff] %v280_v14  }
  0x28   : > { %285 = vst [vmem:[%s2936_s16 + $0x78] sm:$0xff] %v284_v15  }
  0x29   : > { %289 = vst [vmem:[%s2936_s16 + $0x80] sm:$0xff] %v288_v16  }
  0x2a   : > { %293 = vst [vmem:[%s2936_s16 + $0x88] sm:$0xff] %v292_v17  }
  0x2b   : > { %297 = vst [vmem:[%s2936_s16 + $0x90] sm:$0xff] %v296_v18  }
  0x2c   : > { %301 = vst [vmem:[%s2936_s16 + $0x98] sm:$0xff] %v300_v19  }
  0x2d   : > { %305 = vst [vmem:[%s2936_s16 + $0xa0] sm:$0xff] %v304_v20  }
  0x2e   : > { %309 = vst [vmem:[%s2936_s16 + $0xa8] sm:$0xff] %v308_v21  }
  0x2f   : > { %313 = vst [vmem:[%s2936_s16 + $0xb0] sm:$0xff] %v312_v22  }
  0x30   : > { %317 = vst [vmem:[%s2936_s16 + $0xb8] sm:$0xff] %v316_v23  }
  0x31   : > { %321 = vst [vmem:[%s2936_s16 + $0xc0] sm:$0xff] %v320_v24  }
  0x32   : > { %325 = vst [vmem:[%s2936_s16 + $0xc8] sm:$0xff] %v324_v25  }
  0x33   : > { %329 = vst [vmem:[%s2936_s16 + $0xd0] sm:$0xff] %v328_v26  }
  0x34   : > { %333 = vst [vmem:[%s2936_s16 + $0xd8] sm:$0xff] %v332_v27  }
  0x35   : > { %337 = vst [vmem:[%s2936_s16 + $0xe0] sm:$0xff] %v336_v28  }
  0x36   : > { %341 = vst [vmem:[%s2936_s16 + $0xe8] sm:$0xff] %v340_v29  }
  0x37   : > { %345 = vst [vmem:[%s2936_s16 + $0xf0] sm:$0xff] %v344_v30  }
  0x38   : > { %349 = vst [vmem:[%s2936_s16 + $0xf8] sm:$0xff] %v348_v31  }
  0x39   : > { %353 = vst [vmem:[%s2936_s16 + $0x100] sm:$0xff] %v352_v32  }
  0x3a   : > { %357 = vst [vmem:[%s2936_s16 + $0x108] sm:$0xff] %v356_v33  }
  0x3b   : > { %361 = vst [vmem:[%s2936_s16 + $0x110] sm:$0xff] %v360_v34  }
  0x3c   : > { %365 = vst [vmem:[%s2936_s16 + $0x118] sm:$0xff] %v364_v35  }
  0x3d PF: > { %p2399_p7 = scmp.ge.s32.totalorder %s2839_s24, 1  ;;  %p534_p8 = scmp.lt.s32.totalorder %s2839_s24, 5 }
  0x3f   : > { %p535_p9 = pnand %p2399_p7, %p534_p8 }
  0x40   : > { %s541_s28 = sand.u32 (!%p535_p9), 1, %s2815_s18   ;;  %s2400_s12 = sshll.u32 (!%p535_p9), %s2823_s20, 3 }
  0x41   : > { %538 = sbr.rel (%p535_p9) target bundleno = 681 (0x2a9), region = 77  ;;  %p576_p10 = scmp.lt.s32.totalorder (!%p535_p9), %s2827_s21, 1 }
  0x42   : > { %s2725_s29 = smul.u32 (!%p535_p9), 288, %s541_s28  ;;  %p578_p11 = scmp.lt.s32.totalorder (!%p535_p9), %s2400_s12, 15 }
  0x44   : > { %s3033_s13 = scalar_lea.vmem (!%p535_p9), [#allocation2], %s2725_s29 }
  0x46   : > { %v611_v36 = vld [vmem:[%s3735_s1] sm:$0xf]  ;;  %vm746_vm0 = vcmask 1043456   ;;  %vm636_vm1 = vcmask 1042432   ;;  %v2412_v38 = vld [vmem:[%s3735_s1 + $0x4] sm:$0xf] }
  0x47   : > { %v848_v37 = vsel %vm746_vm0, %v611_v36, 0  ;;  %vm637_vm2 = vcmask 1046532   ;;  %v748_v39 = vsel %vm746_vm0, %v2412_v38, 0  ;;  %v2469_v40 = vld [vmem:[%s3735_s1 + $0x8] sm:$0xf]  ;;  %vm721_vm3 = vcmask 64512  }
  0x48   : > { %2721 = vmatpush.bf16.msra.mxu3 %v848_v37  ;;  %857 = vmatpush.bf16.msra.mxu1 %v848_v37  ;;  %v2502_v41 = vld [vmem:[%s3735_s1 + $0xc] sm:$0xf]  ;;  %vm3024_vm4 = vmor %vm636_vm1, %vm637_vm2  ;;  %v1009_v43 = vsel %vm746_vm0, %v2469_v40, 0  ;;  %v2551_v45 = vld [vmem:[%s3735_s1 + $0x10] sm:$0xf]  ;;  %vm899_vm5 = vcmask 1041408  }
  0x49   : > { %2720 = vmatpush.bf16.msra.mxu2 %v748_v39  ;;  %757 = vmatpush.bf16.msra.mxu0 %v748_v39  ;;  %v1168_v44 = vsel %vm746_vm0, %v2502_v41, 0  ;;  %v2698_v46 = vld [vmem:[%s3033_s13 + $0x30] sm:$0xff]  ;;  %v1350_v49 = vsel %vm746_vm0, %v2551_v45, 0  ;;  %v3044_v50 = vld [vmem:[%s3033_s13 + $0x38] sm:$0x3]  ;;  %v2694_v62 = vld [vmem:[%s3033_s13] sm:$0xff] }
  0x4a   : > { %v3037_v47 = vld [vmem:[%s3033_s13 + $0x30] sm:$0xf]  ;;  %v3040_v48 = vld [vmem:[%s3033_s13 + $0x34] sm:$0xf]  ;;  %v3049_v53 = vld [vmem:[%s3033_s13] sm:$0xf] }
  0x4b   : > { %v2408_v51 = vrot.slane %v3037_v47, 9  ;;  %v669_v52 = vrot.slane %v3040_v48, 5  ;;  %2457 = vmatmul.msk.bf16.vlgmr.msra.gmra.mxu3 %vm721_vm3, %v2698_v46  ;;  %v672_v54 = vrot.slane %v3044_v50, 5  ;;  %v3054_v55 = vld [vmem:[%s3033_s13 + $0x4] sm:$0xf]  ;;  %v2404_v57 = vrot.slane %v3049_v53, 9  ;;  %2453 = vmatmul.msk.bf16.vlgmr.msra.gmra.mxu1 %vm721_vm3, %v2694_v62 }
  0x4c   : > { %1177 = vmatpush.bf16.msrb.mxu3 %v1168_v44  ;;  %v3057_v56 = vld [vmem:[%s3033_s13 + $0x8] sm:$0x3]  ;;  %v641_v60 = vrot.slane %v3054_v55, 5  ;;  %v3071_v3 = vld [vmem:[%s3033_s13 + $0x40] sm:$0xf]  ;;  %v2695_v28 = vld [vmem:[%s3033_s13 + $0xc] sm:$0xff] }
  0x4d   : > { %1018 = vmatpush.bf16.msrb.mxu2 %v1009_v43  ;;  %1359 = vmatpush.bf16.msrb.mxu0 %v1350_v49  ;;  %v670_v58 = vsel %vm3024_vm4, %v2408_v51, %v669_v52  ;;  %v671_v59 = vrot.slane %v669_v52, 4  ;;  %v644_v61 = vrot.slane %v3057_v56, 5  ;;  %v3074_v6 = vld [vmem:[%s3033_s13 + $0x10] sm:$0xf]  ;;  %v676_v8 = vrot.slane %v3071_v3, 5  ;;  %v2699_v23 = vld [vmem:[%s3033_s13 + $0x3c] sm:$0xff] }
  0x4e   : > { %v705_v63 = vunpack.c.l.b16 %v670_v58  ;;  %v642_v1 = vsel %vm3024_vm4, %v2404_v57, %v641_v60  ;;  %v643_v2 = vrot.slane %v641_v60, 4  ;;  %v3080_v11 = vld [vmem:[%s3033_s13 + $0x3c] sm:$0xf]  ;;  %v3083_v12 = vld [vmem:[%s3033_s13 + $0x44] sm:$0x3]  ;;  %v648_v13 = vrot.slane %v3074_v6, 5 }
  0x4f   : > { %v673_v0 = vsel %vm3024_vm4, %v671_v59, %v672_v54  ;;  %v697_v5 = vunpack.c.l.b16 %v642_v1  ;;  %v3088_v15 = vld [vmem:[%s3033_s13 + $0xc] sm:$0xf]  ;;  %v3091_v16 = vld [vmem:[%s3033_s13 + $0x14] sm:$0x3]  ;;  %v2409_v17 = vrot.slane %v3080_v11, 9  ;;  %v678_v18 = vrot.slane %v676_v8, 4 }
  0x50   : > { %v706_v4 = vunpack.c.l.b16 %v673_v0  ;;  %v645_v7 = vsel %vm3024_vm4, %v643_v2, %v644_v61  ;;  %v679_v19 = vrot.slane %v3083_v12, 5  ;;  %v2405_v20 = vrot.slane %v3088_v15, 9  ;;  %v3110_v33 = vld [vmem:[%s3033_s13 + $0x4c] sm:$0xf]  ;;  %v3114_v35 = vld [vmem:[%s3033_s13 + $0x1c] sm:$0xf] }
  0x51   : > { %v698_v10 = vunpack.c.l.b16 %v645_v7  ;;  %v650_v21 = vrot.slane %v648_v13, 4  ;;  %v651_v22 = vrot.slane %v3091_v16, 5  ;;  %v677_v24 = vsel %vm3024_vm4, %v2409_v17, %v676_v8  ;;  %v3118_v38 = vld [vmem:[%s3033_s13 + $0x48] sm:$0xf]  ;;  %v3121_v39 = vld [vmem:[%s3033_s13 + $0x50] sm:$0x3] }
  0x52   : > { %v717_v9 = vpack.c.b16 %v706_v4, %v705_v63  ;;  %v680_v25 = vsel %vm3024_vm4, %v678_v18, %v679_v19  ;;  %v649_v26 = vsel %vm3024_vm4, %v2405_v20, %v648_v13  ;;  %v707_v29 = vunpack.c.l.b16 %v677_v24  ;;  %v3126_v41 = vld [vmem:[%s3033_s13 + $0x18] sm:$0xf]  ;;  %v3129_v43 = vld [vmem:[%s3033_s13 + $0x20] sm:$0x3]  ;;  %v2700_v54 = vld [vmem:[%s3033_s13 + $0x48] sm:$0xff]  ;;  %s3757_s21 = smov (!%p576_p10, %s2827_s21), 1 }
  0x53   : > { %v713_v14 = vpack.c.b16 %v698_v10, %v697_v5  ;;  %v652_v27 = vsel %vm3024_vm4, %v650_v21, %v651_v22  ;;  %v708_v30 = vunpack.c.l.b16 %v680_v25  ;;  %v699_v31 = vunpack.c.l.b16 %v649_v26  ;;  %v2696_v61 = vld [vmem:[%s3033_s13 + $0x18] sm:$0xff]  ;;  %v3152_v5 = vld [vmem:[%s3033_s13 + $0x54] sm:$0xf]  ;;  %v3156_v8 = vld [vmem:[%s3033_s13 + $0x28] sm:$0xf]  ;;  %s3759_s12 = smov (!%p578_p11, %s2400_s12), 15 }
  0x54   : > { %2417 = vmatmul.msk.bf16.vlgmr.msra.gmra.mxu2 %vm721_vm3, %v717_v9  ;;  %v700_v32 = vunpack.c.l.b16 %v652_v27  ;;  %v683_v36 = vrot.slane %v3110_v33, 5  ;;  %v655_v40 = vrot.slane %v3114_v35, 5  ;;  %v2410_v44 = vrot.slane %v3118_v38, 9  ;;  %v3148_v0 = vld [vmem:[%s3033_s13 + $0x58] sm:$0xf]  ;;  %s2402_s14 = sshll.u32 %s3757_s21, 5 }
  0x55   : > { %2413 = vmatmul.msk.bf16.vlgmr.msra.gmra.mxu0 %vm721_vm3, %v713_v14  ;;  %v718_v34 = vpack.c.b16 %v708_v30, %v707_v29  ;;  %v686_v46 = vrot.slane %v3121_v39, 5  ;;  %v2406_v49 = vrot.slane %v3126_v41, 9  ;;  %v658_v52 = vrot.slane %v3129_v43, 5  ;;  %v3159_v9 = vld [vmem:[%s3033_s13 + $0x5c] sm:$0x3]  ;;  %v2701_v30 = vld [vmem:[%s3033_s13 + $0x54] sm:$0xff] }
  0x56   : > { %v714_v37 = vpack.c.b16 %v700_v32, %v699_v31  ;;  %v685_v45 = vrot.slane %v683_v36, 4  ;;  %v657_v51 = vrot.slane %v655_v40, 4  ;;  %v684_v57 = vsel %vm3024_vm4, %v2410_v44, %v683_v36  ;;  %v3163_v14 = vld [vmem:[%s3033_s13 + $0x24] sm:$0xf]  ;;  %v3169_v20 = vld [vmem:[%s3033_s13 + $0x2c] sm:$0x3] }
  0x57   : > { %v656_v59 = vsel %vm3024_vm4, %v2406_v49, %v655_v40  ;;  %v709_v62 = vunpack.c.l.b16 %v684_v57  ;;  %v690_v7 = vrot.slane %v3148_v0, 5  ;;  %v2411_v13 = vrot.slane %v3152_v5, 9  ;;  %v2601_v21 = vld [vmem:[%s3735_s1 + $0x18] sm:$0xf]  ;;  %v2650_v24 = vld [vmem:[%s3735_s1 + $0x1c] sm:$0xf] }
  0x58   : > { %v687_v58 = vsel %vm3024_vm4, %v685_v45, %v686_v46  ;;  %v659_v60 = vsel %vm3024_vm4, %v657_v51, %v658_v52  ;;  %v701_v1 = vunpack.c.l.b16 %v656_v59  ;;  %v662_v17 = vrot.slane %v3156_v8, 5  ;;  %v2568_v25 = vld [vmem:[%s3735_s1 + $0x14] sm:$0xf]  ;;  %v2697_v44 = vld [vmem:[%s3033_s13 + $0x24] sm:$0xff]  ;;  %v2667_v46 = vld [vmem:[%s3735_s1 + $0x20] sm:$0xf] }
  0x59   : > { %v710_v63 = vunpack.c.l.b16 %v687_v58  ;;  %v702_v2 = vunpack.c.l.b16 %v659_v60  ;;  %v692_v18 = vrot.slane %v690_v7, 4  ;;  %v693_v19 = vrot.slane %v3159_v9, 5  ;;  %v2479_v45 = vld [vmem:[%s3033_s13 + $0x64] sm:$0xf]  ;;  %v2478_v58 = vld [vmem:[%s3033_s13 + $0x60] sm:$0xf] }
  0x5a   : > { %v1683_v22 = vsel %vm746_vm0, %v2601_v21, 0  ;;  %v664_v26 = vrot.slane %v662_v17, 4  ;;  %v665_v27 = vrot.slane %v3169_v20, 5  ;;  %v1524_v29 = vsel %vm746_vm0, %v2568_v25, 0  ;;  %v2480_v59 = vld [vmem:[%s3033_s13 + $0x68] sm:$0x3] }
  0x5b   : > { %2458 = vmatmul.msk.bf16.gmra.mxu3 %vm721_vm3, %v2699_v23  ;;  %2454 = vmatmul.msk.bf16.gmra.mxu1 %vm721_vm3, %v2695_v28  ;;  %v719_v4 = vpack.c.b16 %v710_v63, %v709_v62  ;;  %v715_v10 = vpack.c.b16 %v702_v2, %v701_v1  ;;  %v2407_v23 = vrot.slane %v3163_v14, 9  ;;  %v1865_v28 = vsel %vm746_vm0, %v2650_v24, 0  ;;  %v2702_v24 = vld [vmem:[%s3033_s13 + $0x60] sm:$0xff] }
  0x5c   : > { %1692 = vmatpush.bf16.msra.mxu2 %v1683_v22  ;;  %v691_v31 = vsel %vm3024_vm4, %v2411_v13, %v690_v7  ;;  %v694_v32 = vsel %vm3024_vm4, %v692_v18, %v693_v19  ;;  %1874 = vmatpush.bf16.msra.mxu3 %v1865_v28  ;;  %v666_v40 = vsel %vm3024_vm4, %v664_v26, %v665_v27  ;;  %v1419_v49 = vrot.slane %v2479_v45, 6  ;;  %v2482_v28 = vld [vmem:[%s3033_s13 + $0x70] sm:$0xf] }
  0x5d   : > { %1533 = vmatpush.bf16.msrb.mxu1 %v1524_v29  ;;  %v712_v36 = vunpack.c.l.b16 %v694_v32  ;;  %v2039_v51 = vsel %vm746_vm0, %v2667_v46, 0  ;;  %vm900_vm6 = vcmask 1045508   ;;  %v2560_v60 = vrot.slane %v2478_v58, 10 }
  0x5e   : > { %2048 = vmatpush.bf16.msra.mxu0 %v2039_v51  ;;  %v1422_v62 = vrot.slane %v2480_v59, 6  ;;  %v904_v63 = vrot.slane %v3054_v55, 6  ;;  %vm3206_vm7 = vmor %vm899_vm5, %vm900_vm6  ;;  %v2461_v13 = vrot.slane %v3049_v53, 10  ;;  %v907_v55 = vrot.slane %v3057_v56, 6 }
  0x5f   : > { %v1420_v7 = vsel %vm3206_vm7, %v2560_v60, %v1419_v49  ;;  %v2543_v18 = vrot.slane %v2478_v58, 9  ;;  %v1248_v21 = vrot.slane %v2480_v59, 5  ;;  %v2462_v58 = vrot.slane %v3088_v15, 10 }
  0x60   : > { %v1475_v22 = vunpack.c.l.b16 %v1420_v7  ;;  %v905_v25 = vsel %vm3206_vm7, %v2461_v13, %v904_v63  ;;  %v914_v60 = vrot.slane %v3091_v16, 6  ;;  %vm2170_vm8 = vcmask 261120  }
  0x61   : > { %v960_v29 = vunpack.c.l.b16 %v905_v25  ;;  %vm2276_vm9 = vcmask 257024  }
  0x64   : > { %2418 = vmatmul.msk.bf16.gmra.mxu2 %vm721_vm3, %v718_v34  ;;  %v711_v34 = vunpack.c.l.b16 %v691_v31  ;;  %v1426_v31 = vrot.slane %v2482_v28, 6 }
  0x65   : > { %2414 = vmatmul.msk.bf16.gmra.mxu0 %vm721_vm3, %v714_v37  ;;  %v663_v37 = vsel %vm3024_vm4, %v2407_v23, %v662_v17  ;;  %v906_v17 = vrot.slane %v904_v63, 4 }
  0x66   : > { %v703_v52 = vunpack.c.l.b16 %v663_v37  ;;  %v720_v57 = vpack.c.b16 %v712_v36, %v711_v34  ;;  %v2481_v36 = vld [vmem:[%s3033_s13 + $0x6c] sm:$0xf]  ;;  %v2483_v37 = vld [vmem:[%s3033_s13 + $0x74] sm:$0x3] }
  0x67   : > { %v908_v26 = vsel %vm3206_vm7, %v906_v17, %v907_v55  ;;  %v1429_v46 = vrot.slane %v2483_v37, 6  ;;  %v2485_v55 = vld [vmem:[%s3033_s13 + $0x7c] sm:$0xf] }
  0x6b   : > { %2459 = vmatmul.msk.bf16.gmra.mxu3 %vm721_vm3, %v2700_v54  ;;  %2455 = vmatmul.msk.bf16.gmra.mxu1 %vm721_vm3, %v2696_v61  ;;  %v704_v54 = vunpack.c.l.b16 %v666_v40  ;;  %v1421_v61 = vrot.slane %v1419_v49, 4  ;;  %v911_v49 = vrot.slane %v3074_v6, 6 }
  0x6d   : > { %v716_v1 = vpack.c.b16 %v704_v54, %v703_v52  ;;  %v1252_v52 = vrot.slane %v2482_v28, 5  ;;  %v913_v59 = vrot.slane %v911_v49, 4  ;;  %v912_v7 = vsel %vm3206_vm7, %v2462_v58, %v911_v49 }
  0x6e   : > { %v962_v17 = vunpack.c.l.b16 %v912_v7 }
  0x6f   : > { %v1254_v6 = vrot.slane %v1252_v52, 4 }
  0x74   : > { %2419 = vmatmul.msk.bf16.gmra.mxu2 %vm721_vm3, %v719_v4  ;;  %v1245_v4 = vrot.slane %v2479_v45, 5  ;;  %v1428_v45 = vrot.slane %v1426_v31, 4 }
  0x75   : > { %2415 = vmatmul.msk.bf16.gmra.mxu0 %vm721_vm3, %v715_v10  ;;  %v1423_v10 = vsel %vm3206_vm7, %v1421_v61, %v1422_v62  ;;  %v2544_v61 = vrot.slane %v2481_v36, 9  ;;  %v1255_v62 = vrot.slane %v2483_v37, 5 }
  0x76   : > { %v1247_v19 = vrot.slane %v1245_v4, 4  ;;  %v1476_v23 = vunpack.c.l.b16 %v1423_v10  ;;  %v1246_v53 = vsel %vm3024_vm4, %v2543_v18, %v1245_v4  ;;  %v2703_v4 = vld [vmem:[%s3033_s13 + $0x6c] sm:$0xff]  ;;  %v915_v10 = vsel %vm3206_vm7, %v913_v59, %v914_v60 }
  0x77   : > { %v1301_v32 = vunpack.c.l.b16 %v1246_v53  ;;  %v1253_v15 = vsel %vm3024_vm4, %v2544_v61, %v1252_v52  ;;  %v1256_v16 = vsel %vm3024_vm4, %v1254_v6, %v1255_v62  ;;  %v963_v18 = vunpack.c.l.b16 %v915_v10  ;;  %v2487_v6 = vld [vmem:[%s3033_s13 + $0x84] sm:$0xf]  ;;  %v2489_v62 = vld [vmem:[%s3033_s13 + $0x8c] sm:$0x3] }
  0x78   : > { %v1249_v56 = vsel %vm3024_vm4, %v1247_v19, %v1248_v21  ;;  %v1491_v27 = vpack.c.b16 %v1476_v23, %v1475_v22  ;;  %v1433_v19 = vrot.slane %v2485_v55, 6  ;;  %v1303_v21 = vunpack.c.l.b16 %v1253_v15  ;;  %v2484_v23 = vld [vmem:[%s3033_s13 + $0x78] sm:$0xf] }
  0x79   : > { %v1302_v34 = vunpack.c.l.b16 %v1249_v56  ;;  %v1304_v22 = vunpack.c.l.b16 %v1256_v16  ;;  %v977_v25 = vpack.c.b16 %v963_v18, %v962_v17  ;;  %v2545_v37 = vrot.slane %v2484_v23, 9 }
  0x7a   : > { %v1435_v53 = vrot.slane %v1433_v19, 4  ;;  %v1443_v7 = vrot.slane %v2489_v62, 6  ;;  %v925_v10 = vrot.slane %v3156_v8, 6  ;;  %v2464_v17 = vrot.slane %v3163_v14, 10 }
  0x7b   : > { %2460 = vmatmul.msk.bf16.gmra.mxu3 %vm721_vm3, %v2701_v30  ;;  %2456 = vmatmul.msk.bf16.gmra.mxu1 %vm721_vm3, %v2697_v44  ;;  %v961_v30 = vunpack.c.l.b16 %v908_v26  ;;  %v2561_v44 = vrot.slane %v2481_v36, 10  ;;  %v1317_v51 = vpack.c.b16 %v1302_v34, %v1301_v32  ;;  %v2562_v26 = vrot.slane %v2484_v23, 10 }
  0x7c   : > { %v1318_v28 = vpack.c.b16 %v1304_v22, %v1303_v21  ;;  %v2463_v32 = vrot.slane %v3126_v41, 10  ;;  %v921_v36 = vrot.slane %v3129_v43, 6  ;;  %v927_v18 = vrot.slane %v925_v10, 4 }
  0x7d   : > { %v976_v40 = vpack.c.b16 %v961_v30, %v960_v29  ;;  %v1427_v54 = vsel %vm3206_vm7, %v2561_v44, %v1426_v31  ;;  %v1259_v29 = vrot.slane %v2485_v55, 5  ;;  %v1434_v30 = vsel %vm3206_vm7, %v2562_v26, %v1433_v19 }
  0x7e   : > { %v1477_v63 = vunpack.c.l.b16 %v1427_v54  ;;  %v1479_v44 = vunpack.c.l.b16 %v1434_v30  ;;  %v2488_v54 = vld [vmem:[%s3033_s13 + $0x88] sm:$0xf]  ;;  %v928_v19 = vrot.slane %v3169_v20, 6  ;;  %v2546_v21 = vrot.slane %v2487_v6, 9 }
  0x7f   : > { %v1260_v41 = vsel %vm3024_vm4, %v2545_v37, %v1259_v29  ;;  %v1440_v59 = vrot.slane %v2488_v54, 6  ;;  %v1266_v16 = vrot.slane %v2488_v54, 5  ;;  %v1269_v22 = vrot.slane %v2489_v62, 5 }
  0x80   : > { %v1305_v60 = vunpack.c.l.b16 %v1260_v41  ;;  %v926_v26 = vsel %vm3206_vm7, %v2464_v17, %v925_v10  ;;  %v935_v54 = vrot.slane %v3044_v50, 6  ;;  %v939_v17 = vrot.slane %v3071_v3, 6 }
  0x81   : > { %v1268_v8 = vrot.slane %v1266_v16, 4  ;;  %v1267_v14 = vsel %vm3024_vm4, %v2546_v21, %v1266_v16  ;;  %v942_v3 = vrot.slane %v3083_v12, 6 }
  0x83   : > { %v1270_v20 = vsel %vm3024_vm4, %v1268_v8, %v1269_v22 }
  0x84   : > { %2420 = vmatmul.msk.bf16.gmra.mxu2 %vm721_vm3, %v720_v57  ;;  %v1430_v57 = vsel %vm3206_vm7, %v1428_v45, %v1429_v46  ;;  %v2704_v46 = vld [vmem:[%s3033_s13 + $0x78] sm:$0xff] }
  0x85   : > { %2416 = vmatmul.msk.bf16.gmra.mxu0 %vm721_vm3, %v716_v1  ;;  %v1478_v1 = vunpack.c.l.b16 %v1430_v57 }
  0x87   : > { %v1492_v13 = vpack.c.b16 %v1478_v1, %v1477_v63  ;;  %v2563_v1 = vrot.slane %v2487_v6, 10 }
  0x8b   : > { %2535 = vmatmul.msk.bf16.vlgmr.msrb.gmra.mxu3 %vm721_vm3, %v2702_v24  ;;  %2569 = vmatmul.msk.bf16.vlgmr.msrb.gmra.mxu1 %vm721_vm3, %v1491_v27  ;;  %v2486_v24 = vld [vmem:[%s3033_s13 + $0x80] sm:$0x3]  ;;  %v918_v27 = vrot.slane %v3114_v35, 6  ;;  %v1261_v35 = vrot.slane %v1259_v29, 4 }
  0x8c   : > { %v1436_v56 = vrot.slane %v2486_v24, 6 }
  0x8d   : > { %v920_v34 = vrot.slane %v918_v27, 4  ;;  %v919_v49 = vsel %vm3206_vm7, %v2463_v32, %v918_v27  ;;  %v2491_v27 = vld [vmem:[%s3033_s13 + $0x94] sm:$0xf]  ;;  %v1308_v32 = vunpack.c.l.b16 %v1270_v20 }
  0x8e   : > { %v1437_v31 = vsel %vm3206_vm7, %v1435_v53, %v1436_v56  ;;  %v964_v57 = vunpack.c.l.b16 %v919_v49  ;;  %v929_v53 = vsel %vm3206_vm7, %v927_v18, %v928_v19  ;;  %v1447_v30 = vrot.slane %v2491_v27, 6  ;;  %v2493_v18 = vld [vmem:[%s3033_s13 + $0x9c] sm:$0xf]  ;;  %v2495_v19 = vld [vmem:[%s3033_s13 + $0xa4] sm:$0x3] }
  0x8f   : > { %v1480_v45 = vunpack.c.l.b16 %v1437_v31  ;;  %v967_v29 = vunpack.c.l.b16 %v929_v53  ;;  %v1307_v31 = vunpack.c.l.b16 %v1267_v14  ;;  %v1273_v49 = vrot.slane %v2491_v27, 5 }
  0x90   : > { %v2565_v8 = vrot.slane %v2493_v18, 10  ;;  %v941_v53 = vrot.slane %v939_v17, 4 }
  0x91   : > { %v1493_v52 = vpack.c.b16 %v1480_v45, %v1479_v44  ;;  %v932_v45 = vrot.slane %v3040_v48, 6  ;;  %v1275_v48 = vrot.slane %v1273_v49, 4 }
  0x94   : > { %2470 = vmatmul.msk.bf16.vlgmr.msrb.gmra.mxu2 %vm721_vm3, %v976_v40  ;;  %v1262_v40 = vrot.slane %v2486_v24, 5 }
  0x95   : > { %2552 = vmatmul.msk.bf16.vlgmr.msrb.gmra.mxu0 %vm721_vm3, %v1317_v51  ;;  %v922_v51 = vsel %vm3206_vm7, %v920_v34, %v921_v36  ;;  %v2490_v34 = vld [vmem:[%s3033_s13 + $0x90] sm:$0xf]  ;;  %v2492_v36 = vld [vmem:[%s3033_s13 + $0x98] sm:$0x3] }
  0x96   : > { %v1263_v43 = vsel %vm3024_vm4, %v1261_v35, %v1262_v40  ;;  %v965_v58 = vunpack.c.l.b16 %v922_v51  ;;  %v2564_v35 = vrot.slane %v2490_v34, 10  ;;  %v1449_v40 = vrot.slane %v1447_v30, 4 }
  0x97   : > { %v1306_v61 = vunpack.c.l.b16 %v1263_v43  ;;  %v1450_v44 = vrot.slane %v2492_v36, 6  ;;  %v2465_v43 = vrot.slane %v3037_v47, 10 }
  0x98   : > { %v978_v63 = vpack.c.b16 %v965_v58, %v964_v57  ;;  %v1448_v51 = vsel %vm3206_vm7, %v2564_v35, %v1447_v30  ;;  %v2547_v57 = vrot.slane %v2490_v34, 9  ;;  %v1276_v58 = vrot.slane %v2492_v36, 5  ;;  %v2707_v35 = vld [vmem:[%s3033_s13 + $0x9c] sm:$0xff] }
  0x99   : > { %v1319_v15 = vpack.c.b16 %v1306_v61, %v1305_v60  ;;  %v1451_v41 = vsel %vm3206_vm7, %v1449_v40, %v1450_v44  ;;  %v2706_v61 = vld [vmem:[%s3033_s13 + $0x90] sm:$0xff]  ;;  %v933_v6 = vsel %vm3206_vm7, %v2465_v43, %v932_v45  ;;  %v1283_v34 = vrot.slane %v2495_v19, 5  ;;  %v2497_v43 = vld [vmem:[%s3033_s13 + $0xac] sm:$0xf] }
  0x9a   : > { %v1484_v60 = vunpack.c.l.b16 %v1451_v41  ;;  %v1274_v47 = vsel %vm3024_vm4, %v2547_v57, %v1273_v49  ;;  %v1277_v50 = vsel %vm3024_vm4, %v1275_v48, %v1276_v58  ;;  %v943_v40 = vsel %vm3206_vm7, %v941_v53, %v942_v3 }
  0x9b   : > { %2536 = vmatmul.msk.bf16.gmra.mxu3 %vm721_vm3, %v2703_v4  ;;  %2570 = vmatmul.msk.bf16.gmra.mxu1 %vm721_vm3, %v1492_v13  ;;  %v1442_v4 = vrot.slane %v1440_v59, 4  ;;  %v1441_v13 = vsel %vm3206_vm7, %v2563_v1, %v1440_v59  ;;  %v1483_v59 = vunpack.c.l.b16 %v1448_v51  ;;  %v2494_v1 = vld [vmem:[%s3033_s13 + $0xa0] sm:$0xf]  ;;  %v1309_v16 = vunpack.c.l.b16 %v1274_v47 }
  0x9c   : > { %v1481_v23 = vunpack.c.l.b16 %v1441_v13  ;;  %v1310_v13 = vunpack.c.l.b16 %v1277_v50  ;;  %v1280_v14 = vrot.slane %v2494_v1, 5 }
  0x9d   : > { %v1444_v55 = vsel %vm3206_vm7, %v1442_v4, %v1443_v7  ;;  %v968_v7 = vunpack.c.l.b16 %v933_v6  ;;  %v2496_v6 = vld [vmem:[%s3033_s13 + $0xa8] sm:$0xf] }
  0x9e   : > { %v1482_v24 = vunpack.c.l.b16 %v1444_v55  ;;  %v2566_v50 = vrot.slane %v2496_v6, 10 }
  0xa0   : > { %v1494_v56 = vpack.c.b16 %v1482_v24, %v1481_v23  ;;  %v1457_v23 = vrot.slane %v2495_v19, 6  ;;  %v1321_v24 = vpack.c.b16 %v1310_v13, %v1309_v16  ;;  %v1287_v16 = vrot.slane %v2497_v43, 5 }
  0xa1   : > { %v2549_v19 = vrot.slane %v2496_v6, 9 }
  0xa4   : > { %2471 = vmatmul.msk.bf16.gmra.mxu2 %vm721_vm3, %v977_v25  ;;  %v2705_v25 = vld [vmem:[%s3033_s13 + $0x84] sm:$0xff] }
  0xa5   : > { %2553 = vmatmul.msk.bf16.gmra.mxu0 %vm721_vm3, %v1318_v28  ;;  %v966_v28 = vunpack.c.l.b16 %v926_v26 }
  0xa7   : > { %v979_v37 = vpack.c.b16 %v967_v29, %v966_v28  ;;  %v2548_v29 = vrot.slane %v2493_v18, 9 }
  0xa9   : > { %v1281_v49 = vsel %vm3024_vm4, %v2548_v29, %v1280_v14 }
  0xaa   : > { %v1311_v57 = vunpack.c.l.b16 %v1281_v49 }
  0xab   : > { %2537 = vmatmul.msk.bf16.gmra.mxu3 %vm721_vm3, %v2704_v46  ;;  %2571 = vmatmul.msk.bf16.gmra.mxu1 %vm721_vm3, %v1493_v52  ;;  %v1320_v46 = vpack.c.b16 %v1308_v32, %v1307_v31  ;;  %v934_v52 = vrot.slane %v932_v45, 4  ;;  %v1282_v32 = vrot.slane %v1280_v14, 4 }
  0xad   : > { %v936_v62 = vsel %vm3206_vm7, %v934_v52, %v935_v54  ;;  %v1284_v51 = vsel %vm3024_vm4, %v1282_v32, %v1283_v34  ;;  %v1461_v54 = vrot.slane %v2497_v43, 6 }
  0xae   : > { %v969_v10 = vunpack.c.l.b16 %v936_v62  ;;  %v1312_v48 = vunpack.c.l.b16 %v1284_v51  ;;  %v2498_v62 = vld [vmem:[%s3033_s13 + $0xb0] sm:$0x3] }
  0xb0   : > { %v980_v21 = vpack.c.b16 %v969_v10, %v968_v7  ;;  %v2467_v7 = vrot.slane %v3118_v38, 10 }
  0xb4   : > { %2472 = vmatmul.msk.bf16.gmra.mxu2 %vm721_vm3, %v978_v63  ;;  %v1495_v63 = vpack.c.b16 %v1484_v60, %v1483_v59 }
  0xb5   : > { %2554 = vmatmul.msk.bf16.gmra.mxu0 %vm721_vm3, %v1319_v15  ;;  %v1454_v15 = vrot.slane %v2494_v1, 6  ;;  %v1464_v1 = vrot.slane %v2498_v62, 6 }
  0xb7   : > { %v1456_v22 = vrot.slane %v1454_v15, 4  ;;  %v1455_v27 = vsel %vm3206_vm7, %v2565_v8, %v1454_v15 }
  0xb8   : > { %v1485_v36 = vunpack.c.l.b16 %v1455_v27 }
  0xb9   : > { %v1458_v28 = vsel %vm3206_vm7, %v1456_v22, %v1457_v23  ;;  %v1289_v22 = vrot.slane %v1287_v16, 4  ;;  %v1290_v23 = vrot.slane %v2498_v62, 5  ;;  %v956_v62 = vrot.slane %v3159_v9, 6 }
  0xbb   : > { %2538 = vmatmul.msk.bf16.gmra.mxu3 %vm721_vm3, %v2705_v25  ;;  %2572 = vmatmul.msk.bf16.gmra.mxu1 %vm721_vm3, %v1494_v56  ;;  %v2466_v25 = vrot.slane %v3080_v11, 10 }
  0xbd   : > { %v940_v11 = vsel %vm3206_vm7, %v2466_v25, %v939_v17  ;;  %v1462_v17 = vsel %vm3206_vm7, %v2566_v50, %v1461_v54  ;;  %v2578_v50 = vld [vmem:[%s3033_s13 + $0xc4] sm:$0xf] }
  0xbe   : > { %v970_v44 = vunpack.c.l.b16 %v940_v11  ;;  %v1291_v11 = vsel %vm3024_vm4, %v1289_v22, %v1290_v23 }
  0xc4   : > { %2473 = vmatmul.msk.bf16.gmra.mxu2 %vm721_vm3, %v979_v37  ;;  %v1486_v37 = vunpack.c.l.b16 %v1458_v28  ;;  %v1288_v28 = vsel %vm3024_vm4, %v2549_v19, %v1287_v16  ;;  %v2579_v19 = vld [vmem:[%s3033_s13 + $0xc8] sm:$0x3] }
  0xc5   : > { %2555 = vmatmul.msk.bf16.gmra.mxu0 %vm721_vm3, %v1320_v46  ;;  %v971_v46 = vunpack.c.l.b16 %v943_v40  ;;  %v1313_v34 = vunpack.c.l.b16 %v1288_v28 }
  0xc6   : > { %v1496_v41 = vpack.c.b16 %v1486_v37, %v1485_v36  ;;  %v1314_v36 = vunpack.c.l.b16 %v1291_v11 }
  0xc7   : > { %v981_v60 = vpack.c.b16 %v971_v46, %v970_v44  ;;  %v2499_v44 = vld [vmem:[%s3033_s13 + $0xb4] sm:$0xf]  ;;  %v2501_v46 = vld [vmem:[%s3033_s13 + $0xbc] sm:$0x3] }
  0xc8   : > { %v859_v4 = vpop.f32.mrf.mxu1  ;;  %v2567_v51 = vrot.slane %v2499_v44, 10  ;;  %v1471_v43 = vrot.slane %v2501_v46, 6 }
  0xcb   : > { %2539 = vmatmul.msk.bf16.gmra.mxu3 %vm721_vm3, %v2706_v61  ;;  %2573 = vmatmul.msk.bf16.gmra.mxu1 %vm721_vm3, %v1495_v63  ;;  %v946_v61 = vrot.slane %v3110_v33, 6  ;;  %v1463_v63 = vrot.slane %v1461_v54, 4  ;;  %v949_v33 = vrot.slane %v3121_v39, 6  ;;  %v1323_v54 = vpack.c.b16 %v1314_v36, %v1313_v34 }
  0xcd   : > { %v948_v15 = vrot.slane %v946_v61, 4  ;;  %v1465_v18 = vsel %vm3206_vm7, %v1463_v63, %v1464_v1  ;;  %v947_v38 = vsel %vm3206_vm7, %v2467_v7, %v946_v61  ;;  %v2468_v61 = vrot.slane %v3152_v5, 10 }
  0xce   : > { %v879_v55 = vpop.f32.mrf.mxu3  ;;  %v1488_v25 = vunpack.c.l.b16 %v1465_v18  ;;  %v972_v14 = vunpack.c.l.b16 %v947_v38  ;;  %v1297_v7 = vrot.slane %v2501_v46, 5  ;;  %v1760_v18 = vrot.slane %v2578_v50, 5  ;;  %v2577_v38 = vld [vmem:[%s3033_s13 + $0xc0] sm:$0xf] }
  0xcf   : > { %v950_v53 = vsel %vm3206_vm7, %v948_v15, %v949_v33  ;;  %v2709_v33 = vld [vmem:[%s3033_s13 + $0xb4] sm:$0xff] }
  0xd0   : > { %v3329_v56 = vpop.f32.mrf.mxu1  ;;  %v973_v27 = vunpack.c.l.b16 %v950_v53  ;;  %v1762_v53 = vrot.slane %v1760_v18, 4 }
  0xd2   : > { %v759_v26 = vpop.f32.mrf.mxu0  ;;  %v982_v40 = vpack.c.b16 %v973_v27, %v972_v14  ;;  %v1763_v14 = vrot.slane %v2579_v19, 5 }
  0xd3   : > { %v3326_v20 = vadd.f32 %v859_v4, %v759_v26  ;;  %v1322_v4 = vpack.c.b16 %v1312_v48, %v1311_v57  ;;  %v2708_v26 = vld [vmem:[%s3033_s13 + $0xa8] sm:$0xff] }
  0xd4   : > { %2474 = vmatmul.msk.bf16.gmra.mxu2 %vm721_vm3, %v980_v21  ;;  %v1764_v34 = vsel %vm3024_vm4, %v1762_v53, %v1763_v14  ;;  %v2584_v53 = vld [vmem:[%s3033_s13 + $0xdc] sm:$0xf] }
  0xd5   : > { %2556 = vmatmul.msk.bf16.gmra.mxu0 %vm721_vm3, %v1321_v24  ;;  %v1487_v24 = vunpack.c.l.b16 %v1462_v17 }
  0xd6   : > { %v881_v31 = vpop.f32.mrf.mxu3 }
  0xd7   : > { %v779_v30 = vpop.f32.mrf.mxu2  ;;  %v1497_v29 = vpack.c.b16 %v1488_v25, %v1487_v24 }
  0xd8   : > { %v3339_v12 = vadd.f32 %v879_v55, %v779_v30  ;;  %v864_v52 = vpop.f32.mrf.mxu1  ;;  %v2500_v30 = vld [vmem:[%s3033_s13 + $0xb8] sm:$0xf] }
  0xd9   : > { %v1294_v48 = vrot.slane %v2500_v30, 5 }
  0xda   : > { %v3344_v45 = vpop.f32.mrf.mxu0 }
  0xdb   : > { %2540 = vmatmul.msk.bf16.gmra.mxu3 %vm721_vm3, %v2707_v35  ;;  %2574 = vmatmul.msk.bf16.gmra.mxu1 %vm721_vm3, %v1496_v41 }
  0xde   : > { %v884_v59 = vpop.f32.mrf.mxu3 }
  0xdf   : > { %v781_v58 = vpop.f32.mrf.mxu2 }
  0xe0   : > { %v3356_v47 = vadd.f32 %v881_v31, %v781_v58  ;;  %v3362_v55 = vpop.f32.mrf.mxu1  ;;  %v1468_v31 = vrot.slane %v2500_v30, 6 }
  0xe2   : > { %v764_v10 = vpop.f32.mrf.mxu0  ;;  %v1470_v41 = vrot.slane %v1468_v31, 4 }
  0xe3   : > { %v3359_v13 = vadd.f32 %v864_v52, %v764_v10  ;;  %v953_v52 = vrot.slane %v3148_v0, 6  ;;  %v2550_v0 = vrot.slane %v2499_v44, 9 }
  0xe4   : > { %2475 = vmatmul.msk.bf16.gmra.mxu2 %vm721_vm3, %v981_v60  ;;  %v1472_v60 = vsel %vm3206_vm7, %v1470_v41, %v1471_v43  ;;  %v2581_v41 = vld [vmem:[%s3033_s13 + $0xd0] sm:$0xf] }
  0xe5   : > { %2557 = vmatmul.msk.bf16.gmra.mxu0 %vm721_vm3, %v1322_v4  ;;  %v955_v6 = vrot.slane %v953_v52, 4  ;;  %v1296_v4 = vrot.slane %v1294_v48, 4  ;;  %v1490_v15 = vunpack.c.l.b16 %v1472_v60  ;;  %v954_v5 = vsel %vm3206_vm7, %v2468_v61, %v953_v52 }
  0xe6   : > { %v886_v8 = vpop.f32.mrf.mxu3  ;;  %v974_v24 = vunpack.c.l.b16 %v954_v5  ;;  %v1767_v61 = vrot.slane %v2581_v41, 5 }
  0xe7   : > { %v784_v21 = vpop.f32.mrf.mxu2  ;;  %v957_v9 = vsel %vm3206_vm7, %v955_v6, %v956_v62  ;;  %v1298_v22 = vsel %vm3024_vm4, %v1296_v4, %v1297_v7  ;;  %v2580_v6 = vld [vmem:[%s3033_s13 + $0xcc] sm:$0xf]  ;;  %v2582_v62 = vld [vmem:[%s3033_s13 + $0xd4] sm:$0x3] }
  0xe8   : > { %v3372_v39 = vadd.f32 %v884_v59, %v784_v21  ;;  %v869_v32 = vpop.f32.mrf.mxu1  ;;  %v1469_v59 = vsel %vm3206_vm7, %v2567_v51, %v1468_v31  ;;  %v975_v25 = vunpack.c.l.b16 %v957_v9  ;;  %v1316_v28 = vunpack.c.l.b16 %v1298_v22 }
  0xe9   : > { %v1489_v10 = vunpack.c.l.b16 %v1469_v59  ;;  %v1817_v51 = vunpack.c.l.b16 %v1764_v34  ;;  %v2643_v4 = vrot.slane %v2580_v6, 9  ;;  %v1769_v7 = vrot.slane %v1767_v61, 4 }
  0xea   : > { %v3377_v3 = vpop.f32.mrf.mxu0  ;;  %v983_v31 = vpack.c.b16 %v975_v25, %v974_v24  ;;  %v1941_v24 = vrot.slane %v2581_v41, 6  ;;  %v1774_v34 = vrot.slane %v2584_v53, 5 }
  0xeb   : > { %2541 = vmatmul.msk.bf16.gmra.mxu3 %vm721_vm3, %v2708_v26  ;;  %2575 = vmatmul.msk.bf16.gmra.mxu1 %vm721_vm3, %v1497_v29  ;;  %v1498_v23 = vpack.c.b16 %v1490_v15, %v1489_v10  ;;  %v2642_v26 = vrot.slane %v2577_v38, 9  ;;  %v1770_v10 = vrot.slane %v2582_v62, 5 }
  0xee   : > { %v889_v35 = vpop.f32.mrf.mxu3 }
  0xef   : > { %v786_v37 = vpop.f32.mrf.mxu2 }
  0xf0   : > { %v3388_v49 = vadd.f32 %v886_v8, %v786_v37  ;;  %v3405_v17 = vpop.f32.mrf.mxu1  ;;  %v1295_v8 = vsel %vm3024_vm4, %v2550_v0, %v1294_v48  ;;  %v1937_v48 = vrot.slane %v2579_v19, 6  ;;  %v1768_v19 = vsel %vm3024_vm4, %v2643_v4, %v1767_v61 }
  0xf1   : > { %v1315_v27 = vunpack.c.l.b16 %v1295_v8  ;;  %v1771_v8 = vsel %vm3024_vm4, %v1769_v7, %v1770_v10  ;;  %v1818_v25 = vunpack.c.l.b16 %v1768_v19  ;;  %v1948_v10 = vrot.slane %v2584_v53, 6  ;;  %v2588_v53 = vld [vmem:[%s3033_s13 + $0xec] sm:$0x3] }
  0xf2   : > { %v769_v57 = vpop.f32.mrf.mxu0 }
  0xf3   : > { %v3391_v58 = vadd.f32 %v869_v32, %v769_v57  ;;  %v1761_v32 = vsel %vm3024_vm4, %v2642_v26, %v1760_v18  ;;  %v1324_v36 = vpack.c.b16 %v1316_v28, %v1315_v27  ;;  %v1819_v26 = vunpack.c.l.b16 %v1771_v8 }
  0xf4   : > { %2476 = vmatmul.msk.bf16.gmra.mxu2 %vm721_vm3, %v982_v40  ;;  %v1934_v40 = vrot.slane %v2578_v50, 6  ;;  %v1816_v46 = vunpack.c.l.b16 %v1761_v32  ;;  %v2660_v28 = vrot.slane %v2580_v6, 10  ;;  %v1950_v19 = vrot.slane %v1948_v10, 4 }
  0xf5   : > { %2558 = vmatmul.msk.bf16.gmra.mxu0 %vm721_vm3, %v1323_v54  ;;  %v2659_v54 = vrot.slane %v2577_v38, 10  ;;  %v2710_v38 = vld [vmem:[%s3033_s13 + $0xc0] sm:$0xff]  ;;  %v1833_v32 = vpack.c.b16 %v1819_v26, %v1818_v25 }
  0xf6   : > { %v891_v1 = vpop.f32.mrf.mxu3  ;;  %v1936_v57 = vrot.slane %v1934_v40, 4  ;;  %v1832_v60 = vpack.c.b16 %v1817_v51, %v1816_v46  ;;  %v1942_v46 = vsel %vm3206_vm7, %v2660_v28, %v1941_v24  ;;  %v2586_v26 = vld [vmem:[%s3033_s13 + $0xe4] sm:$0xf] }
  0xf7   : > { %v789_v63 = vpop.f32.mrf.mxu2  ;;  %v1935_v50 = vsel %vm3206_vm7, %v2659_v54, %v1934_v40  ;;  %v862_v54 = vadd.f32 %v3329_v56, %v3344_v45 }
  0xf8   : > { %v3402_v16 = vadd.f32 %v889_v35, %v789_v63  ;;  %v874_v35 = vpop.f32.mrf.mxu1  ;;  %v1938_v63 = vsel %vm3206_vm7, %v1936_v57, %v1937_v48  ;;  %v1990_v15 = vunpack.c.l.b16 %v1935_v50  ;;  %v1992_v57 = vunpack.c.l.b16 %v1942_v46  ;;  %v2712_v46 = vld [vmem:[%s3033_s13 + $0xd8] sm:$0xff] }
  0xfa   : > { %v3413_v21 = vpop.f32.mrf.mxu0 }
  0xfb   : > { %2542 = vmatmul.msk.bf16.gmra.mxu3 %vm721_vm3, %v2709_v33  ;;  %2576 = vmatmul.msk.bf16.gmra.mxu1 %vm721_vm3, %v1498_v23  ;;  %v1991_v33 = vunpack.c.l.b16 %v1938_v63 }
  0xfd   : > { %v2006_v22 = vpack.c.b16 %v1991_v33, %v1990_v15  ;;  %v2587_v33 = vld [vmem:[%s3033_s13 + $0xe8] sm:$0xf] }
  0xfe   : > { %v894_v29 = vpop.f32.mrf.mxu3 }
  0xff   : > { %v791_v11 = vpop.f32.mrf.mxu2 }
 0x100   : > { %v3421_v30 = vadd.f32 %v891_v1, %v791_v11  ;;  %v2719_v1 = vld [vmem:[%s3737_s3 + $0x8] sm:$0xff]  ;;  %v1943_v11 = vrot.slane %v1941_v24, 4  ;;  %v1781_v24 = vrot.slane %v2587_v33, 5 }
 0x101   : > { %2201 = vmatpush.bf16.msra.mxu1 %v2719_v1 }
 0x102   : > { %v774_v37 = vpop.f32.mrf.mxu0 }
 0x103   : > { %v3427_v44 = vadd.f32 %v874_v35, %v774_v37  ;;  %v2583_v37 = vld [vmem:[%s3033_s13 + $0xd8] sm:$0xf]  ;;  %v2585_v35 = vld [vmem:[%s3033_s13 + $0xe0] sm:$0x3] }
 0x104   : > { %2477 = vmatmul.msk.bf16.gmra.mxu2 %vm721_vm3, %v983_v31  ;;  %v1951_v8 = vrot.slane %v2585_v35, 6 }
 0x105   : > { %2559 = vmatmul.msk.bf16.gmra.mxu0 %vm721_vm3, %v1324_v36 }
 0x106   : > { %v896_v52 = vpop.f32.mrf.mxu3  ;;  %v1952_v28 = vsel %vm3206_vm7, %v1950_v19, %v1951_v8 }
 0x107   : > { %v794_v43 = vpop.f32.mrf.mxu2 }
 0x108   : > { %v3432_v59 = vadd.f32 %v894_v29, %v794_v43  ;;  %v1944_v29 = vrot.slane %v2582_v62, 6  ;;  %v2644_v43 = vrot.slane %v2583_v37, 9  ;;  %v2711_v62 = vld [vmem:[%s3033_s13 + $0xcc] sm:$0xff] }
 0x10a   : > { %v3436_v0 = vpop.f32.mrf.mxu0  ;;  %v1945_v51 = vsel %vm3206_vm7, %v1943_v11, %v1944_v29  ;;  %v1775_v50 = vsel %vm3024_vm4, %v2644_v43, %v1774_v34  ;;  %v2645_v29 = vrot.slane %v2586_v26, 9 }
 0x10b   : > { %2651 = vmatmul.msk.bf16.vlgmr.msra.gmra.mxu3 %vm721_vm3, %v1832_v60  ;;  %v1993_v48 = vunpack.c.l.b16 %v1945_v51  ;;  %v1820_v45 = vunpack.c.l.b16 %v1775_v50 }
 0x10c   : > { %v1782_v51 = vsel %vm3024_vm4, %v2645_v29, %v1781_v24 }
 0x10d   : > { %v2007_v4 = vpack.c.b16 %v1993_v48, %v1992_v57  ;;  %v1955_v57 = vrot.slane %v2587_v33, 6 }
 0x10e   : > { %v1179_v9 = vpop.f32.mrf.mxu3 }
 0x10f   : > { %v796_v5 = vpop.f32.mrf.mxu2  ;;  %v1957_v50 = vrot.slane %v1955_v57, 4 }
 0x110   : > { %v3446_v18 = vadd.f32 %v896_v52, %v796_v5  ;;  %v1776_v52 = vrot.slane %v1774_v34, 4 }
 0x112   : > { %v1361_v23 = vpop.f32.mrf.mxu0 }
 0x114   : > { %2634 = vmatmul.msk.bf16.vlgmr.msra.gmra.mxu2 %vm721_vm3, %v2710_v38  ;;  %v2661_v38 = vrot.slane %v2583_v37, 10 }
 0x115   : > { %2668 = vmatmul.msk.bf16.vlgmr.msra.gmra.mxu0 %vm721_vm3, %v2006_v22 }
 0x116   : > { %v1181_v27 = vpop.f32.mrf.mxu3 }
 0x117   : > { %v1020_v14 = vpop.f32.mrf.mxu2 }
 0x118   : > { %v1060_v31 = vadd.f32 %v1020_v14, %v3326_v20  ;;  %v1777_v20 = vrot.slane %v2585_v35, 5 }
 0x11a   : > { %v1219_v36 = vadd.f32 %v1179_v9, %v1060_v31  ;;  %v1363_v40 = vpop.f32.mrf.mxu0  ;;  %v1778_v63 = vsel %vm3024_vm4, %v1776_v52, %v1777_v20  ;;  %v1783_v31 = vrot.slane %v1781_v24, 4 }
 0x11b   : > { %2652 = vmatmul.msk.bf16.gmra.mxu3 %vm721_vm3, %v1833_v32  ;;  %v1821_v15 = vunpack.c.l.b16 %v1778_v63  ;;  %v867_v32 = vadd.f32 %v3362_v55, %v3377_v3  ;;  %v1822_v3 = vunpack.c.l.b16 %v1782_v51  ;;  %v1958_v63 = vrot.slane %v2588_v53, 6 }
 0x11c   : > { %v3463_v41 = vadd.f32 %v1361_v23, %v1219_v36  ;;  %v1995_v36 = vunpack.c.l.b16 %v1952_v28 }
 0x11d   : > { %v1834_v23 = vpack.c.b16 %v1821_v15, %v1820_v45  ;;  %v2589_v45 = vld [vmem:[%s3033_s13 + $0xf0] sm:$0xf]  ;;  %v2591_v15 = vld [vmem:[%s3033_s13 + $0xf8] sm:$0x3] }
 0x11e   : > { %v1184_v61 = vpop.f32.mrf.mxu3  ;;  %v2646_v19 = vrot.slane %v2589_v45, 9  ;;  %v1965_v51 = vrot.slane %v2591_v15, 6 }
 0x11f   : > { %v1022_v60 = vpop.f32.mrf.mxu2 }
 0x120   : > { %v1061_v6 = vadd.f32 %v1022_v60, %v862_v54  ;;  %v2590_v60 = vld [vmem:[%s3033_s13 + $0xf4] sm:$0xf] }
 0x122   : > { %v1220_v1 = vadd.f32 %v1181_v27, %v1061_v6  ;;  %v1366_v7 = vpop.f32.mrf.mxu0  ;;  %v1949_v27 = vsel %vm3206_vm7, %v2661_v38, %v1948_v10 }
 0x123   : > { %v1994_v34 = vunpack.c.l.b16 %v1949_v27 }
 0x124   : > { %2635 = vmatmul.msk.bf16.gmra.mxu2 %vm721_vm3, %v2711_v62  ;;  %v3474_v56 = vadd.f32 %v1363_v40, %v1220_v1  ;;  %v2662_v62 = vrot.slane %v2586_v26, 10 }
 0x125   : > { %2669 = vmatmul.msk.bf16.gmra.mxu0 %vm721_vm3, %v2007_v4  ;;  %v2008_v20 = vpack.c.b16 %v1995_v36, %v1994_v34  ;;  %v2593_v36 = vld [vmem:[%s3033_s13 + $0x100] sm:$0xf] }
 0x126   : > { %v1186_v9 = vpop.f32.mrf.mxu3 }
 0x127   : > { %v1025_v5 = vpop.f32.mrf.mxu2 }
 0x128   : > { %v1062_v22 = vadd.f32 %v1025_v5, %v3359_v13  ;;  %v1784_v13 = vrot.slane %v2588_v53, 5  ;;  %v1956_v5 = vsel %vm3206_vm7, %v2662_v62, %v1955_v57  ;;  %v2592_v57 = vld [vmem:[%s3033_s13 + $0xfc] sm:$0xf]  ;;  %v2718_v62 = vld [vmem:[%s3737_s3] sm:$0xff] }
 0x129   : > { %2202 = vmatpush.bf16.msra.mxu1 %v2718_v62 }
 0x12a   : > { %v1221_v25 = vadd.f32 %v1184_v61, %v1062_v22  ;;  %v1368_v14 = vpop.f32.mrf.mxu0  ;;  %v1785_v43 = vsel %vm3024_vm4, %v1783_v31, %v1784_v13  ;;  %v872_v22 = vadd.f32 %v3405_v17, %v3413_v21 }
 0x12b   : > { %2653 = vmatmul.msk.bf16.gmra.mxu3 %vm721_vm3, %v1834_v23  ;;  %v1823_v48 = vunpack.c.l.b16 %v1785_v43  ;;  %v1996_v23 = vunpack.c.l.b16 %v1956_v5  ;;  %v2714_v5 = vld [vmem:[%s3033_s13 + $0xf0] sm:$0xff] }
 0x12c   : > { %v3485_v11 = vadd.f32 %v1366_v7, %v1221_v25  ;;  %v1788_v7 = vrot.slane %v2590_v60, 5 }
 0x12d   : > { %v1835_v4 = vpack.c.b16 %v1823_v48, %v1822_v3  ;;  %v2594_v3 = vld [vmem:[%s3033_s13 + $0x104] sm:$0x3]  ;;  %v876_v48 = vpop.f32.mrf.mxu1 }
 0x12e   : > { %v1189_v35 = vpop.f32.mrf.mxu3  ;;  %v1790_v8 = vrot.slane %v1788_v7, 4  ;;  %v1789_v27 = vsel %vm3024_vm4, %v2646_v19, %v1788_v7 }
 0x12f   : > { %v1027_v37 = vpop.f32.mrf.mxu2  ;;  %v1824_v21 = vunpack.c.l.b16 %v1789_v27  ;;  %v2664_v27 = vrot.slane %v2592_v57, 10 }
 0x130   : > { %v1063_v40 = vadd.f32 %v1027_v37, %v867_v32  ;;  %v1962_v32 = vrot.slane %v2590_v60, 6 }
 0x132   : > { %v1222_v52 = vadd.f32 %v1186_v9, %v1063_v40  ;;  %v1371_v54 = vpop.f32.mrf.mxu0  ;;  %v1959_v9 = vsel %vm3206_vm7, %v1957_v50, %v1958_v63  ;;  %v2663_v40 = vrot.slane %v2589_v45, 10 }
 0x133   : > { %v1997_v24 = vunpack.c.l.b16 %v1959_v9 }
 0x134   : > { %2636 = vmatmul.msk.bf16.gmra.mxu2 %vm721_vm3, %v2712_v46  ;;  %v3496_v55 = vadd.f32 %v1368_v14, %v1222_v52  ;;  %v2713_v14 = vld [vmem:[%s3033_s13 + $0xe4] sm:$0xff]  ;;  %v1964_v46 = vrot.slane %v1962_v32, 4 }
 0x135   : > { %2670 = vmatmul.msk.bf16.gmra.mxu0 %vm721_vm3, %v2008_v20  ;;  %v2009_v31 = vpack.c.b16 %v1997_v24, %v1996_v23  ;;  %v1795_v20 = vrot.slane %v2593_v36, 5  ;;  %v1969_v23 = vrot.slane %v2593_v36, 6  ;;  %v2597_v36 = vld [vmem:[%s3033_s13 + $0x110] sm:$0x3] }
 0x136   : > { %v1191_v6 = vpop.f32.mrf.mxu3 }
 0x137   : > { %v1030_v61 = vpop.f32.mrf.mxu2  ;;  %v1797_v63 = vrot.slane %v1795_v20, 4 }
 0x138   : > { %v1064_v1 = vadd.f32 %v1030_v61, %v3391_v58  ;;  %v1791_v58 = vrot.slane %v2591_v15, 5  ;;  %v1963_v61 = vsel %vm3206_vm7, %v2663_v40, %v1962_v32 }
 0x139   : > { %v1998_v7 = vunpack.c.l.b16 %v1963_v61 }
 0x13a   : > { %v1223_v10 = vadd.f32 %v1189_v35, %v1064_v1  ;;  %v1373_v33 = vpop.f32.mrf.mxu0  ;;  %v1792_v28 = vsel %vm3024_vm4, %v1790_v8, %v1791_v58  ;;  %v1798_v1 = vrot.slane %v2594_v3, 5 }
 0x13b   : > { %2654 = vmatmul.msk.bf16.gmra.mxu3 %vm721_vm3, %v1835_v4  ;;  %v1825_v34 = vunpack.c.l.b16 %v1792_v28  ;;  %v877_v4 = vadd.f32 %v876_v48, %v3436_v0  ;;  %v1971_v28 = vrot.slane %v1969_v23, 4  ;;  %v2715_v48 = vld [vmem:[%s3033_s13 + $0xfc] sm:$0xff] }
 0x13c   : > { %v3507_v38 = vadd.f32 %v1371_v54, %v1223_v10  ;;  %v1799_v19 = vsel %vm3024_vm4, %v1797_v63, %v1798_v1 }
 0x13d   : > { %v1836_v52 = vpack.c.b16 %v1825_v34, %v1824_v21  ;;  %v2595_v34 = vld [vmem:[%s3033_s13 + $0x108] sm:$0xf] }
 0x13e   : > { %v1194_v26 = vpop.f32.mrf.mxu3 }
 0x13f   : > { %v1032_v25 = vpop.f32.mrf.mxu2 }
 0x140   : > { %v1065_v53 = vadd.f32 %v1032_v25, %v872_v22  ;;  %v1827_v25 = vunpack.c.l.b16 %v1799_v19 }
 0x142   : > { %v1224_v29 = vadd.f32 %v1191_v6, %v1065_v53  ;;  %v1376_v13 = vpop.f32.mrf.mxu0  ;;  %v1966_v6 = vsel %vm3206_vm7, %v1964_v46, %v1965_v51  ;;  %v2648_v51 = vrot.slane %v2595_v34, 9 }
 0x143   : > { %v1999_v10 = vunpack.c.l.b16 %v1966_v6 }
 0x144   : > { %2637 = vmatmul.msk.bf16.gmra.mxu2 %vm721_vm3, %v2713_v14  ;;  %v3518_v17 = vadd.f32 %v1373_v33, %v1224_v29  ;;  %v1972_v29 = vrot.slane %v2594_v3, 6 }
 0x145   : > { %2671 = vmatmul.msk.bf16.gmra.mxu0 %vm721_vm3, %v2009_v31  ;;  %v2010_v58 = vpack.c.b16 %v1999_v10, %v1998_v7 }
 0x146   : > { %v1196_v35 = vpop.f32.mrf.mxu3  ;;  %v1973_v40 = vsel %vm3206_vm7, %v1971_v28, %v1972_v29 }
 0x147   : > { %v1035_v37 = vpop.f32.mrf.mxu2 }
 0x148   : > { %v1066_v43 = vadd.f32 %v1035_v37, %v3427_v44  ;;  %v2647_v44 = vrot.slane %v2592_v57, 9 }
 0x14a   : > { %v1225_v54 = vadd.f32 %v1194_v26, %v1066_v43  ;;  %v1378_v60 = vpop.f32.mrf.mxu0  ;;  %v1796_v9 = vsel %vm3024_vm4, %v2647_v44, %v1795_v20  ;;  %v2596_v26 = vld [vmem:[%s3033_s13 + $0x10c] sm:$0xf]  ;;  %v2001_v20 = vunpack.c.l.b16 %v1973_v40 }
 0x14b   : > { %2655 = vmatmul.msk.bf16.gmra.mxu3 %vm721_vm3, %v1836_v52  ;;  %v1826_v24 = vunpack.c.l.b16 %v1796_v9  ;;  %v1802_v32 = vrot.slane %v2596_v26, 5  ;;  %v1976_v63 = vrot.slane %v2596_v26, 6 }
 0x14c   : > { %v3532_v50 = vadd.f32 %v1376_v13, %v1225_v54 }
 0x14d   : > { %v1837_v13 = vpack.c.b16 %v1827_v25, %v1826_v24  ;;  %v1804_v43 = vrot.slane %v1802_v32, 4 }
 0x14e   : > { %v1199_v15 = vpop.f32.mrf.mxu3 }
 0x14f   : > { %v1037_v45 = vpop.f32.mrf.mxu2 }
 0x150   : > { %v1067_v33 = vadd.f32 %v1037_v45, %v877_v4 }
 0x152   : > { %v1226_v8 = vadd.f32 %v1196_v35, %v1067_v33  ;;  %v1381_v22 = vpop.f32.mrf.mxu0  ;;  %v1970_v35 = vsel %vm3206_vm7, %v2664_v27, %v1969_v23  ;;  %v1978_v33 = vrot.slane %v1976_v63, 4  ;;  %v2600_v23 = vld [vmem:[%s3033_s13 + $0x11c] sm:$0x3] }
 0x153   : > { %v2000_v52 = vunpack.c.l.b16 %v1970_v35  ;;  %v1986_v42 = vrot.slane %v2600_v23, 6 }
 0x154   : > { %2638 = vmatmul.msk.bf16.gmra.mxu2 %vm721_vm3, %v2714_v5  ;;  %v3542_v0 = vadd.f32 %v1378_v60, %v1226_v8  ;;  %v1803_v60 = vsel %vm3024_vm4, %v2648_v51, %v1802_v32  ;;  %v1979_v5 = vrot.slane %v2597_v36, 6 }
 0x155   : > { %2672 = vmatmul.msk.bf16.gmra.mxu0 %vm721_vm3, %v2010_v58  ;;  %v2011_v62 = vpack.c.b16 %v2001_v20, %v2000_v52  ;;  %v1828_v4 = vunpack.c.l.b16 %v1803_v60 }
 0x156   : > { %v1201_v14 = vpop.f32.mrf.mxu3  ;;  %v1980_v26 = vsel %vm3206_vm7, %v1978_v33, %v1979_v5 }
 0x157   : > { %v1040_v53 = vpop.f32.mrf.mxu2  ;;  %v2003_v29 = vunpack.c.l.b16 %v1980_v26 }
 0x158   : > { %v1068_v31 = vadd.f32 %v1040_v53, %v3339_v12  ;;  %v1805_v12 = vrot.slane %v2597_v36, 5 }
 0x15a   : > { %v1227_v21 = vadd.f32 %v1199_v15, %v1068_v31  ;;  %v1383_v37 = vpop.f32.mrf.mxu0  ;;  %v1806_v61 = vsel %vm3024_vm4, %v1804_v43, %v1805_v12  ;;  %v2665_v15 = vrot.slane %v2595_v34, 10  ;;  %v1535_v43 = vpop.f32.mrf.mxu1 }
 0x15b   : > { %2656 = vmatmul.msk.bf16.gmra.mxu3 %vm721_vm3, %v1837_v13  ;;  %v1829_v7 = vunpack.c.l.b16 %v1806_v61 }
 0x15c   : > { %v3553_v46 = vadd.f32 %v1381_v22, %v1227_v21  ;;  %v2598_v22 = vld [vmem:[%s3033_s13 + $0x114] sm:$0xf]  ;;  %v1977_v25 = vsel %vm3206_vm7, %v2665_v15, %v1976_v63  ;;  %v2716_v21 = vld [vmem:[%s3033_s13 + $0x108] sm:$0xff] }
 0x15d   : > { %v1838_v19 = vpack.c.b16 %v1829_v7, %v1828_v4  ;;  %v2002_v28 = vunpack.c.l.b16 %v1977_v25  ;;  %v2717_v15 = vld [vmem:[%s3033_s13 + $0x114] sm:$0xff] }
 0x15e   : > { %v1204_v57 = vpop.f32.mrf.mxu3 }
 0x15f   : > { %v1042_v54 = vpop.f32.mrf.mxu2  ;;  %v2012_v35 = vpack.c.b16 %v2003_v29, %v2002_v28 }
 0x160   : > { %v1069_v3 = vadd.f32 %v1042_v54, %v3356_v47  ;;  %v2599_v47 = vld [vmem:[%s3033_s13 + $0x118] sm:$0xf]  ;;  %s2401_s13 = sshll.u32 %s3759_s12, 1 }
 0x161   : > { %v1809_v8 = vrot.slane %v2599_v47, 5  ;;  %v1983_v51 = vrot.slane %v2599_v47, 6  ;;  %s582_s17 = sadd.s32 %s2402_s14, %s2401_s13 }
 0x162   : > { %v1228_v6 = vadd.f32 %v1201_v14, %v1069_v3  ;;  %v1386_v44 = vpop.f32.mrf.mxu0  ;;  %v2649_v14 = vrot.slane %v2598_v22, 9  ;;  %v1537_v4 = vpop.f32.mrf.mxu1  ;;  %s2403_s27 = sshll.u32 %s582_s17, 2 }
 0x163   : > { %v1811_v27 = vrot.slane %v1809_v8, 4  ;;  %v1985_v3 = vrot.slane %v1983_v51, 4  ;;  %s3664_s29 = scalar_lea.vmem %s3739_s5, %s2403_s27 }
 0x164   : > { %2639 = vmatmul.msk.bf16.gmra.mxu2 %vm721_vm3, %v2715_v48  ;;  %v3563_v1 = vadd.f32 %v1383_v37, %v1228_v6  ;;  %v1810_v34 = vsel %vm3024_vm4, %v2649_v14, %v1809_v8 }
 0x165   : > { %2673 = vmatmul.msk.bf16.gmra.mxu0 %vm721_vm3, %v2011_v62  ;;  %v1830_v52 = vunpack.c.l.b16 %v1810_v34 }
 0x166   : > { %v1206_v45 = vpop.f32.mrf.mxu3 }
 0x167   : > { %v1045_v10 = vpop.f32.mrf.mxu2 }
 0x168   : > { %v1070_v9 = vadd.f32 %v1045_v10, %v3372_v39  ;;  %v1812_v39 = vrot.slane %v2600_v23, 5 }
 0x16a   : > { %v1229_v58 = vadd.f32 %v1204_v57, %v1070_v9  ;;  %v1388_v24 = vpop.f32.mrf.mxu0  ;;  %v1813_v36 = vsel %vm3024_vm4, %v1811_v27, %v1812_v39  ;;  %v2666_v57 = vrot.slane %v2598_v22, 10 }
 0x16b   : > { %2657 = vmatmul.msk.bf16.gmra.mxu3 %vm721_vm3, %v1838_v19  ;;  %v1831_v20 = vunpack.c.l.b16 %v1813_v36 }
 0x16c   : > { %v3574_v53 = vadd.f32 %v1386_v44, %v1229_v58  ;;  %v1984_v62 = vsel %vm3206_vm7, %v2666_v57, %v1983_v51  ;;  %v1987_v44 = vsel %vm3206_vm7, %v1985_v3, %v1986_v42  ;;  %v1540_v58 = vpop.f32.mrf.mxu1 }
 0x16d   : > { %v1839_v60 = vpack.c.b16 %v1831_v20, %v1830_v52  ;;  %v2004_v7 = vunpack.c.l.b16 %v1984_v62  ;;  %v2005_v47 = vunpack.c.l.b16 %v1987_v44 }
 0x16e   : > { %v1209_v13 = vpop.f32.mrf.mxu3 }
 0x16f   : > { %v1047_v31 = vpop.f32.mrf.mxu2  ;;  %v2013_v5 = vpack.c.b16 %v2005_v47, %v2004_v7 }
 0x170   : > { %v1071_v32 = vadd.f32 %v1047_v31, %v3388_v49  ;;  %v1575_v31 = vadd.f32 %v1535_v43, %v3463_v41 }
 0x172   : > { %v1230_v37 = vadd.f32 %v1206_v45, %v1071_v32  ;;  %v1391_v40 = vpop.f32.mrf.mxu0 }
 0x174   : > { %2640 = vmatmul.msk.bf16.gmra.mxu2 %vm721_vm3, %v2716_v21  ;;  %v3584_v12 = vadd.f32 %v1388_v24, %v1230_v37  ;;  %v1542_v27 = vpop.f32.mrf.mxu1  ;;  %v1576_v37 = vadd.f32 %v1537_v4, %v3474_v56 }
 0x175   : > { %2674 = vmatmul.msk.bf16.gmra.mxu0 %vm721_vm3, %v2012_v35  ;;  %v1578_v4 = vadd.f32 %v1542_v27, %v3496_v55 }
 0x176   : > { %v1211_v54 = vpop.f32.mrf.mxu3 }
 0x177   : > { %v1050_v49 = vpop.f32.mrf.mxu2 }
 0x178   : > { %v1072_v48 = vadd.f32 %v1050_v49, %v3402_v16 }
 0x17a   : > { %v1231_v61 = vadd.f32 %v1209_v13, %v1072_v48  ;;  %v1393_v6 = vpop.f32.mrf.mxu0 }
 0x17b   : > { %2658 = vmatmul.msk.bf16.gmra.mxu3 %vm721_vm3, %v1839_v60 }
 0x17c   : > { %v3592_v63 = vadd.f32 %v1391_v40, %v1231_v61 }
 0x17e   : > { %v1214_v45 = vpop.f32.mrf.mxu3 }
 0x17f   : > { %v1052_v10 = vpop.f32.mrf.mxu2 }
 0x180   : > { %v1073_v16 = vadd.f32 %v1052_v10, %v3421_v30 }
 0x182   : > { %v1232_v33 = vadd.f32 %v1211_v54, %v1073_v16  ;;  %v1396_v9 = vpop.f32.mrf.mxu0  ;;  %v1577_v54 = vadd.f32 %v1540_v58, %v3485_v11 }
 0x184   : > { %2641 = vmatmul.msk.bf16.gmra.mxu2 %vm721_vm3, %v2717_v15  ;;  %v3598_v19 = vadd.f32 %v1393_v6, %v1232_v33 }
 0x185   : > { %2675 = vmatmul.msk.bf16.gmra.mxu0 %vm721_vm3, %v2013_v5 }
 0x186   : > { %v1216_v8 = vpop.f32.mrf.mxu3 }
 0x187   : > { %v1055_v2 = vpop.f32.mrf.mxu2 }
 0x188   : > { %v1074_v22 = vadd.f32 %v1055_v2, %v3432_v59  ;;  %v1545_v59 = vpop.f32.mrf.mxu1 }
 0x18a   : > { %v1233_v23 = vadd.f32 %v1214_v45, %v1074_v22  ;;  %v1398_v24 = vpop.f32.mrf.mxu0 }
 0x18c   : > { %v3602_v25 = vadd.f32 %v1396_v9, %v1233_v23  ;;  %v1579_v9 = vadd.f32 %v1545_v59, %v3507_v38 }
 0x18e   : > { %v1876_v26 = vpop.f32.mrf.mxu3 }
 0x18f   : > { %v1057_v30 = vpop.f32.mrf.mxu2 }
 0x190   : > { %v1075_v14 = vadd.f32 %v1057_v30, %v3446_v18  ;;  %v3612_v18 = vld [vmem:[%s3736_s2] ss:$0 sm:$0xff]  ;;  %v1547_v57 = vpop.f32.mrf.mxu1 }
 0x191   : > { %v1580_v27 = vadd.f32 %v1547_v57, %v3518_v17 }
 0x192   : > { %v1234_v39 = vadd.f32 %v1216_v8, %v1075_v14  ;;  %v2050_v28 = vpop.f32.mrf.mxu0 }
 0x194   : > { %v3605_v29 = vadd.f32 %v1398_v24, %v1234_v39 }
 0x196   : > { %v1878_v32 = vpop.f32.mrf.mxu3 }
 0x197   : > { %v1694_v13 = vpop.f32.mrf.mxu2 }
 0x198   : > { %v1734_v21 = vadd.f32 %v1694_v13, %v1575_v31  ;;  %v1550_v10 = vpop.f32.mrf.mxu1 }
 0x19a   : > { %v2052_v34 = vpop.f32.mrf.mxu0  ;;  %v1916_v36 = vadd.f32 %v1876_v26, %v1734_v21 }
 0x19c   : > { %v2090_v51 = vadd.f32 %v2050_v28, %v1916_v36  ;;  %v1581_v36 = vadd.f32 %v1550_v10, %v3532_v50 }
 0x19e   : > { %v1881_v40 = vpop.f32.mrf.mxu3  ;;  %v2110_v41 = vadd.f32 %v3612_v18, %v2090_v51 }
 0x19f   : > { %v1696_v35 = vpop.f32.mrf.mxu2 }
 0x1a0   : > { %v1735_v52 = vadd.f32 %v1696_v35, %v1576_v37  ;;  %v2126_v48 = vmax.f32 %v2110_v41, 0.0  ;;  %v1552_v55 = vpop.f32.mrf.mxu1 }
 0x1a2   : > { %v1917_v20 = vadd.f32 %v1878_v32, %v1735_v52  ;;  %v2055_v49 = vpop.f32.mrf.mxu0 }
 0x1a4   : > { %v2091_v43 = vadd.f32 %v2052_v34, %v1917_v20 }
 0x1a6   : > { %v2111_v3 = vadd.f32 %v3612_v18, %v2091_v43  ;;  %v1883_v42 = vpop.f32.mrf.mxu3  ;;  %v1582_v43 = vadd.f32 %v1552_v55, %v3542_v0 }
 0x1a7   : > { %v1699_v56 = vpop.f32.mrf.mxu2 }
 0x1a8   : > { %v2127_v60 = vmax.f32 %v2111_v3, 0.0  ;;  %v1736_v61 = vadd.f32 %v1699_v56, %v1577_v54  ;;  %v1555_v21 = vpop.f32.mrf.mxu1 }
 0x1aa   : > { %v2142_v6 = vpack.c.bf16 %v2127_v60, %v2126_v48  ;;  %v2057_v62 = vpop.f32.mrf.mxu0  ;;  %v1918_v44 = vadd.f32 %v1881_v40, %v1736_v61 }
 0x1ac   : > { %2684 = vmatmul.msk.bf16.vlgmr.msra.gmra.mxu1 %vm2170_vm8, %v2142_v6  ;;  %v2092_v11 = vadd.f32 %v2055_v49, %v1918_v44  ;;  %v1583_v6 = vadd.f32 %v1555_v21, %v3553_v46 }
 0x1ae   : > { %v1886_v47 = vpop.f32.mrf.mxu3  ;;  %v2112_v33 = vadd.f32 %v3612_v18, %v2092_v11 }
 0x1af   : > { %v1701_v7 = vpop.f32.mrf.mxu2 }
 0x1b0   : > { %v1737_v45 = vadd.f32 %v1701_v7, %v1578_v4  ;;  %v2128_v22 = vmax.f32 %v2112_v33, 0.0  ;;  %v1557_v54 = vpop.f32.mrf.mxu1 }
 0x1b2   : > { %v1919_v16 = vadd.f32 %v1883_v42, %v1737_v45  ;;  %v2060_v15 = vpop.f32.mrf.mxu0 }
 0x1b4   : > { %v2093_v5 = vadd.f32 %v2057_v62, %v1919_v16 }
 0x1b6   : > { %v2113_v2 = vadd.f32 %v3612_v18, %v2093_v5  ;;  %v1888_v58 = vpop.f32.mrf.mxu3 }
 0x1b7   : > { %v1704_v8 = vpop.f32.mrf.mxu2 }
 0x1b8   : > { %v2129_v23 = vmax.f32 %v2113_v2, 0.0  ;;  %v1738_v24 = vadd.f32 %v1704_v8, %v1579_v9  ;;  %v1560_v0 = vpop.f32.mrf.mxu1 }
 0x1ba   : > { %v2143_v30 = vpack.c.bf16 %v2129_v23, %v2128_v22  ;;  %v2062_v26 = vpop.f32.mrf.mxu0  ;;  %v1920_v14 = vadd.f32 %v1886_v47, %v1738_v24  ;;  %v1585_v24 = vadd.f32 %v1560_v0, %v3574_v53 }
 0x1bc   : > { %2685 = vmatmul.msk.bf16.gmra.mxu1 %vm2170_vm8, %v2143_v30  ;;  %v2094_v31 = vadd.f32 %v2060_v15, %v1920_v14  ;;  %v1584_v15 = vadd.f32 %v1557_v54, %v3563_v1 }
 0x1be   : > { %v1891_v28 = vpop.f32.mrf.mxu3  ;;  %v2114_v34 = vadd.f32 %v3612_v18, %v2094_v31 }
 0x1bf   : > { %v1706_v39 = vpop.f32.mrf.mxu2 }
 0x1c0   : > { %v1739_v13 = vadd.f32 %v1706_v39, %v1580_v27  ;;  %v2130_v51 = vmax.f32 %v2114_v34, 0.0  ;;  %v1562_v8 = vpop.f32.mrf.mxu1 }
 0x1c2   : > { %v1921_v38 = vadd.f32 %v1888_v58, %v1739_v13  ;;  %v2065_v32 = vpop.f32.mrf.mxu0 }
 0x1c4   : > { %v2095_v59 = vadd.f32 %v2062_v26, %v1921_v38  ;;  %v1586_v38 = vadd.f32 %v1562_v8, %v3584_v12 }
 0x1c6   : > { %v2115_v37 = vadd.f32 %v3612_v18, %v2095_v59  ;;  %v1893_v40 = vpop.f32.mrf.mxu3 }
 0x1c7   : > { %v1709_v35 = vpop.f32.mrf.mxu2 }
 0x1c8   : > { %v2131_v52 = vmax.f32 %v2115_v37, 0.0  ;;  %v1740_v20 = vadd.f32 %v1709_v35, %v1581_v36  ;;  %v1565_v13 = vpop.f32.mrf.mxu1 }
 0x1ca   : > { %v2144_v17 = vpack.c.bf16 %v2131_v52, %v2130_v51  ;;  %v2067_v49 = vpop.f32.mrf.mxu0  ;;  %v1922_v41 = vadd.f32 %v1891_v28, %v1740_v20 }
 0x1cc   : > { %2686 = vmatmul.msk.bf16.gmra.mxu1 %vm2170_vm8, %v2144_v17  ;;  %v2096_v56 = vadd.f32 %v2065_v32, %v1922_v41 }
 0x1ce   : > { %v1896_v3 = vpop.f32.mrf.mxu3  ;;  %v2116_v60 = vadd.f32 %v3612_v18, %v2096_v56 }
 0x1cf   : > { %v1711_v57 = vpop.f32.mrf.mxu2 }
 0x1d0   : > { %v1741_v42 = vadd.f32 %v1711_v57, %v1582_v43  ;;  %v2132_v7 = vmax.f32 %v2116_v60, 0.0  ;;  %v1567_v52 = vpop.f32.mrf.mxu1 }
 0x1d1   : > { %v1588_v57 = vadd.f32 %v1567_v52, %v3598_v19 }
 0x1d2   : > { %v1923_v50 = vadd.f32 %v1893_v40, %v1741_v42  ;;  %v2070_v48 = vpop.f32.mrf.mxu0  ;;  %v1587_v40 = vadd.f32 %v1565_v13, %v3592_v63 }
 0x1d4   : > { %v2097_v61 = vadd.f32 %v2067_v49, %v1923_v50 }
 0x1d6   : > { %v2117_v62 = vadd.f32 %v3612_v18, %v2097_v61  ;;  %v1898_v4 = vpop.f32.mrf.mxu3 }
 0x1d7   : > { %v1714_v44 = vpop.f32.mrf.mxu2 }
 0x1d8   : > { %v2133_v47 = vmax.f32 %v2117_v62, 0.0  ;;  %v1742_v10 = vadd.f32 %v1714_v44, %v1583_v6 }
 0x1da   : > { %v2145_v11 = vpack.c.bf16 %v2133_v47, %v2132_v7  ;;  %v2072_v45 = vpop.f32.mrf.mxu0  ;;  %v1924_v16 = vadd.f32 %v1896_v3, %v1742_v10 }
 0x1dc   : > { %2687 = vmatmul.msk.bf16.gmra.mxu1 %vm2170_vm8, %v2145_v11  ;;  %v2098_v9 = vadd.f32 %v2070_v48, %v1924_v16  ;;  %v1570_v48 = vpop.f32.mrf.mxu1 }
 0x1dd   : > { %v1589_v6 = vadd.f32 %v1570_v48, %v3602_v25 }
 0x1de   : > { %v1901_v5 = vpop.f32.mrf.mxu3  ;;  %v2118_v22 = vadd.f32 %v3612_v18, %v2098_v9 }
 0x1df   : > { %v1716_v33 = vpop.f32.mrf.mxu2 }
 0x1e0   : > { %v1743_v2 = vadd.f32 %v1716_v33, %v1584_v15  ;;  %v2134_v26 = vmax.f32 %v2118_v22, 0.0 }
 0x1e2   : > { %v1925_v46 = vadd.f32 %v1898_v4, %v1743_v2  ;;  %v2075_v58 = vpop.f32.mrf.mxu0 }
 0x1e4   : > { %v2099_v23 = vadd.f32 %v2072_v45, %v1925_v46  ;;  %v1572_v11 = vpop.f32.mrf.mxu1 }
 0x1e5   : > { %v1590_v16 = vadd.f32 %v1572_v11, %v3605_v29  ;;  %v3658_v29 = vld [vmem:[%s3738_s4] ss:$0 sm:$0xff] }
 0x1e6   : > { %v2119_v55 = vadd.f32 %v3612_v18, %v2099_v23  ;;  %v1903_v39 = vpop.f32.mrf.mxu3 }
 0x1e7   : > { %v1719_v30 = vpop.f32.mrf.mxu2 }
 0x1e8   : > { %v2135_v14 = vmax.f32 %v2119_v55, 0.0  ;;  %v1744_v27 = vadd.f32 %v1719_v30, %v1585_v24 }
 0x1ea   : > { %v2146_v1 = vpack.c.bf16 %v2135_v14, %v2134_v26  ;;  %v2077_v28 = vpop.f32.mrf.mxu0  ;;  %v1926_v31 = vadd.f32 %v1901_v5, %v1744_v27 }
 0x1ec   : > { %2688 = vmatmul.msk.bf16.gmra.mxu1 %vm2170_vm8, %v2146_v1  ;;  %v2100_v21 = vadd.f32 %v2075_v58, %v1926_v31 }
 0x1ee   : > { %v1906_v53 = vpop.f32.mrf.mxu3  ;;  %v2120_v36 = vadd.f32 %v3612_v18, %v2100_v21 }
 0x1ef   : > { %v1721_v32 = vpop.f32.mrf.mxu2 }
 0x1f0   : > { %v1745_v34 = vadd.f32 %v1721_v32, %v1586_v38  ;;  %v2136_v17 = vmax.f32 %v2120_v36, 0.0 }
 0x1f2   : > { %v1927_v59 = vadd.f32 %v1903_v39, %v1745_v34  ;;  %v2080_v35 = vpop.f32.mrf.mxu0 }
 0x1f4   : > { %v2101_v37 = vadd.f32 %v2077_v28, %v1927_v59 }
 0x1f6   : > { %v2121_v51 = vadd.f32 %v3612_v18, %v2101_v37  ;;  %v1908_v54 = vpop.f32.mrf.mxu3 }
 0x1f7   : > { %v1724_v20 = vpop.f32.mrf.mxu2 }
 0x1f8   : > { %v2137_v49 = vmax.f32 %v2121_v51, 0.0  ;;  %v1746_v41 = vadd.f32 %v1724_v20, %v1587_v40 }
 0x1fa   : > { %v2147_v43 = vpack.c.bf16 %v2137_v49, %v2136_v17  ;;  %v1928_v12 = vadd.f32 %v1906_v53, %v1746_v41  ;;  %v2082_v3 = vpop.f32.mrf.mxu0 }
 0x1fc   : > { %2689 = vmatmul.msk.bf16.gmra.mxu1 %vm2170_vm8, %v2147_v43  ;;  %v2102_v42 = vadd.f32 %v2080_v35, %v1928_v12 }
 0x1fe   : > { %v2122_v60 = vadd.f32 %v3612_v18, %v2102_v42  ;;  %v1911_v44 = vpop.f32.mrf.mxu3 }
 0x1ff   : > { %v1726_v56 = vpop.f32.mrf.mxu2 }
 0x200   : > { %v1747_v50 = vadd.f32 %v1726_v56, %v1588_v57  ;;  %v2138_v7 = vmax.f32 %v2122_v60, 0.0 }
 0x202   : > { %v1929_v63 = vadd.f32 %v1908_v54, %v1747_v50  ;;  %v2085_v0 = vpop.f32.mrf.mxu0 }
 0x204   : > { %v2103_v61 = vadd.f32 %v2082_v3, %v1929_v63 }
 0x206   : > { %v2123_v62 = vadd.f32 %v3612_v18, %v2103_v61  ;;  %v1913_v5 = vpop.f32.mrf.mxu3 }
 0x207   : > { %v1729_v4 = vpop.f32.mrf.mxu2 }
 0x208   : > { %v2139_v47 = vmax.f32 %v2123_v62, 0.0  ;;  %v1748_v10 = vadd.f32 %v1729_v4, %v1589_v6 }
 0x20a   : > { %v2148_v19 = vpack.c.bf16 %v2139_v47, %v2138_v7  ;;  %v1930_v45 = vadd.f32 %v1911_v44, %v1748_v10  ;;  %v2087_v2 = vpop.f32.mrf.mxu0 }
 0x20c   : > { %2690 = vmatmul.msk.bf16.gmra.mxu1 %vm2170_vm8, %v2148_v19  ;;  %v2104_v25 = vadd.f32 %v2085_v0, %v1930_v45 }
 0x20e   : > { %v2124_v46 = vadd.f32 %v3612_v18, %v2104_v25 }
 0x20f   : > { %v1731_v15 = vpop.f32.mrf.mxu2 }
 0x210   : > { %v1749_v33 = vadd.f32 %v1731_v15, %v1590_v16  ;;  %v2140_v22 = vmax.f32 %v2124_v46, 0.0 }
 0x212   : > { %v1931_v9 = vadd.f32 %v1913_v5, %v1749_v33 }
 0x214   : > { %v2105_v8 = vadd.f32 %v2087_v2, %v1931_v9 }
 0x216   : > { %v2125_v58 = vadd.f32 %v3612_v18, %v2105_v8 }
 0x218   : > { %v2141_v23 = vmax.f32 %v2125_v58, 0.0 }
 0x21a   : > { %v2149_v24 = vpack.c.bf16 %v2141_v23, %v2140_v22 }
 0x21c   : > { %2691 = vmatmul.msk.bf16.gmra.mxu1 %vm2170_vm8, %v2149_v24 }
 0x229   : > { %v2204_v55 = vpop.f32.mrf.mxu1 }
 0x22a   : > { %v2205_v18 = vadd.f32 %v3658_v29, %v2204_v55 }
 0x22c   : > { %v2244_v30 = vmax.f32 %v2205_v18, 0.0 }
 0x22e   : > { %v2260_v26 = vpack.c.bf16 %v2244_v30, %v2244_v30 }
 0x230   : > { %2277 = vst.msk [vmem:[%s3664_s29] sm:$0xf] %vm2276_vm9, %v2260_v26 }
 0x231   : > { %v2206_v14 = vpop.f32.mrf.mxu1 }
 0x232   : > { %v2207_v27 = vadd.f32 %v3658_v29, %v2206_v14 }
 0x234   : > { %v2245_v39 = vmax.f32 %v2207_v27, 0.0 }
 0x236   : > { %v2261_v1 = vpack.c.bf16 %v2245_v39, %v2245_v39 }
 0x238   : > { %2278 = vst.msk [vmem:[%s3664_s29 + $0x4] sm:$0xf] %vm2276_vm9, %v2261_v1 }
 0x239   : > { %v2209_v28 = vpop.f32.mrf.mxu1 }
 0x23a   : > { %v2210_v31 = vadd.f32 %v3658_v29, %v2209_v28 }
 0x23c   : > { %v2246_v13 = vmax.f32 %v2210_v31, 0.0 }
 0x23e   : > { %v2262_v38 = vpack.c.bf16 %v2246_v13, %v2246_v13 }
 0x240   : > { %2279 = vst.msk [vmem:[%s3664_s29 + $0x8] sm:$0xf] %vm2276_vm9, %v2262_v38 }
 0x241   : > { %v2211_v32 = vpop.f32.mrf.mxu1 }
 0x242   : > { %v2212_v21 = vadd.f32 %v3658_v29, %v2211_v32 }
 0x244   : > { %v2247_v34 = vmax.f32 %v2212_v21, 0.0 }
 0x246   : > { %v2263_v59 = vpack.c.bf16 %v2247_v34, %v2247_v34 }
 0x248   : > { %2280 = vst.msk [vmem:[%s3664_s29 + $0xc] sm:$0xf] %vm2276_vm9, %v2263_v59 }
 0x249   : > { %v2214_v53 = vpop.f32.mrf.mxu1 }
 0x24a   : > { %v2215_v36 = vadd.f32 %v3658_v29, %v2214_v53 }
 0x24c   : > { %v2248_v37 = vmax.f32 %v2215_v36, 0.0 }
 0x24e   : > { %v2264_v35 = vpack.c.bf16 %v2248_v37, %v2248_v37 }
 0x250   : > { %2281 = vst.msk [vmem:[%s3664_s29 + $0x10] sm:$0xf] %vm2276_vm9, %v2264_v35 }
 0x251   : > { %v2216_v40 = vpop.f32.mrf.mxu1 }
 0x252   : > { %v2217_v51 = vadd.f32 %v3658_v29, %v2216_v40 }
 0x254   : > { %v2249_v52 = vmax.f32 %v2217_v51, 0.0 }
 0x256   : > { %v2265_v20 = vpack.c.bf16 %v2249_v52, %v2249_v52 }
 0x258   : > { %2282 = vst.msk [vmem:[%s3664_s29 + $0x14] sm:$0xf] %vm2276_vm9, %v2265_v20 }
 0x259   : > { %v2219_v17 = vpop.f32.mrf.mxu1 }
 0x25a   : > { %v2220_v49 = vadd.f32 %v3658_v29, %v2219_v17 }
 0x25c   : > { %v2250_v41 = vmax.f32 %v2220_v49, 0.0 }
 0x25e   : > { %v2266_v43 = vpack.c.bf16 %v2250_v41, %v2250_v41 }
 0x260   : > { %2283 = vst.msk [vmem:[%s3664_s29 + $0x18] sm:$0xf] %vm2276_vm9, %v2266_v43 }
 0x261   : > { %v2221_v12 = vpop.f32.mrf.mxu1 }
 0x262   : > { %v2222_v54 = vadd.f32 %v3658_v29, %v2221_v12 }
 0x264   : > { %v2251_v57 = vmax.f32 %v2222_v54, 0.0 }
 0x266   : > { %v2267_v3 = vpack.c.bf16 %v2251_v57, %v2251_v57 }
 0x268   : > { %2284 = vst.msk [vmem:[%s3664_s29 + $0x1c] sm:$0xf] %vm2276_vm9, %v2267_v3 }
 0x269   : > { %v2224_v56 = vpop.f32.mrf.mxu1 }
 0x26a   : > { %v2225_v42 = vadd.f32 %v3658_v29, %v2224_v56 }
 0x26c   : > { %v2252_v50 = vmax.f32 %v2225_v42, 0.0 }
 0x26e   : > { %v2268_v48 = vpack.c.bf16 %v2252_v50, %v2252_v50 }
 0x270   : > { %2285 = vst.msk [vmem:[%s3664_s29 + $0x20] sm:$0xf] %vm2276_vm9, %v2268_v48 }
 0x271   : > { %v2226_v63 = vpop.f32.mrf.mxu1 }
 0x272   : > { %v2227_v60 = vadd.f32 %v3658_v29, %v2226_v63 }
 0x274   : > { %v2253_v61 = vmax.f32 %v2227_v60, 0.0 }
 0x276   : > { %v2269_v6 = vpack.c.bf16 %v2253_v61, %v2253_v61 }
 0x278   : > { %2286 = vst.msk [vmem:[%s3664_s29 + $0x24] sm:$0xf] %vm2276_vm9, %v2269_v6 }
 0x279   : > { %v2229_v62 = vpop.f32.mrf.mxu1 }
 0x27a   : > { %v2230_v44 = vadd.f32 %v3658_v29, %v2229_v62 }
 0x27c   : > { %v2254_v4 = vmax.f32 %v2230_v44, 0.0 }
 0x27e   : > { %v2270_v7 = vpack.c.bf16 %v2254_v4, %v2254_v4 }
 0x280   : > { %2287 = vst.msk [vmem:[%s3664_s29 + $0x28] sm:$0xf] %vm2276_vm9, %v2270_v7 }
 0x281   : > { %v2231_v47 = vpop.f32.mrf.mxu1 }
 0x282   : > { %v2232_v10 = vadd.f32 %v3658_v29, %v2231_v47 }
 0x284   : > { %v2255_v0 = vmax.f32 %v2232_v10, 0.0 }
 0x286   : > { %v2271_v19 = vpack.c.bf16 %v2255_v0, %v2255_v0 }
 0x288   : > { %2288 = vst.msk [vmem:[%s3664_s29 + $0x2c] sm:$0xf] %vm2276_vm9, %v2271_v19 }
 0x289   : > { %v2234_v11 = vpop.f32.mrf.mxu1 }
 0x28a   : > { %v2235_v45 = vadd.f32 %v3658_v29, %v2234_v11 }
 0x28c   : > { %v2256_v16 = vmax.f32 %v2235_v45, 0.0 }
 0x28e   : > { %v2272_v15 = vpack.c.bf16 %v2256_v16, %v2256_v16 }
 0x290   : > { %2289 = vst.msk [vmem:[%s3664_s29 + $0x30] sm:$0xf] %vm2276_vm9, %v2272_v15 }
 0x291   : > { %v2236_v25 = vpop.f32.mrf.mxu1 }
 0x292   : > { %v2237_v33 = vadd.f32 %v3658_v29, %v2236_v25 }
 0x294   : > { %v2257_v5 = vmax.f32 %v2237_v33, 0.0 }
 0x296   : > { %v2273_v9 = vpack.c.bf16 %v2257_v5, %v2257_v5 }
 0x298   : > { %2290 = vst.msk [vmem:[%s3664_s29 + $0x34] sm:$0xf] %vm2276_vm9, %v2273_v9 }
 0x299   : > { %v2239_v2 = vpop.f32.mrf.mxu1 }
 0x29a   : > { %v2240_v46 = vadd.f32 %v3658_v29, %v2239_v2 }
 0x29c   : > { %v2258_v8 = vmax.f32 %v2240_v46, 0.0 }
 0x29e   : > { %v2274_v58 = vpack.c.bf16 %v2258_v8, %v2258_v8 }
 0x2a0   : > { %2291 = vst.msk [vmem:[%s3664_s29 + $0x38] sm:$0xf] %vm2276_vm9, %v2274_v58 }
 0x2a1   : > { %v2241_v22 = vpop.f32.mrf.mxu1 }
 0x2a2   : > { %v2242_v23 = vadd.f32 %v3658_v29, %v2241_v22 }
 0x2a4   : > { %v2259_v24 = vmax.f32 %v2242_v23, 0.0 }
 0x2a6   : > { %v2275_v55 = vpack.c.bf16 %v2259_v24, %v2259_v24 }
 0x2a8   : > { %2292 = vst.msk [vmem:[%s3664_s29 + $0x3c] sm:$0xf] %vm2276_vm9, %v2275_v55 }
 0x2a9 PF: > { %s15_s24 = sadd.s32 1, %s2839_s24   ;;  %s3744_s18 = smov %s2819_s19 }
 0x2aa   : > { %p12_p12 = scmp.ge.s32.totalorder %s15_s24, 6   ;;  %s3745_s19 = smov %s2922_s6 }
 0x2ab   : > { %s3746_s20 = smov %s2831_s22  ;;  %s3747_s21 = smov %s2835_s23 }
 0x2ac   : > { %s3748_s22 = smov %s3751_s25  ;;  %s3749_s23 = smov %s3755_s26 }
 0x2ad   :  { %14 = sbr.rel (!%p12_p12) target bundleno = 4 (0x4), region = 126 }

// kernel: assp_branch.1
= control target key start
LH: loop header
LB: loop body
LE: loop exit
PB: predicated region body
PF: predicated region fallthrough
CT: control target
= control target key end

     0   :  { %s2871_s18 = smov 0   ;;  %s2873_s19 = smov 0   ;;  %s3734_s0 = inlined_call_operand.vmem [shape: bf16[6,16,20,8], index: 0, kind: input, shape index: {}]   ;;  %s3735_s1 = inlined_call_operand.vmem [shape: bf16[3,3,8,32], index: 1, kind: input, shape index: {}]   ;;  %s3736_s2 = inlined_call_operand.vmem [shape: f32[1,32], index: 2, kind: input, shape index: {}]   ;;  %s3737_s3 = inlined_call_operand.vmem [shape: bf16[32,32], index: 3, kind: input, shape index: {}]   ;;  %s3738_s4 = inlined_call_operand.vmem [shape: f32[1,32], index: 4, kind: input, shape index: {}]   ;;  %s3739_s5 = inlined_call_operand.vmem [shape: bf16[2,16,16,32], index: 5, kind: output, shape index: {}]  }
   0x1   :  { %s2875_s20 = smov 0   ;;  %s2877_s21 = smov 0  }
   0x2   :  { %s2879_s22 = smov 0   ;;  %s2881_s23 = smov 0  }
   0x3   :  { %s2883_s24 = smov 0  }
   0x4 LB: > { %s24_s25 = sadd.s32 1, %s2831_s22  ;;  %s27_s26 = sadd.s32 1, %s2835_s23  ;;  %s2839_s24 = sphi %s2883_s24, %s15_s24   ;;  %s2835_s23 = sphi %s2881_s23, %s3749_s23   ;;  %s2831_s22 = sphi %s2879_s22, %s3748_s22   ;;  %s2827_s21 = sphi %s2877_s21, %s3747_s21   ;;  %s2823_s20 = sphi %s2875_s20, %s3746_s20   ;;  %s2819_s19 = sphi %s2873_s19, %s3745_s19   ;;  %s2815_s18 = sphi %s2871_s18, %s3744_s18  }
   0x5   : > { %p25_p0 = scmp.ge.s32.totalorder %s24_s25, 2  ;;  %p43_p1 = scmp.ne.s32.totalorder %s2819_s19, %s2815_s18 }
   0x6   : > { %p44_p2 = scmp.eq.s32.totalorder %s2839_s24, 0  ;;  %s36_s30 = sadd.s32 1, %s2819_s19 }
   0x7   : > { %s3751_s25 = smov (%p25_p0, %s24_s25), 0  ;;  %s3753_s26 = smov (!%p25_p0, %s27_s26), %s2835_s23 }
   0x8   : > { %p45_p3 = por %p44_p2, %p43_p1  ;;  %p29_p4 = scmp.ge.s32.totalorder %s3753_s26, 2 }
   0x9   : > { %s32_s27 = ssub.s32 %s2831_s22, %s3751_s25  ;;  %p2395_p6 = scmp.ge.s32.totalorder %s2839_s24, 4 }
   0xa   : > { %s3755_s26 = smov (%p29_p4, %s3753_s26), 0 }
   0xb   : > { %s31_s28 = ssub.s32 %s2835_s23, %s3755_s26  ;;  %193 = sbr.rel (%p2395_p6) target bundleno = 61 (0x3d), region = 32 }
   0xc   : > { %s33_s29 = sor.u32 %s32_s27, %s31_s28 }
   0xd   : > { %p34_p5 = scmp.eq.s32.totalorder %s33_s29, 0 }
   0xf   : > { %s2922_s6 = scalar_select %p34_p5, %s2819_s19, %s36_s30  }
  0x10   : > { %196 = sbr.rel (!%p45_p3) target bundleno = 61 (0x3d), region = 36  ;;  %s198_s7 = sand.u32 (%p45_p3), 1, %s2819_s19  }
  0x11   : > { %s2722_s8 = smul.u32 (%p45_p3), 288, %s198_s7 }
  0x12   : > { %s2723_s9 = smul.u32 (%p45_p3), 24, %s2831_s22 }
  0x13   : > { %s2726_s10 = smul.u32 (%p45_p3), 144, %s2835_s23  ;;  %s2936_s16 = scalar_lea.vmem (%p45_p3), [#allocation2], %s2722_s8 }
  0x15   : > { %s205_s11 = sadd.s32 %s2726_s10, %s2723_s9 }
  0x16   : > { %s2398_s12 = sshll.u32 %s205_s11, 2 }
  0x17   : > { %s2931_s15 = scalar_lea.vmem %s3734_s0, %s2398_s12 }
  0x18   : > { %v224_v0 = vld [vmem:[%s2931_s15] sm:$0xff]   ;;  %v228_v1 = vld [vmem:[%s2931_s15 + $0x8] sm:$0xff]   ;;  %v232_v2 = vld [vmem:[%s2931_s15 + $0x10] sm:$0xff]  }
  0x19   : > { %225 = vst [vmem:[%s2936_s16] sm:$0xff] %v224_v0   ;;  %v236_v3 = vld [vmem:[%s2931_s15 + $0x18] sm:$0xff]   ;;  %v240_v4 = vld [vmem:[%s2931_s15 + $0x20] sm:$0xff]   ;;  %v244_v5 = vld [vmem:[%s2931_s15 + $0x28] sm:$0xff]  }
  0x1a   : > { %229 = vst [vmem:[%s2936_s16 + $0x8] sm:$0xff] %v228_v1   ;;  %v248_v6 = vld [vmem:[%s2931_s15 + $0x30] sm:$0xff]   ;;  %v252_v7 = vld [vmem:[%s2931_s15 + $0x38] sm:$0xff]   ;;  %v256_v8 = vld [vmem:[%s2931_s15 + $0x40] sm:$0xff]  }
  0x1b   : > { %233 = vst [vmem:[%s2936_s16 + $0x10] sm:$0xff] %v232_v2   ;;  %v260_v9 = vld [vmem:[%s2931_s15 + $0x48] sm:$0xff]   ;;  %v264_v10 = vld [vmem:[%s2931_s15 + $0x50] sm:$0xff]   ;;  %v268_v11 = vld [vmem:[%s2931_s15 + $0x58] sm:$0xff]  }
  0x1c   : > { %237 = vst [vmem:[%s2936_s16 + $0x18] sm:$0xff] %v236_v3   ;;  %v272_v12 = vld [vmem:[%s2931_s15 + $0xc0] sm:$0xff]   ;;  %v276_v13 = vld [vmem:[%s2931_s15 + $0xc8] sm:$0xff]   ;;  %v280_v14 = vld [vmem:[%s2931_s15 + $0xd0] sm:$0xff]  }
  0x1d   : > { %241 = vst [vmem:[%s2936_s16 + $0x20] sm:$0xff] %v240_v4   ;;  %v284_v15 = vld [vmem:[%s2931_s15 + $0xd8] sm:$0xff]   ;;  %v288_v16 = vld [vmem:[%s2931_s15 + $0xe0] sm:$0xff]   ;;  %v292_v17 = vld [vmem:[%s2931_s15 + $0xe8] sm:$0xff]  }
  0x1e   : > { %245 = vst [vmem:[%s2936_s16 + $0x28] sm:$0xff] %v244_v5   ;;  %v296_v18 = vld [vmem:[%s2931_s15 + $0xf0] sm:$0xff]   ;;  %v300_v19 = vld [vmem:[%s2931_s15 + $0xf8] sm:$0xff]   ;;  %v304_v20 = vld [vmem:[%s2931_s15 + $0x100] sm:$0xff]  }
  0x1f   : > { %249 = vst [vmem:[%s2936_s16 + $0x30] sm:$0xff] %v248_v6   ;;  %v308_v21 = vld [vmem:[%s2931_s15 + $0x108] sm:$0xff]   ;;  %v312_v22 = vld [vmem:[%s2931_s15 + $0x110] sm:$0xff]   ;;  %v316_v23 = vld [vmem:[%s2931_s15 + $0x118] sm:$0xff]  }
  0x20   : > { %253 = vst [vmem:[%s2936_s16 + $0x38] sm:$0xff] %v252_v7   ;;  %v320_v24 = vld [vmem:[%s2931_s15 + $0x180] sm:$0xff]   ;;  %v324_v25 = vld [vmem:[%s2931_s15 + $0x188] sm:$0xff]   ;;  %v328_v26 = vld [vmem:[%s2931_s15 + $0x190] sm:$0xff]  }
  0x21   : > { %257 = vst [vmem:[%s2936_s16 + $0x40] sm:$0xff] %v256_v8   ;;  %v332_v27 = vld [vmem:[%s2931_s15 + $0x198] sm:$0xff]   ;;  %v336_v28 = vld [vmem:[%s2931_s15 + $0x1a0] sm:$0xff]   ;;  %v340_v29 = vld [vmem:[%s2931_s15 + $0x1a8] sm:$0xff]  }
  0x22   : > { %261 = vst [vmem:[%s2936_s16 + $0x48] sm:$0xff] %v260_v9   ;;  %v344_v30 = vld [vmem:[%s2931_s15 + $0x1b0] sm:$0xff]   ;;  %v348_v31 = vld [vmem:[%s2931_s15 + $0x1b8] sm:$0xff]   ;;  %v352_v32 = vld [vmem:[%s2931_s15 + $0x1c0] sm:$0xff]  }
  0x23   : > { %265 = vst [vmem:[%s2936_s16 + $0x50] sm:$0xff] %v264_v10   ;;  %v356_v33 = vld [vmem:[%s2931_s15 + $0x1c8] sm:$0xff]   ;;  %v360_v34 = vld [vmem:[%s2931_s15 + $0x1d0] sm:$0xff]   ;;  %v364_v35 = vld [vmem:[%s2931_s15 + $0x1d8] sm:$0xff]  }
  0x24   : > { %269 = vst [vmem:[%s2936_s16 + $0x58] sm:$0xff] %v268_v11  }
  0x25   : > { %273 = vst [vmem:[%s2936_s16 + $0x60] sm:$0xff] %v272_v12  }
  0x26   : > { %277 = vst [vmem:[%s2936_s16 + $0x68] sm:$0xff] %v276_v13  }
  0x27   : > { %281 = vst [vmem:[%s2936_s16 + $0x70] sm:$0xff] %v280_v14  }
  0x28   : > { %285 = vst [vmem:[%s2936_s16 + $0x78] sm:$0xff] %v284_v15  }
  0x29   : > { %289 = vst [vmem:[%s2936_s16 + $0x80] sm:$0xff] %v288_v16  }
  0x2a   : > { %293 = vst [vmem:[%s2936_s16 + $0x88] sm:$0xff] %v292_v17  }
  0x2b   : > { %297 = vst [vmem:[%s2936_s16 + $0x90] sm:$0xff] %v296_v18  }
  0x2c   : > { %301 = vst [vmem:[%s2936_s16 + $0x98] sm:$0xff] %v300_v19  }
  0x2d   : > { %305 = vst [vmem:[%s2936_s16 + $0xa0] sm:$0xff] %v304_v20  }
  0x2e   : > { %309 = vst [vmem:[%s2936_s16 + $0xa8] sm:$0xff] %v308_v21  }
  0x2f   : > { %313 = vst [vmem:[%s2936_s16 + $0xb0] sm:$0xff] %v312_v22  }
  0x30   : > { %317 = vst [vmem:[%s2936_s16 + $0xb8] sm:$0xff] %v316_v23  }
  0x31   : > { %321 = vst [vmem:[%s2936_s16 + $0xc0] sm:$0xff] %v320_v24  }
  0x32   : > { %325 = vst [vmem:[%s2936_s16 + $0xc8] sm:$0xff] %v324_v25  }
  0x33   : > { %329 = vst [vmem:[%s2936_s16 + $0xd0] sm:$0xff] %v328_v26  }
  0x34   : > { %333 = vst [vmem:[%s2936_s16 + $0xd8] sm:$0xff] %v332_v27  }
  0x35   : > { %337 = vst [vmem:[%s2936_s16 + $0xe0] sm:$0xff] %v336_v28  }
  0x36   : > { %341 = vst [vmem:[%s2936_s16 + $0xe8] sm:$0xff] %v340_v29  }
  0x37   : > { %345 = vst [vmem:[%s2936_s16 + $0xf0] sm:$0xff] %v344_v30  }
  0x38   : > { %349 = vst [vmem:[%s2936_s16 + $0xf8] sm:$0xff] %v348_v31  }
  0x39   : > { %353 = vst [vmem:[%s2936_s16 + $0x100] sm:$0xff] %v352_v32  }
  0x3a   : > { %357 = vst [vmem:[%s2936_s16 + $0x108] sm:$0xff] %v356_v33  }
  0x3b   : > { %361 = vst [vmem:[%s2936_s16 + $0x110] sm:$0xff] %v360_v34  }
  0x3c   : > { %365 = vst [vmem:[%s2936_s16 + $0x118] sm:$0xff] %v364_v35  }
  0x3d PF: > { %p2399_p7 = scmp.ge.s32.totalorder %s2839_s24, 1  ;;  %p534_p8 = scmp.lt.s32.totalorder %s2839_s24, 5 }
  0x3f   : > { %p535_p9 = pnand %p2399_p7, %p534_p8 }
  0x40   : > { %s541_s28 = sand.u32 (!%p535_p9), 1, %s2815_s18   ;;  %s2400_s12 = sshll.u32 (!%p535_p9), %s2823_s20, 3 }
  0x41   : > { %538 = sbr.rel (%p535_p9) target bundleno = 681 (0x2a9), region = 77  ;;  %p576_p10 = scmp.lt.s32.totalorder (!%p535_p9), %s2827_s21, 1 }
  0x42   : > { %s2725_s29 = smul.u32 (!%p535_p9), 288, %s541_s28  ;;  %p578_p11 = scmp.lt.s32.totalorder (!%p535_p9), %s2400_s12, 15 }
  0x44   : > { %s3033_s13 = scalar_lea.vmem (!%p535_p9), [#allocation2], %s2725_s29 }
  0x46   : > { %v611_v36 = vld [vmem:[%s3735_s1] sm:$0xf]  ;;  %vm746_vm0 = vcmask 1043456   ;;  %vm636_vm1 = vcmask 1042432   ;;  %v2412_v38 = vld [vmem:[%s3735_s1 + $0x4] sm:$0xf] }
  0x47   : > { %v848_v37 = vsel %vm746_vm0, %v611_v36, 0  ;;  %vm637_vm2 = vcmask 1046532   ;;  %v748_v39 = vsel %vm746_vm0, %v2412_v38, 0  ;;  %v2469_v40 = vld [vmem:[%s3735_s1 + $0x8] sm:$0xf]  ;;  %vm721_vm3 = vcmask 64512  }
  0x48   : > { %2721 = vmatpush.bf16.msra.mxu3 %v848_v37  ;;  %857 = vmatpush.bf16.msra.mxu1 %v848_v37  ;;  %v2502_v41 = vld [vmem:[%s3735_s1 + $0xc] sm:$0xf]  ;;  %vm3024_vm4 = vmor %vm636_vm1, %vm637_vm2  ;;  %v1009_v43 = vsel %vm746_vm0, %v2469_v40, 0  ;;  %v2551_v45 = vld [vmem:[%s3735_s1 + $0x10] sm:$0xf]  ;;  %vm899_vm5 = vcmask 1041408  }
  0x49   : > { %2720 = vmatpush.bf16.msra.mxu2 %v748_v39  ;;  %757 = vmatpush.bf16.msra.mxu0 %v748_v39  ;;  %v1168_v44 = vsel %vm746_vm0, %v2502_v41, 0  ;;  %v2698_v46 = vld [vmem:[%s3033_s13 + $0x30] sm:$0xff]  ;;  %v1350_v49 = vsel %vm746_vm0, %v2551_v45, 0  ;;  %v3044_v50 = vld [vmem:[%s3033_s13 + $0x38] sm:$0x3]  ;;  %v2694_v62 = vld [vmem:[%s3033_s13] sm:$0xff] }
  0x4a   : > { %v3037_v47 = vld [vmem:[%s3033_s13 + $0x30] sm:$0xf]  ;;  %v3040_v48 = vld [vmem:[%s3033_s13 + $0x34] sm:$0xf]  ;;  %v3049_v53 = vld [vmem:[%s3033_s13] sm:$0xf] }
  0x4b   : > { %v2408_v51 = vrot.slane %v3037_v47, 9  ;;  %v669_v52 = vrot.slane %v3040_v48, 5  ;;  %2457 = vmatmul.msk.bf16.vlgmr.msra.gmra.mxu3 %vm721_vm3, %v2698_v46  ;;  %v672_v54 = vrot.slane %v3044_v50, 5  ;;  %v3054_v55 = vld [vmem:[%s3033_s13 + $0x4] sm:$0xf]  ;;  %v2404_v57 = vrot.slane %v3049_v53, 9  ;;  %2453 = vmatmul.msk.bf16.vlgmr.msra.gmra.mxu1 %vm721_vm3, %v2694_v62 }
  0x4c   : > { %1177 = vmatpush.bf16.msrb.mxu3 %v1168_v44  ;;  %v3057_v56 = vld [vmem:[%s3033_s13 + $0x8] sm:$0x3]  ;;  %v641_v60 = vrot.slane %v3054_v55, 5  ;;  %v3071_v3 = vld [vmem:[%s3033_s13 + $0x40] sm:$0xf]  ;;  %v2695_v28 = vld [vmem:[%s3033_s13 + $0xc] sm:$0xff] }
  0x4d   : > { %1018 = vmatpush.bf16.msrb.mxu2 %v1009_v43  ;;  %1359 = vmatpush.bf16.msrb.mxu0 %v1350_v49  ;;  %v670_v58 = vsel %vm3024_vm4, %v2408_v51, %v669_v52  ;;  %v671_v59 = vrot.slane %v669_v52, 4  ;;  %v644_v61 = vrot.slane %v3057_v56, 5  ;;  %v3074_v6 = vld [vmem:[%s3033_s13 + $0x10] sm:$0xf]  ;;  %v676_v8 = vrot.slane %v3071_v3, 5  ;;  %v2699_v23 = vld [vmem:[%s3033_s13 + $0x3c] sm:$0xff] }
  0x4e   : > { %v705_v63 = vunpack.c.l.b16 %v670_v58  ;;  %v642_v1 = vsel %vm3024_vm4, %v2404_v57, %v641_v60  ;;  %v643_v2 = vrot.slane %v641_v60, 4  ;;  %v3080_v11 = vld [vmem:[%s3033_s13 + $0x3c] sm:$0xf]  ;;  %v3083_v12 = vld [vmem:[%s3033_s13 + $0x44] sm:$0x3]  ;;  %v648_v13 = vrot.slane %v3074_v6, 5 }
  0x4f   : > { %v673_v0 = vsel %vm3024_vm4, %v671_v59, %v672_v54  ;;  %v697_v5 = vunpack.c.l.b16 %v642_v1  ;;  %v3088_v15 = vld [vmem:[%s3033_s13 + $0xc] sm:$0xf]  ;;  %v3091_v16 = vld [vmem:[%s3033_s13 + $0x14] sm:$0x3]  ;;  %v2409_v17 = vrot.slane %v3080_v11, 9  ;;  %v678_v18 = vrot.slane %v676_v8, 4 }
  0x50   : > { %v706_v4 = vunpack.c.l.b16 %v673_v0  ;;  %v645_v7 = vsel %vm3024_vm4, %v643_v2, %v644_v61  ;;  %v679_v19 = vrot.slane %v3083_v12, 5  ;;  %v2405_v20 = vrot.slane %v3088_v15, 9  ;;  %v3110_v33 = vld [vmem:[%s3033_s13 + $0x4c] sm:$0xf]  ;;  %v3114_v35 = vld [vmem:[%s3033_s13 + $0x1c] sm:$0xf] }
  0x51   : > { %v698_v10 = vunpack.c.l.b16 %v645_v7  ;;  %v650_v21 = vrot.slane %v648_v13, 4  ;;  %v651_v22 = vrot.slane %v3091_v16, 5  ;;  %v677_v24 = vsel %vm3024_vm4, %v2409_v17, %v676_v8  ;;  %v3118_v38 = vld [vmem:[%s3033_s13 + $0x48] sm:$0xf]  ;;  %v3121_v39 = vld [vmem:[%s3033_s13 + $0x50] sm:$0x3] }
  0x52   : > { %v717_v9 = vpack.c.b16 %v706_v4, %v705_v63  ;;  %v680_v25 = vsel %vm3024_vm4, %v678_v18, %v679_v19  ;;  %v649_v26 = vsel %vm3024_vm4, %v2405_v20, %v648_v13  ;;  %v707_v29 = vunpack.c.l.b16 %v677_v24  ;;  %v3126_v41 = vld [vmem:[%s3033_s13 + $0x18] sm:$0xf]  ;;  %v3129_v43 = vld [vmem:[%s3033_s13 + $0x20] sm:$0x3]  ;;  %v2700_v54 = vld [vmem:[%s3033_s13 + $0x48] sm:$0xff]  ;;  %s3757_s21 = smov (!%p576_p10, %s2827_s21), 1 }
  0x53   : > { %v713_v14 = vpack.c.b16 %v698_v10, %v697_v5  ;;  %v652_v27 = vsel %vm3024_vm4, %v650_v21, %v651_v22  ;;  %v708_v30 = vunpack.c.l.b16 %v680_v25  ;;  %v699_v31 = vunpack.c.l.b16 %v649_v26  ;;  %v2696_v61 = vld [vmem:[%s3033_s13 + $0x18] sm:$0xff]  ;;  %v3152_v5 = vld [vmem:[%s3033_s13 + $0x54] sm:$0xf]  ;;  %v3156_v8 = vld [vmem:[%s3033_s13 + $0x28] sm:$0xf]  ;;  %s3759_s12 = smov (!%p578_p11, %s2400_s12), 15 }
  0x54   : > { %2417 = vmatmul.msk.bf16.vlgmr.msra.gmra.mxu2 %vm721_vm3, %v717_v9  ;;  %v700_v32 = vunpack.c.l.b16 %v652_v27  ;;  %v683_v36 = vrot.slane %v3110_v33, 5  ;;  %v655_v40 = vrot.slane %v3114_v35, 5  ;;  %v2410_v44 = vrot.slane %v3118_v38, 9  ;;  %v3148_v0 = vld [vmem:[%s3033_s13 + $0x58] sm:$0xf]  ;;  %s2402_s14 = sshll.u32 %s3757_s21, 5 }
  0x55   : > { %2413 = vmatmul.msk.bf16.vlgmr.msra.gmra.mxu0 %vm721_vm3, %v713_v14  ;;  %v718_v34 = vpack.c.b16 %v708_v30, %v707_v29  ;;  %v686_v46 = vrot.slane %v3121_v39, 5  ;;  %v2406_v49 = vrot.slane %v3126_v41, 9  ;;  %v658_v52 = vrot.slane %v3129_v43, 5  ;;  %v3159_v9 = vld [vmem:[%s3033_s13 + $0x5c] sm:$0x3]  ;;  %v2701_v30 = vld [vmem:[%s3033_s13 + $0x54] sm:$0xff] }
  0x56   : > { %v714_v37 = vpack.c.b16 %v700_v32, %v699_v31  ;;  %v685_v45 = vrot.slane %v683_v36, 4  ;;  %v657_v51 = vrot.slane %v655_v40, 4  ;;  %v684_v57 = vsel %vm3024_vm4, %v2410_v44, %v683_v36  ;;  %v3163_v14 = vld [vmem:[%s3033_s13 + $0x24] sm:$0xf]  ;;  %v3169_v20 = vld [vmem:[%s3033_s13 + $0x2c] sm:$0x3] }
  0x57   : > { %v656_v59 = vsel %vm3024_vm4, %v2406_v49, %v655_v40  ;;  %v709_v62 = vunpack.c.l.b16 %v684_v57  ;;  %v690_v7 = vrot.slane %v3148_v0, 5  ;;  %v2411_v13 = vrot.slane %v3152_v5, 9  ;;  %v2601_v21 = vld [vmem:[%s3735_s1 + $0x18] sm:$0xf]  ;;  %v2650_v24 = vld [vmem:[%s3735_s1 + $0x1c] sm:$0xf] }
  0x58   : > { %v687_v58 = vsel %vm3024_vm4, %v685_v45, %v686_v46  ;;  %v659_v60 = vsel %vm3024_vm4, %v657_v51, %v658_v52  ;;  %v701_v1 = vunpack.c.l.b16 %v656_v59  ;;  %v662_v17 = vrot.slane %v3156_v8, 5  ;;  %v2568_v25 = vld [vmem:[%s3735_s1 + $0x14] sm:$0xf]  ;;  %v2697_v44 = vld [vmem:[%s3033_s13 + $0x24] sm:$0xff]  ;;  %v2667_v46 = vld [vmem:[%s3735_s1 + $0x20] sm:$0xf] }
  0x59   : > { %v710_v63 = vunpack.c.l.b16 %v687_v58  ;;  %v702_v2 = vunpack.c.l.b16 %v659_v60  ;;  %v692_v18 = vrot.slane %v690_v7, 4  ;;  %v693_v19 = vrot.slane %v3159_v9, 5  ;;  %v2479_v45 = vld [vmem:[%s3033_s13 + $0x64] sm:$0xf]  ;;  %v2478_v58 = vld [vmem:[%s3033_s13 + $0x60] sm:$0xf] }
  0x5a   : > { %v1683_v22 = vsel %vm746_vm0, %v2601_v21, 0  ;;  %v664_v26 = vrot.slane %v662_v17, 4  ;;  %v665_v27 = vrot.slane %v3169_v20, 5  ;;  %v1524_v29 = vsel %vm746_vm0, %v2568_v25, 0  ;;  %v2480_v59 = vld [vmem:[%s3033_s13 + $0x68] sm:$0x3] }
  0x5b   : > { %2458 = vmatmul.msk.bf16.gmra.mxu3 %vm721_vm3, %v2699_v23  ;;  %2454 = vmatmul.msk.bf16.gmra.mxu1 %vm721_vm3, %v2695_v28  ;;  %v719_v4 = vpack.c.b16 %v710_v63, %v709_v62  ;;  %v715_v10 = vpack.c.b16 %v702_v2, %v701_v1  ;;  %v2407_v23 = vrot.slane %v3163_v14, 9  ;;  %v1865_v28 = vsel %vm746_vm0, %v2650_v24, 0  ;;  %v2702_v24 = vld [vmem:[%s3033_s13 + $0x60] sm:$0xff] }
  0x5c   : > { %1692 = vmatpush.bf16.msra.mxu2 %v1683_v22  ;;  %v691_v31 = vsel %vm3024_vm4, %v2411_v13, %v690_v7  ;;  %v694_v32 = vsel %vm3024_vm4, %v692_v18, %v693_v19  ;;  %1874 = vmatpush.bf16.msra.mxu3 %v1865_v28  ;;  %v666_v40 = vsel %vm3024_vm4, %v664_v26, %v665_v27  ;;  %v1419_v49 = vrot.slane %v2479_v45, 6  ;;  %v2482_v28 = vld [vmem:[%s3033_s13 + $0x70] sm:$0xf] }
  0x5d   : > { %1533 = vmatpush.bf16.msrb.mxu1 %v1524_v29  ;;  %v712_v36 = vunpack.c.l.b16 %v694_v32  ;;  %v2039_v51 = vsel %vm746_vm0, %v2667_v46, 0  ;;  %vm900_vm6 = vcmask 1045508   ;;  %v2560_v60 = vrot.slane %v2478_v58, 10 }
  0x5e   : > { %2048 = vmatpush.bf16.msra.mxu0 %v2039_v51  ;;  %v1422_v62 = vrot.slane %v2480_v59, 6  ;;  %v904_v63 = vrot.slane %v3054_v55, 6  ;;  %vm3206_vm7 = vmor %vm899_vm5, %vm900_vm6  ;;  %v2461_v13 = vrot.slane %v3049_v53, 10  ;;  %v907_v55 = vrot.slane %v3057_v56, 6 }
  0x5f   : > { %v1420_v7 = vsel %vm3206_vm7, %v2560_v60, %v1419_v49  ;;  %v2543_v18 = vrot.slane %v2478_v58, 9  ;;  %v1248_v21 = vrot.slane %v2480_v59, 5  ;;  %v2462_v58 = vrot.slane %v3088_v15, 10 }
  0x60   : > { %v1475_v22 = vunpack.c.l.b16 %v1420_v7  ;;  %v905_v25 = vsel %vm3206_vm7, %v2461_v13, %v904_v63  ;;  %v914_v60 = vrot.slane %v3091_v16, 6  ;;  %vm2170_vm8 = vcmask 261120  }
  0x61   : > { %v960_v29 = vunpack.c.l.b16 %v905_v25  ;;  %vm2276_vm9 = vcmask 257024  }
  0x64   : > { %2418 = vmatmul.msk.bf16.gmra.mxu2 %vm721_vm3, %v718_v34  ;;  %v711_v34 = vunpack.c.l.b16 %v691_v31  ;;  %v1426_v31 = vrot.slane %v2482_v28, 6 }
  0x65   : > { %2414 = vmatmul.msk.bf16.gmra.mxu0 %vm721_vm3, %v714_v37  ;;  %v663_v37 = vsel %vm3024_vm4, %v2407_v23, %v662_v17  ;;  %v906_v17 = vrot.slane %v904_v63, 4 }
  0x66   : > { %v703_v52 = vunpack.c.l.b16 %v663_v37  ;;  %v720_v57 = vpack.c.b16 %v712_v36, %v711_v34  ;;  %v2481_v36 = vld [vmem:[%s3033_s13 + $0x6c] sm:$0xf]  ;;  %v2483_v37 = vld [vmem:[%s3033_s13 + $0x74] sm:$0x3] }
  0x67   : > { %v908_v26 = vsel %vm3206_vm7, %v906_v17, %v907_v55  ;;  %v1429_v46 = vrot.slane %v2483_v37, 6  ;;  %v2485_v55 = vld [vmem:[%s3033_s13 + $0x7c] sm:$0xf] }
  0x6b   : > { %2459 = vmatmul.msk.bf16.gmra.mxu3 %vm721_vm3, %v2700_v54  ;;  %2455 = vmatmul.msk.bf16.gmra.mxu1 %vm721_vm3, %v2696_v61  ;;  %v704_v54 = vunpack.c.l.b16 %v666_v40  ;;  %v1421_v61 = vrot.slane %v1419_v49, 4  ;;  %v911_v49 = vrot.slane %v3074_v6, 6 }
  0x6d   : > { %v716_v1 = vpack.c.b16 %v704_v54, %v703_v52  ;;  %v1252_v52 = vrot.slane %v2482_v28, 5  ;;  %v913_v59 = vrot.slane %v911_v49, 4  ;;  %v912_v7 = vsel %vm3206_vm7, %v2462_v58, %v911_v49 }
  0x6e   : > { %v962_v17 = vunpack.c.l.b16 %v912_v7 }
  0x6f   : > { %v1254_v6 = vrot.slane %v1252_v52, 4 }
  0x74   : > { %2419 = vmatmul.msk.bf16.gmra.mxu2 %vm721_vm3, %v719_v4  ;;  %v1245_v4 = vrot.slane %v2479_v45, 5  ;;  %v1428_v45 = vrot.slane %v1426_v31, 4 }
  0x75   : > { %2415 = vmatmul.msk.bf16.gmra.mxu0 %vm721_vm3, %v715_v10  ;;  %v1423_v10 = vsel %vm3206_vm7, %v1421_v61, %v1422_v62  ;;  %v2544_v61 = vrot.slane %v2481_v36, 9  ;;  %v1255_v62 = vrot.slane %v2483_v37, 5 }
  0x76   : > { %v1247_v19 = vrot.slane %v1245_v4, 4  ;;  %v1476_v23 = vunpack.c.l.b16 %v1423_v10  ;;  %v1246_v53 = vsel %vm3024_vm4, %v2543_v18, %v1245_v4  ;;  %v2703_v4 = vld [vmem:[%s3033_s13 + $0x6c] sm:$0xff]  ;;  %v915_v10 = vsel %vm3206_vm7, %v913_v59, %v914_v60 }
  0x77   : > { %v1301_v32 = vunpack.c.l.b16 %v1246_v53  ;;  %v1253_v15 = vsel %vm3024_vm4, %v2544_v61, %v1252_v52  ;;  %v1256_v16 = vsel %vm3024_vm4, %v1254_v6, %v1255_v62  ;;  %v963_v18 = vunpack.c.l.b16 %v915_v10  ;;  %v2487_v6 = vld [vmem:[%s3033_s13 + $0x84] sm:$0xf]  ;;  %v2489_v62 = vld [vmem:[%s3033_s13 + $0x8c] sm:$0x3] }
  0x78   : > { %v1249_v56 = vsel %vm3024_vm4, %v1247_v19, %v1248_v21  ;;  %v1491_v27 = vpack.c.b16 %v1476_v23, %v1475_v22  ;;  %v1433_v19 = vrot.slane %v2485_v55, 6  ;;  %v1303_v21 = vunpack.c.l.b16 %v1253_v15  ;;  %v2484_v23 = vld [vmem:[%s3033_s13 + $0x78] sm:$0xf] }
  0x79   : > { %v1302_v34 = vunpack.c.l.b16 %v1249_v56  ;;  %v1304_v22 = vunpack.c.l.b16 %v1256_v16  ;;  %v977_v25 = vpack.c.b16 %v963_v18, %v962_v17  ;;  %v2545_v37 = vrot.slane %v2484_v23, 9 }
  0x7a   : > { %v1435_v53 = vrot.slane %v1433_v19, 4  ;;  %v1443_v7 = vrot.slane %v2489_v62, 6  ;;  %v925_v10 = vrot.slane %v3156_v8, 6  ;;  %v2464_v17 = vrot.slane %v3163_v14, 10 }
  0x7b   : > { %2460 = vmatmul.msk.bf16.gmra.mxu3 %vm721_vm3, %v2701_v30  ;;  %2456 = vmatmul.msk.bf16.gmra.mxu1 %vm721_vm3, %v2697_v44  ;;  %v961_v30 = vunpack.c.l.b16 %v908_v26  ;;  %v2561_v44 = vrot.slane %v2481_v36, 10  ;;  %v1317_v51 = vpack.c.b16 %v1302_v34, %v1301_v32  ;;  %v2562_v26 = vrot.slane %v2484_v23, 10 }
  0x7c   : > { %v1318_v28 = vpack.c.b16 %v1304_v22, %v1303_v21  ;;  %v2463_v32 = vrot.slane %v3126_v41, 10  ;;  %v921_v36 = vrot.slane %v3129_v43, 6  ;;  %v927_v18 = vrot.slane %v925_v10, 4 }
  0x7d   : > { %v976_v40 = vpack.c.b16 %v961_v30, %v960_v29  ;;  %v1427_v54 = vsel %vm3206_vm7, %v2561_v44, %v1426_v31  ;;  %v1259_v29 = vrot.slane %v2485_v55, 5  ;;  %v1434_v30 = vsel %vm3206_vm7, %v2562_v26, %v1433_v19 }
  0x7e   : > { %v1477_v63 = vunpack.c.l.b16 %v1427_v54  ;;  %v1479_v44 = vunpack.c.l.b16 %v1434_v30  ;;  %v2488_v54 = vld [vmem:[%s3033_s13 + $0x88] sm:$0xf]  ;;  %v928_v19 = vrot.slane %v3169_v20, 6  ;;  %v2546_v21 = vrot.slane %v2487_v6, 9 }
  0x7f   : > { %v1260_v41 = vsel %vm3024_vm4, %v2545_v37, %v1259_v29  ;;  %v1440_v59 = vrot.slane %v2488_v54, 6  ;;  %v1266_v16 = vrot.slane %v2488_v54, 5  ;;  %v1269_v22 = vrot.slane %v2489_v62, 5 }
  0x80   : > { %v1305_v60 = vunpack.c.l.b16 %v1260_v41  ;;  %v926_v26 = vsel %vm3206_vm7, %v2464_v17, %v925_v10  ;;  %v935_v54 = vrot.slane %v3044_v50, 6  ;;  %v939_v17 = vrot.slane %v3071_v3, 6 }
  0x81   : > { %v1268_v8 = vrot.slane %v1266_v16, 4  ;;  %v1267_v14 = vsel %vm3024_vm4, %v2546_v21, %v1266_v16  ;;  %v942_v3 = vrot.slane %v3083_v12, 6 }
  0x83   : > { %v1270_v20 = vsel %vm3024_vm4, %v1268_v8, %v1269_v22 }
  0x84   : > { %2420 = vmatmul.msk.bf16.gmra.mxu2 %vm721_vm3, %v720_v57  ;;  %v1430_v57 = vsel %vm3206_vm7, %v1428_v45, %v1429_v46  ;;  %v2704_v46 = vld [vmem:[%s3033_s13 + $0x78] sm:$0xff] }
  0x85   : > { %2416 = vmatmul.msk.bf16.gmra.mxu0 %vm721_vm3, %v716_v1  ;;  %v1478_v1 = vunpack.c.l.b16 %v1430_v57 }
  0x87   : > { %v1492_v13 = vpack.c.b16 %v1478_v1, %v1477_v63  ;;  %v2563_v1 = vrot.slane %v2487_v6, 10 }
  0x8b   : > { %2535 = vmatmul.msk.bf16.vlgmr.msrb.gmra.mxu3 %vm721_vm3, %v2702_v24  ;;  %2569 = vmatmul.msk.bf16.vlgmr.msrb.gmra.mxu1 %vm721_vm3, %v1491_v27  ;;  %v2486_v24 = vld [vmem:[%s3033_s13 + $0x80] sm:$0x3]  ;;  %v918_v27 = vrot.slane %v3114_v35, 6  ;;  %v1261_v35 = vrot.slane %v1259_v29, 4 }
  0x8c   : > { %v1436_v56 = vrot.slane %v2486_v24, 6 }
  0x8d   : > { %v920_v34 = vrot.slane %v918_v27, 4  ;;  %v919_v49 = vsel %vm3206_vm7, %v2463_v32, %v918_v27  ;;  %v2491_v27 = vld [vmem:[%s3033_s13 + $0x94] sm:$0xf]  ;;  %v1308_v32 = vunpack.c.l.b16 %v1270_v20 }
  0x8e   : > { %v1437_v31 = vsel %vm3206_vm7, %v1435_v53, %v1436_v56  ;;  %v964_v57 = vunpack.c.l.b16 %v919_v49  ;;  %v929_v53 = vsel %vm3206_vm7, %v927_v18, %v928_v19  ;;  %v1447_v30 = vrot.slane %v2491_v27, 6  ;;  %v2493_v18 = vld [vmem:[%s3033_s13 + $0x9c] sm:$0xf]  ;;  %v2495_v19 = vld [vmem:[%s3033_s13 + $0xa4] sm:$0x3] }
  0x8f   : > { %v1480_v45 = vunpack.c.l.b16 %v1437_v31  ;;  %v967_v29 = vunpack.c.l.b16 %v929_v53  ;;  %v1307_v31 = vunpack.c.l.b16 %v1267_v14  ;;  %v1273_v49 = vrot.slane %v2491_v27, 5 }
  0x90   : > { %v2565_v8 = vrot.slane %v2493_v18, 10  ;;  %v941_v53 = vrot.slane %v939_v17, 4 }
  0x91   : > { %v1493_v52 = vpack.c.b16 %v1480_v45, %v1479_v44  ;;  %v932_v45 = vrot.slane %v3040_v48, 6  ;;  %v1275_v48 = vrot.slane %v1273_v49, 4 }
  0x94   : > { %2470 = vmatmul.msk.bf16.vlgmr.msrb.gmra.mxu2 %vm721_vm3, %v976_v40  ;;  %v1262_v40 = vrot.slane %v2486_v24, 5 }
  0x95   : > { %2552 = vmatmul.msk.bf16.vlgmr.msrb.gmra.mxu0 %vm721_vm3, %v1317_v51  ;;  %v922_v51 = vsel %vm3206_vm7, %v920_v34, %v921_v36  ;;  %v2490_v34 = vld [vmem:[%s3033_s13 + $0x90] sm:$0xf]  ;;  %v2492_v36 = vld [vmem:[%s3033_s13 + $0x98] sm:$0x3] }
  0x96   : > { %v1263_v43 = vsel %vm3024_vm4, %v1261_v35, %v1262_v40  ;;  %v965_v58 = vunpack.c.l.b16 %v922_v51  ;;  %v2564_v35 = vrot.slane %v2490_v34, 10  ;;  %v1449_v40 = vrot.slane %v1447_v30, 4 }
  0x97   : > { %v1306_v61 = vunpack.c.l.b16 %v1263_v43  ;;  %v1450_v44 = vrot.slane %v2492_v36, 6  ;;  %v2465_v43 = vrot.slane %v3037_v47, 10 }
  0x98   : > { %v978_v63 = vpack.c.b16 %v965_v58, %v964_v57  ;;  %v1448_v51 = vsel %vm3206_vm7, %v2564_v35, %v1447_v30  ;;  %v2547_v57 = vrot.slane %v2490_v34, 9  ;;  %v1276_v58 = vrot.slane %v2492_v36, 5  ;;  %v2707_v35 = vld [vmem:[%s3033_s13 + $0x9c] sm:$0xff] }
  0x99   : > { %v1319_v15 = vpack.c.b16 %v1306_v61, %v1305_v60  ;;  %v1451_v41 = vsel %vm3206_vm7, %v1449_v40, %v1450_v44  ;;  %v2706_v61 = vld [vmem:[%s3033_s13 + $0x90] sm:$0xff]  ;;  %v933_v6 = vsel %vm3206_vm7, %v2465_v43, %v932_v45  ;;  %v1283_v34 = vrot.slane %v2495_v19, 5  ;;  %v2497_v43 = vld [vmem:[%s3033_s13 + $0xac] sm:$0xf] }
  0x9a   : > { %v1484_v60 = vunpack.c.l.b16 %v1451_v41  ;;  %v1274_v47 = vsel %vm3024_vm4, %v2547_v57, %v1273_v49  ;;  %v1277_v50 = vsel %vm3024_vm4, %v1275_v48, %v1276_v58  ;;  %v943_v40 = vsel %vm3206_vm7, %v941_v53, %v942_v3 }
  0x9b   : > { %2536 = vmatmul.msk.bf16.gmra.mxu3 %vm721_vm3, %v2703_v4  ;;  %2570 = vmatmul.msk.bf16.gmra.mxu1 %vm721_vm3, %v1492_v13  ;;  %v1442_v4 = vrot.slane %v1440_v59, 4  ;;  %v1441_v13 = vsel %vm3206_vm7, %v2563_v1, %v1440_v59  ;;  %v1483_v59 = vunpack.c.l.b16 %v1448_v51  ;;  %v2494_v1 = vld [vmem:[%s3033_s13 + $0xa0] sm:$0xf]  ;;  %v1309_v16 = vunpack.c.l.b16 %v1274_v47 }
  0x9c   : > { %v1481_v23 = vunpack.c.l.b16 %v1441_v13  ;;  %v1310_v13 = vunpack.c.l.b16 %v1277_v50  ;;  %v1280_v14 = vrot.slane %v2494_v1, 5 }
  0x9d   : > { %v1444_v55 = vsel %vm3206_vm7, %v1442_v4, %v1443_v7  ;;  %v968_v7 = vunpack.c.l.b16 %v933_v6  ;;  %v2496_v6 = vld [vmem:[%s3033_s13 + $0xa8] sm:$0xf] }
  0x9e   : > { %v1482_v24 = vunpack.c.l.b16 %v1444_v55  ;;  %v2566_v50 = vrot.slane %v2496_v6, 10 }
  0xa0   : > { %v1494_v56 = vpack.c.b16 %v1482_v24, %v1481_v23  ;;  %v1457_v23 = vrot.slane %v2495_v19, 6  ;;  %v1321_v24 = vpack.c.b16 %v1310_v13, %v1309_v16  ;;  %v1287_v16 = vrot.slane %v2497_v43, 5 }
  0xa1   : > { %v2549_v19 = vrot.slane %v2496_v6, 9 }
  0xa4   : > { %2471 = vmatmul.msk.bf16.gmra.mxu2 %vm721_vm3, %v977_v25  ;;  %v2705_v25 = vld [vmem:[%s3033_s13 + $0x84] sm:$0xff] }
  0xa5   : > { %2553 = vmatmul.msk.bf16.gmra.mxu0 %vm721_vm3, %v1318_v28  ;;  %v966_v28 = vunpack.c.l.b16 %v926_v26 }
  0xa7   : > { %v979_v37 = vpack.c.b16 %v967_v29, %v966_v28  ;;  %v2548_v29 = vrot.slane %v2493_v18, 9 }
  0xa9   : > { %v1281_v49 = vsel %vm3024_vm4, %v2548_v29, %v1280_v14 }
  0xaa   : > { %v1311_v57 = vunpack.c.l.b16 %v1281_v49 }
  0xab   : > { %2537 = vmatmul.msk.bf16.gmra.mxu3 %vm721_vm3, %v2704_v46  ;;  %2571 = vmatmul.msk.bf16.gmra.mxu1 %vm721_vm3, %v1493_v52  ;;  %v1320_v46 = vpack.c.b16 %v1308_v32, %v1307_v31  ;;  %v934_v52 = vrot.slane %v932_v45, 4  ;;  %v1282_v32 = vrot.slane %v1280_v14, 4 }
  0xad   : > { %v936_v62 = vsel %vm3206_vm7, %v934_v52, %v935_v54  ;;  %v1284_v51 = vsel %vm3024_vm4, %v1282_v32, %v1283_v34  ;;  %v1461_v54 = vrot.slane %v2497_v43, 6 }
  0xae   : > { %v969_v10 = vunpack.c.l.b16 %v936_v62  ;;  %v1312_v48 = vunpack.c.l.b16 %v1284_v51  ;;  %v2498_v62 = vld [vmem:[%s3033_s13 + $0xb0] sm:$0x3] }
  0xb0   : > { %v980_v21 = vpack.c.b16 %v969_v10, %v968_v7  ;;  %v2467_v7 = vrot.slane %v3118_v38, 10 }
  0xb4   : > { %2472 = vmatmul.msk.bf16.gmra.mxu2 %vm721_vm3, %v978_v63  ;;  %v1495_v63 = vpack.c.b16 %v1484_v60, %v1483_v59 }
  0xb5   : > { %2554 = vmatmul.msk.bf16.gmra.mxu0 %vm721_vm3, %v1319_v15  ;;  %v1454_v15 = vrot.slane %v2494_v1, 6  ;;  %v1464_v1 = vrot.slane %v2498_v62, 6 }
  0xb7   : > { %v1456_v22 = vrot.slane %v1454_v15, 4  ;;  %v1455_v27 = vsel %vm3206_vm7, %v2565_v8, %v1454_v15 }
  0xb8   : > { %v1485_v36 = vunpack.c.l.b16 %v1455_v27 }
  0xb9   : > { %v1458_v28 = vsel %vm3206_vm7, %v1456_v22, %v1457_v23  ;;  %v1289_v22 = vrot.slane %v1287_v16, 4  ;;  %v1290_v23 = vrot.slane %v2498_v62, 5  ;;  %v956_v62 = vrot.slane %v3159_v9, 6 }
  0xbb   : > { %2538 = vmatmul.msk.bf16.gmra.mxu3 %vm721_vm3, %v2705_v25  ;;  %2572 = vmatmul.msk.bf16.gmra.mxu1 %vm721_vm3, %v1494_v56  ;;  %v2466_v25 = vrot.slane %v3080_v11, 10 }
  0xbd   : > { %v940_v11 = vsel %vm3206_vm7, %v2466_v25, %v939_v17  ;;  %v1462_v17 = vsel %vm3206_vm7, %v2566_v50, %v1461_v54  ;;  %v2578_v50 = vld [vmem:[%s3033_s13 + $0xc4] sm:$0xf] }
  0xbe   : > { %v970_v44 = vunpack.c.l.b16 %v940_v11  ;;  %v1291_v11 = vsel %vm3024_vm4, %v1289_v22, %v1290_v23 }
  0xc4   : > { %2473 = vmatmul.msk.bf16.gmra.mxu2 %vm721_vm3, %v979_v37  ;;  %v1486_v37 = vunpack.c.l.b16 %v1458_v28  ;;  %v1288_v28 = vsel %vm3024_vm4, %v2549_v19, %v1287_v16  ;;  %v2579_v19 = vld [vmem:[%s3033_s13 + $0xc8] sm:$0x3] }
  0xc5   : > { %2555 = vmatmul.msk.bf16.gmra.mxu0 %vm721_vm3, %v1320_v46  ;;  %v971_v46 = vunpack.c.l.b16 %v943_v40  ;;  %v1313_v34 = vunpack.c.l.b16 %v1288_v28 }
  0xc6   : > { %v1496_v41 = vpack.c.b16 %v1486_v37, %v1485_v36  ;;  %v1314_v36 = vunpack.c.l.b16 %v1291_v11 }
  0xc7   : > { %v981_v60 = vpack.c.b16 %v971_v46, %v970_v44  ;;  %v2499_v44 = vld [vmem:[%s3033_s13 + $0xb4] sm:$0xf]  ;;  %v2501_v46 = vld [vmem:[%s3033_s13 + $0xbc] sm:$0x3] }
  0xc8   : > { %v859_v4 = vpop.f32.mrf.mxu1  ;;  %v2567_v51 = vrot.slane %v2499_v44, 10  ;;  %v1471_v43 = vrot.slane %v2501_v46, 6 }
  0xcb   : > { %2539 = vmatmul.msk.bf16.gmra.mxu3 %vm721_vm3, %v2706_v61  ;;  %2573 = vmatmul.msk.bf16.gmra.mxu1 %vm721_vm3, %v1495_v63  ;;  %v946_v61 = vrot.slane %v3110_v33, 6  ;;  %v1463_v63 = vrot.slane %v1461_v54, 4  ;;  %v949_v33 = vrot.slane %v3121_v39, 6  ;;  %v1323_v54 = vpack.c.b16 %v1314_v36, %v1313_v34 }
  0xcd   : > { %v948_v15 = vrot.slane %v946_v61, 4  ;;  %v1465_v18 = vsel %vm3206_vm7, %v1463_v63, %v1464_v1  ;;  %v947_v38 = vsel %vm3206_vm7, %v2467_v7, %v946_v61  ;;  %v2468_v61 = vrot.slane %v3152_v5, 10 }
  0xce   : > { %v879_v55 = vpop.f32.mrf.mxu3  ;;  %v1488_v25 = vunpack.c.l.b16 %v1465_v18  ;;  %v972_v14 = vunpack.c.l.b16 %v947_v38  ;;  %v1297_v7 = vrot.slane %v2501_v46, 5  ;;  %v1760_v18 = vrot.slane %v2578_v50, 5  ;;  %v2577_v38 = vld [vmem:[%s3033_s13 + $0xc0] sm:$0xf] }
  0xcf   : > { %v950_v53 = vsel %vm3206_vm7, %v948_v15, %v949_v33  ;;  %v2709_v33 = vld [vmem:[%s3033_s13 + $0xb4] sm:$0xff] }
  0xd0   : > { %v3329_v56 = vpop.f32.mrf.mxu1  ;;  %v973_v27 = vunpack.c.l.b16 %v950_v53  ;;  %v1762_v53 = vrot.slane %v1760_v18, 4 }
  0xd2   : > { %v759_v26 = vpop.f32.mrf.mxu0  ;;  %v982_v40 = vpack.c.b16 %v973_v27, %v972_v14  ;;  %v1763_v14 = vrot.slane %v2579_v19, 5 }
  0xd3   : > { %v3326_v20 = vadd.f32 %v859_v4, %v759_v26  ;;  %v1322_v4 = vpack.c.b16 %v1312_v48, %v1311_v57  ;;  %v2708_v26 = vld [vmem:[%s3033_s13 + $0xa8] sm:$0xff] }
  0xd4   : > { %2474 = vmatmul.msk.bf16.gmra.mxu2 %vm721_vm3, %v980_v21  ;;  %v1764_v34 = vsel %vm3024_vm4, %v1762_v53, %v1763_v14  ;;  %v2584_v53 = vld [vmem:[%s3033_s13 + $0xdc] sm:$0xf] }
  0xd5   : > { %2556 = vmatmul.msk.bf16.gmra.mxu0 %vm721_vm3, %v1321_v24  ;;  %v1487_v24 = vunpack.c.l.b16 %v1462_v17 }
  0xd6   : > { %v881_v31 = vpop.f32.mrf.mxu3 }
  0xd7   : > { %v779_v30 = vpop.f32.mrf.mxu2  ;;  %v1497_v29 = vpack.c.b16 %v1488_v25, %v1487_v24 }
  0xd8   : > { %v3339_v12 = vadd.f32 %v879_v55, %v779_v30  ;;  %v864_v52 = vpop.f32.mrf.mxu1  ;;  %v2500_v30 = vld [vmem:[%s3033_s13 + $0xb8] sm:$0xf] }
  0xd9   : > { %v1294_v48 = vrot.slane %v2500_v30, 5 }
  0xda   : > { %v3344_v45 = vpop.f32.mrf.mxu0 }
  0xdb   : > { %2540 = vmatmul.msk.bf16.gmra.mxu3 %vm721_vm3, %v2707_v35  ;;  %2574 = vmatmul.msk.bf16.gmra.mxu1 %vm721_vm3, %v1496_v41 }
  0xde   : > { %v884_v59 = vpop.f32.mrf.mxu3 }
  0xdf   : > { %v781_v58 = vpop.f32.mrf.mxu2 }
  0xe0   : > { %v3356_v47 = vadd.f32 %v881_v31, %v781_v58  ;;  %v3362_v55 = vpop.f32.mrf.mxu1  ;;  %v1468_v31 = vrot.slane %v2500_v30, 6 }
  0xe2   : > { %v764_v10 = vpop.f32.mrf.mxu0  ;;  %v1470_v41 = vrot.slane %v1468_v31, 4 }
  0xe3   : > { %v3359_v13 = vadd.f32 %v864_v52, %v764_v10  ;;  %v953_v52 = vrot.slane %v3148_v0, 6  ;;  %v2550_v0 = vrot.slane %v2499_v44, 9 }
  0xe4   : > { %2475 = vmatmul.msk.bf16.gmra.mxu2 %vm721_vm3, %v981_v60  ;;  %v1472_v60 = vsel %vm3206_vm7, %v1470_v41, %v1471_v43  ;;  %v2581_v41 = vld [vmem:[%s3033_s13 + $0xd0] sm:$0xf] }
  0xe5   : > { %2557 = vmatmul.msk.bf16.gmra.mxu0 %vm721_vm3, %v1322_v4  ;;  %v955_v6 = vrot.slane %v953_v52, 4  ;;  %v1296_v4 = vrot.slane %v1294_v48, 4  ;;  %v1490_v15 = vunpack.c.l.b16 %v1472_v60  ;;  %v954_v5 = vsel %vm3206_vm7, %v2468_v61, %v953_v52 }
  0xe6   : > { %v886_v8 = vpop.f32.mrf.mxu3  ;;  %v974_v24 = vunpack.c.l.b16 %v954_v5  ;;  %v1767_v61 = vrot.slane %v2581_v41, 5 }
  0xe7   : > { %v784_v21 = vpop.f32.mrf.mxu2  ;;  %v957_v9 = vsel %vm3206_vm7, %v955_v6, %v956_v62  ;;  %v1298_v22 = vsel %vm3024_vm4, %v1296_v4, %v1297_v7  ;;  %v2580_v6 = vld [vmem:[%s3033_s13 + $0xcc] sm:$0xf]  ;;  %v2582_v62 = vld [vmem:[%s3033_s13 + $0xd4] sm:$0x3] }
  0xe8   : > { %v3372_v39 = vadd.f32 %v884_v59, %v784_v21  ;;  %v869_v32 = vpop.f32.mrf.mxu1  ;;  %v1469_v59 = vsel %vm3206_vm7, %v2567_v51, %v1468_v31  ;;  %v975_v25 = vunpack.c.l.b16 %v957_v9  ;;  %v1316_v28 = vunpack.c.l.b16 %v1298_v22 }
  0xe9   : > { %v1489_v10 = vunpack.c.l.b16 %v1469_v59  ;;  %v1817_v51 = vunpack.c.l.b16 %v1764_v34  ;;  %v2643_v4 = vrot.slane %v2580_v6, 9  ;;  %v1769_v7 = vrot.slane %v1767_v61, 4 }
  0xea   : > { %v3377_v3 = vpop.f32.mrf.mxu0  ;;  %v983_v31 = vpack.c.b16 %v975_v25, %v974_v24  ;;  %v1941_v24 = vrot.slane %v2581_v41, 6  ;;  %v1774_v34 = vrot.slane %v2584_v53, 5 }
  0xeb   : > { %2541 = vmatmul.msk.bf16.gmra.mxu3 %vm721_vm3, %v2708_v26  ;;  %2575 = vmatmul.msk.bf16.gmra.mxu1 %vm721_vm3, %v1497_v29  ;;  %v1498_v23 = vpack.c.b16 %v1490_v15, %v1489_v10  ;;  %v2642_v26 = vrot.slane %v2577_v38, 9  ;;  %v1770_v10 = vrot.slane %v2582_v62, 5 }
  0xee   : > { %v889_v35 = vpop.f32.mrf.mxu3 }
  0xef   : > { %v786_v37 = vpop.f32.mrf.mxu2 }
  0xf0   : > { %v3388_v49 = vadd.f32 %v886_v8, %v786_v37  ;;  %v3405_v17 = vpop.f32.mrf.mxu1  ;;  %v1295_v8 = vsel %vm3024_vm4, %v2550_v0, %v1294_v48  ;;  %v1937_v48 = vrot.slane %v2579_v19, 6  ;;  %v1768_v19 = vsel %vm3024_vm4, %v2643_v4, %v1767_v61 }
  0xf1   : > { %v1315_v27 = vunpack.c.l.b16 %v1295_v8  ;;  %v1771_v8 = vsel %vm3024_vm4, %v1769_v7, %v1770_v10  ;;  %v1818_v25 = vunpack.c.l.b16 %v1768_v19  ;;  %v1948_v10 = vrot.slane %v2584_v53, 6  ;;  %v2588_v53 = vld [vmem:[%s3033_s13 + $0xec] sm:$0x3] }
  0xf2   : > { %v769_v57 = vpop.f32.mrf.mxu0 }
  0xf3   : > { %v3391_v58 = vadd.f32 %v869_v32, %v769_v57  ;;  %v1761_v32 = vsel %vm3024_vm4, %v2642_v26, %v1760_v18  ;;  %v1324_v36 = vpack.c.b16 %v1316_v28, %v1315_v27  ;;  %v1819_v26 = vunpack.c.l.b16 %v1771_v8 }
  0xf4   : > { %2476 = vmatmul.msk.bf16.gmra.mxu2 %vm721_vm3, %v982_v40  ;;  %v1934_v40 = vrot.slane %v2578_v50, 6  ;;  %v1816_v46 = vunpack.c.l.b16 %v1761_v32  ;;  %v2660_v28 = vrot.slane %v2580_v6, 10  ;;  %v1950_v19 = vrot.slane %v1948_v10, 4 }
  0xf5   : > { %2558 = vmatmul.msk.bf16.gmra.mxu0 %vm721_vm3, %v1323_v54  ;;  %v2659_v54 = vrot.slane %v2577_v38, 10  ;;  %v2710_v38 = vld [vmem:[%s3033_s13 + $0xc0] sm:$0xff]  ;;  %v1833_v32 = vpack.c.b16 %v1819_v26, %v1818_v25 }
  0xf6   : > { %v891_v1 = vpop.f32.mrf.mxu3  ;;  %v1936_v57 = vrot.slane %v1934_v40, 4  ;;  %v1832_v60 = vpack.c.b16 %v1817_v51, %v1816_v46  ;;  %v1942_v46 = vsel %vm3206_vm7, %v2660_v28, %v1941_v24  ;;  %v2586_v26 = vld [vmem:[%s3033_s13 + $0xe4] sm:$0xf] }
  0xf7   : > { %v789_v63 = vpop.f32.mrf.mxu2  ;;  %v1935_v50 = vsel %vm3206_vm7, %v2659_v54, %v1934_v40  ;;  %v862_v54 = vadd.f32 %v3329_v56, %v3344_v45 }
  0xf8   : > { %v3402_v16 = vadd.f32 %v889_v35, %v789_v63  ;;  %v874_v35 = vpop.f32.mrf.mxu1  ;;  %v1938_v63 = vsel %vm3206_vm7, %v1936_v57, %v1937_v48  ;;  %v1990_v15 = vunpack.c.l.b16 %v1935_v50  ;;  %v1992_v57 = vunpack.c.l.b16 %v1942_v46  ;;  %v2712_v46 = vld [vmem:[%s3033_s13 + $0xd8] sm:$0xff] }
  0xfa   : > { %v3413_v21 = vpop.f32.mrf.mxu0 }
  0xfb   : > { %2542 = vmatmul.msk.bf16.gmra.mxu3 %vm721_vm3, %v2709_v33  ;;  %2576 = vmatmul.msk.bf16.gmra.mxu1 %vm721_vm3, %v1498_v23  ;;  %v1991_v33 = vunpack.c.l.b16 %v1938_v63 }
  0xfd   : > { %v2006_v22 = vpack.c.b16 %v1991_v33, %v1990_v15  ;;  %v2587_v33 = vld [vmem:[%s3033_s13 + $0xe8] sm:$0xf] }
  0xfe   : > { %v894_v29 = vpop.f32.mrf.mxu3 }
  0xff   : > { %v791_v11 = vpop.f32.mrf.mxu2 }
 0x100   : > { %v3421_v30 = vadd.f32 %v891_v1, %v791_v11  ;;  %v2719_v1 = vld [vmem:[%s3737_s3 + $0x8] sm:$0xff]  ;;  %v1943_v11 = vrot.slane %v1941_v24, 4  ;;  %v1781_v24 = vrot.slane %v2587_v33, 5 }
 0x101   : > { %2201 = vmatpush.bf16.msra.mxu1 %v2719_v1 }
 0x102   : > { %v774_v37 = vpop.f32.mrf.mxu0 }
 0x103   : > { %v3427_v44 = vadd.f32 %v874_v35, %v774_v37  ;;  %v2583_v37 = vld [vmem:[%s3033_s13 + $0xd8] sm:$0xf]  ;;  %v2585_v35 = vld [vmem:[%s3033_s13 + $0xe0] sm:$0x3] }
 0x104   : > { %2477 = vmatmul.msk.bf16.gmra.mxu2 %vm721_vm3, %v983_v31  ;;  %v1951_v8 = vrot.slane %v2585_v35, 6 }
 0x105   : > { %2559 = vmatmul.msk.bf16.gmra.mxu0 %vm721_vm3, %v1324_v36 }
 0x106   : > { %v896_v52 = vpop.f32.mrf.mxu3  ;;  %v1952_v28 = vsel %vm3206_vm7, %v1950_v19, %v1951_v8 }
 0x107   : > { %v794_v43 = vpop.f32.mrf.mxu2 }
 0x108   : > { %v3432_v59 = vadd.f32 %v894_v29, %v794_v43  ;;  %v1944_v29 = vrot.slane %v2582_v62, 6  ;;  %v2644_v43 = vrot.slane %v2583_v37, 9  ;;  %v2711_v62 = vld [vmem:[%s3033_s13 + $0xcc] sm:$0xff] }
 0x10a   : > { %v3436_v0 = vpop.f32.mrf.mxu0  ;;  %v1945_v51 = vsel %vm3206_vm7, %v1943_v11, %v1944_v29  ;;  %v1775_v50 = vsel %vm3024_vm4, %v2644_v43, %v1774_v34  ;;  %v2645_v29 = vrot.slane %v2586_v26, 9 }
 0x10b   : > { %2651 = vmatmul.msk.bf16.vlgmr.msra.gmra.mxu3 %vm721_vm3, %v1832_v60  ;;  %v1993_v48 = vunpack.c.l.b16 %v1945_v51  ;;  %v1820_v45 = vunpack.c.l.b16 %v1775_v50 }
 0x10c   : > { %v1782_v51 = vsel %vm3024_vm4, %v2645_v29, %v1781_v24 }
 0x10d   : > { %v2007_v4 = vpack.c.b16 %v1993_v48, %v1992_v57  ;;  %v1955_v57 = vrot.slane %v2587_v33, 6 }
 0x10e   : > { %v1179_v9 = vpop.f32.mrf.mxu3 }
 0x10f   : > { %v796_v5 = vpop.f32.mrf.mxu2  ;;  %v1957_v50 = vrot.slane %v1955_v57, 4 }
 0x110   : > { %v3446_v18 = vadd.f32 %v896_v52, %v796_v5  ;;  %v1776_v52 = vrot.slane %v1774_v34, 4 }
 0x112   : > { %v1361_v23 = vpop.f32.mrf.mxu0 }
 0x114   : > { %2634 = vmatmul.msk.bf16.vlgmr.msra.gmra.mxu2 %vm721_vm3, %v2710_v38  ;;  %v2661_v38 = vrot.slane %v2583_v37, 10 }
 0x115   : > { %2668 = vmatmul.msk.bf16.vlgmr.msra.gmra.mxu0 %vm721_vm3, %v2006_v22 }
 0x116   : > { %v1181_v27 = vpop.f32.mrf.mxu3 }
 0x117   : > { %v1020_v14 = vpop.f32.mrf.mxu2 }
 0x118   : > { %v1060_v31 = vadd.f32 %v1020_v14, %v3326_v20  ;;  %v1777_v20 = vrot.slane %v2585_v35, 5 }
 0x11a   : > { %v1219_v36 = vadd.f32 %v1179_v9, %v1060_v31  ;;  %v1363_v40 = vpop.f32.mrf.mxu0  ;;  %v1778_v63 = vsel %vm3024_vm4, %v1776_v52, %v1777_v20  ;;  %v1783_v31 = vrot.slane %v1781_v24, 4 }
 0x11b   : > { %2652 = vmatmul.msk.bf16.gmra.mxu3 %vm721_vm3, %v1833_v32  ;;  %v1821_v15 = vunpack.c.l.b16 %v1778_v63  ;;  %v867_v32 = vadd.f32 %v3362_v55, %v3377_v3  ;;  %v1822_v3 = vunpack.c.l.b16 %v1782_v51  ;;  %v1958_v63 = vrot.slane %v2588_v53, 6 }
 0x11c   : > { %v3463_v41 = vadd.f32 %v1361_v23, %v1219_v36  ;;  %v1995_v36 = vunpack.c.l.b16 %v1952_v28 }
 0x11d   : > { %v1834_v23 = vpack.c.b16 %v1821_v15, %v1820_v45  ;;  %v2589_v45 = vld [vmem:[%s3033_s13 + $0xf0] sm:$0xf]  ;;  %v2591_v15 = vld [vmem:[%s3033_s13 + $0xf8] sm:$0x3] }
 0x11e   : > { %v1184_v61 = vpop.f32.mrf.mxu3  ;;  %v2646_v19 = vrot.slane %v2589_v45, 9  ;;  %v1965_v51 = vrot.slane %v2591_v15, 6 }
 0x11f   : > { %v1022_v60 = vpop.f32.mrf.mxu2 }
 0x120   : > { %v1061_v6 = vadd.f32 %v1022_v60, %v862_v54  ;;  %v2590_v60 = vld [vmem:[%s3033_s13 + $0xf4] sm:$0xf] }
 0x122   : > { %v1220_v1 = vadd.f32 %v1181_v27, %v1061_v6  ;;  %v1366_v7 = vpop.f32.mrf.mxu0  ;;  %v1949_v27 = vsel %vm3206_vm7, %v2661_v38, %v1948_v10 }
 0x123   : > { %v1994_v34 = vunpack.c.l.b16 %v1949_v27 }
 0x124   : > { %2635 = vmatmul.msk.bf16.gmra.mxu2 %vm721_vm3, %v2711_v62  ;;  %v3474_v56 = vadd.f32 %v1363_v40, %v1220_v1  ;;  %v2662_v62 = vrot.slane %v2586_v26, 10 }
 0x125   : > { %2669 = vmatmul.msk.bf16.gmra.mxu0 %vm721_vm3, %v2007_v4  ;;  %v2008_v20 = vpack.c.b16 %v1995_v36, %v1994_v34  ;;  %v2593_v36 = vld [vmem:[%s3033_s13 + $0x100] sm:$0xf] }
 0x126   : > { %v1186_v9 = vpop.f32.mrf.mxu3 }
 0x127   : > { %v1025_v5 = vpop.f32.mrf.mxu2 }
 0x128   : > { %v1062_v22 = vadd.f32 %v1025_v5, %v3359_v13  ;;  %v1784_v13 = vrot.slane %v2588_v53, 5  ;;  %v1956_v5 = vsel %vm3206_vm7, %v2662_v62, %v1955_v57  ;;  %v2592_v57 = vld [vmem:[%s3033_s13 + $0xfc] sm:$0xf]  ;;  %v2718_v62 = vld [vmem:[%s3737_s3] sm:$0xff] }
 0x129   : > { %2202 = vmatpush.bf16.msra.mxu1 %v2718_v62 }
 0x12a   : > { %v1221_v25 = vadd.f32 %v1184_v61, %v1062_v22  ;;  %v1368_v14 = vpop.f32.mrf.mxu0  ;;  %v1785_v43 = vsel %vm3024_vm4, %v1783_v31, %v1784_v13  ;;  %v872_v22 = vadd.f32 %v3405_v17, %v3413_v21 }
 0x12b   : > { %2653 = vmatmul.msk.bf16.gmra.mxu3 %vm721_vm3, %v1834_v23  ;;  %v1823_v48 = vunpack.c.l.b16 %v1785_v43  ;;  %v1996_v23 = vunpack.c.l.b16 %v1956_v5  ;;  %v2714_v5 = vld [vmem:[%s3033_s13 + $0xf0] sm:$0xff] }
 0x12c   : > { %v3485_v11 = vadd.f32 %v1366_v7, %v1221_v25  ;;  %v1788_v7 = vrot.slane %v2590_v60, 5 }
 0x12d   : > { %v1835_v4 = vpack.c.b16 %v1823_v48, %v1822_v3  ;;  %v2594_v3 = vld [vmem:[%s3033_s13 + $0x104] sm:$0x3]  ;;  %v876_v48 = vpop.f32.mrf.mxu1 }
 0x12e   : > { %v1189_v35 = vpop.f32.mrf.mxu3  ;;  %v1790_v8 = vrot.slane %v1788_v7, 4  ;;  %v1789_v27 = vsel %vm3024_vm4, %v2646_v19, %v1788_v7 }
 0x12f   : > { %v1027_v37 = vpop.f32.mrf.mxu2  ;;  %v1824_v21 = vunpack.c.l.b16 %v1789_v27  ;;  %v2664_v27 = vrot.slane %v2592_v57, 10 }
 0x130   : > { %v1063_v40 = vadd.f32 %v1027_v37, %v867_v32  ;;  %v1962_v32 = vrot.slane %v2590_v60, 6 }
 0x132   : > { %v1222_v52 = vadd.f32 %v1186_v9, %v1063_v40  ;;  %v1371_v54 = vpop.f32.mrf.mxu0  ;;  %v1959_v9 = vsel %vm3206_vm7, %v1957_v50, %v1958_v63  ;;  %v2663_v40 = vrot.slane %v2589_v45, 10 }
 0x133   : > { %v1997_v24 = vunpack.c.l.b16 %v1959_v9 }
 0x134   : > { %2636 = vmatmul.msk.bf16.gmra.mxu2 %vm721_vm3, %v2712_v46  ;;  %v3496_v55 = vadd.f32 %v1368_v14, %v1222_v52  ;;  %v2713_v14 = vld [vmem:[%s3033_s13 + $0xe4] sm:$0xff]  ;;  %v1964_v46 = vrot.slane %v1962_v32, 4 }
 0x135   : > { %2670 = vmatmul.msk.bf16.gmra.mxu0 %vm721_vm3, %v2008_v20  ;;  %v2009_v31 = vpack.c.b16 %v1997_v24, %v1996_v23  ;;  %v1795_v20 = vrot.slane %v2593_v36, 5  ;;  %v1969_v23 = vrot.slane %v2593_v36, 6  ;;  %v2597_v36 = vld [vmem:[%s3033_s13 + $0x110] sm:$0x3] }
 0x136   : > { %v1191_v6 = vpop.f32.mrf.mxu3 }
 0x137   : > { %v1030_v61 = vpop.f32.mrf.mxu2  ;;  %v1797_v63 = vrot.slane %v1795_v20, 4 }
 0x138   : > { %v1064_v1 = vadd.f32 %v1030_v61, %v3391_v58  ;;  %v1791_v58 = vrot.slane %v2591_v15, 5  ;;  %v1963_v61 = vsel %vm3206_vm7, %v2663_v40, %v1962_v32 }
 0x139   : > { %v1998_v7 = vunpack.c.l.b16 %v1963_v61 }
 0x13a   : > { %v1223_v10 = vadd.f32 %v1189_v35, %v1064_v1  ;;  %v1373_v33 = vpop.f32.mrf.mxu0  ;;  %v1792_v28 = vsel %vm3024_vm4, %v1790_v8, %v1791_v58  ;;  %v1798_v1 = vrot.slane %v2594_v3, 5 }
 0x13b   : > { %2654 = vmatmul.msk.bf16.gmra.mxu3 %vm721_vm3, %v1835_v4  ;;  %v1825_v34 = vunpack.c.l.b16 %v1792_v28  ;;  %v877_v4 = vadd.f32 %v876_v48, %v3436_v0  ;;  %v1971_v28 = vrot.slane %v1969_v23, 4  ;;  %v2715_v48 = vld [vmem:[%s3033_s13 + $0xfc] sm:$0xff] }
 0x13c   : > { %v3507_v38 = vadd.f32 %v1371_v54, %v1223_v10  ;;  %v1799_v19 = vsel %vm3024_vm4, %v1797_v63, %v1798_v1 }
 0x13d   : > { %v1836_v52 = vpack.c.b16 %v1825_v34, %v1824_v21  ;;  %v2595_v34 = vld [vmem:[%s3033_s13 + $0x108] sm:$0xf] }
 0x13e   : > { %v1194_v26 = vpop.f32.mrf.mxu3 }
 0x13f   : > { %v1032_v25 = vpop.f32.mrf.mxu2 }
 0x140   : > { %v1065_v53 = vadd.f32 %v1032_v25, %v872_v22  ;;  %v1827_v25 = vunpack.c.l.b16 %v1799_v19 }
 0x142   : > { %v1224_v29 = vadd.f32 %v1191_v6, %v1065_v53  ;;  %v1376_v13 = vpop.f32.mrf.mxu0  ;;  %v1966_v6 = vsel %vm3206_vm7, %v1964_v46, %v1965_v51  ;;  %v2648_v51 = vrot.slane %v2595_v34, 9 }
 0x143   : > { %v1999_v10 = vunpack.c.l.b16 %v1966_v6 }
 0x144   : > { %2637 = vmatmul.msk.bf16.gmra.mxu2 %vm721_vm3, %v2713_v14  ;;  %v3518_v17 = vadd.f32 %v1373_v33, %v1224_v29  ;;  %v1972_v29 = vrot.slane %v2594_v3, 6 }
 0x145   : > { %2671 = vmatmul.msk.bf16.gmra.mxu0 %vm721_vm3, %v2009_v31  ;;  %v2010_v58 = vpack.c.b16 %v1999_v10, %v1998_v7 }
 0x146   : > { %v1196_v35 = vpop.f32.mrf.mxu3  ;;  %v1973_v40 = vsel %vm3206_vm7, %v1971_v28, %v1972_v29 }
 0x147   : > { %v1035_v37 = vpop.f32.mrf.mxu2 }
 0x148   : > { %v1066_v43 = vadd.f32 %v1035_v37, %v3427_v44  ;;  %v2647_v44 = vrot.slane %v2592_v57, 9 }
 0x14a   : > { %v1225_v54 = vadd.f32 %v1194_v26, %v1066_v43  ;;  %v1378_v60 = vpop.f32.mrf.mxu0  ;;  %v1796_v9 = vsel %vm3024_vm4, %v2647_v44, %v1795_v20  ;;  %v2596_v26 = vld [vmem:[%s3033_s13 + $0x10c] sm:$0xf]  ;;  %v2001_v20 = vunpack.c.l.b16 %v1973_v40 }
 0x14b   : > { %2655 = vmatmul.msk.bf16.gmra.mxu3 %vm721_vm3, %v1836_v52  ;;  %v1826_v24 = vunpack.c.l.b16 %v1796_v9  ;;  %v1802_v32 = vrot.slane %v2596_v26, 5  ;;  %v1976_v63 = vrot.slane %v2596_v26, 6 }
 0x14c   : > { %v3532_v50 = vadd.f32 %v1376_v13, %v1225_v54 }
 0x14d   : > { %v1837_v13 = vpack.c.b16 %v1827_v25, %v1826_v24  ;;  %v1804_v43 = vrot.slane %v1802_v32, 4 }
 0x14e   : > { %v1199_v15 = vpop.f32.mrf.mxu3 }
 0x14f   : > { %v1037_v45 = vpop.f32.mrf.mxu2 }
 0x150   : > { %v1067_v33 = vadd.f32 %v1037_v45, %v877_v4 }
 0x152   : > { %v1226_v8 = vadd.f32 %v1196_v35, %v1067_v33  ;;  %v1381_v22 = vpop.f32.mrf.mxu0  ;;  %v1970_v35 = vsel %vm3206_vm7, %v2664_v27, %v1969_v23  ;;  %v1978_v33 = vrot.slane %v1976_v63, 4  ;;  %v2600_v23 = vld [vmem:[%s3033_s13 + $0x11c] sm:$0x3] }
 0x153   : > { %v2000_v52 = vunpack.c.l.b16 %v1970_v35  ;;  %v1986_v42 = vrot.slane %v2600_v23, 6 }
 0x154   : > { %2638 = vmatmul.msk.bf16.gmra.mxu2 %vm721_vm3, %v2714_v5  ;;  %v3542_v0 = vadd.f32 %v1378_v60, %v1226_v8  ;;  %v1803_v60 = vsel %vm3024_vm4, %v2648_v51, %v1802_v32  ;;  %v1979_v5 = vrot.slane %v2597_v36, 6 }
 0x155   : > { %2672 = vmatmul.msk.bf16.gmra.mxu0 %vm721_vm3, %v2010_v58  ;;  %v2011_v62 = vpack.c.b16 %v2001_v20, %v2000_v52  ;;  %v1828_v4 = vunpack.c.l.b16 %v1803_v60 }
 0x156   : > { %v1201_v14 = vpop.f32.mrf.mxu3  ;;  %v1980_v26 = vsel %vm3206_vm7, %v1978_v33, %v1979_v5 }
 0x157   : > { %v1040_v53 = vpop.f32.mrf.mxu2  ;;  %v2003_v29 = vunpack.c.l.b16 %v1980_v26 }
 0x158   : > { %v1068_v31 = vadd.f32 %v1040_v53, %v3339_v12  ;;  %v1805_v12 = vrot.slane %v2597_v36, 5 }
 0x15a   : > { %v1227_v21 = vadd.f32 %v1199_v15, %v1068_v31  ;;  %v1383_v37 = vpop.f32.mrf.mxu0  ;;  %v1806_v61 = vsel %vm3024_vm4, %v1804_v43, %v1805_v12  ;;  %v2665_v15 = vrot.slane %v2595_v34, 10  ;;  %v1535_v43 = vpop.f32.mrf.mxu1 }
 0x15b   : > { %2656 = vmatmul.msk.bf16.gmra.mxu3 %vm721_vm3, %v1837_v13  ;;  %v1829_v7 = vunpack.c.l.b16 %v1806_v61 }
 0x15c   : > { %v3553_v46 = vadd.f32 %v1381_v22, %v1227_v21  ;;  %v2598_v22 = vld [vmem:[%s3033_s13 + $0x114] sm:$0xf]  ;;  %v1977_v25 = vsel %vm3206_vm7, %v2665_v15, %v1976_v63  ;;  %v2716_v21 = vld [vmem:[%s3033_s13 + $0x108] sm:$0xff] }
 0x15d   : > { %v1838_v19 = vpack.c.b16 %v1829_v7, %v1828_v4  ;;  %v2002_v28 = vunpack.c.l.b16 %v1977_v25  ;;  %v2717_v15 = vld [vmem:[%s3033_s13 + $0x114] sm:$0xff] }
 0x15e   : > { %v1204_v57 = vpop.f32.mrf.mxu3 }
 0x15f   : > { %v1042_v54 = vpop.f32.mrf.mxu2  ;;  %v2012_v35 = vpack.c.b16 %v2003_v29, %v2002_v28 }
 0x160   : > { %v1069_v3 = vadd.f32 %v1042_v54, %v3356_v47  ;;  %v2599_v47 = vld [vmem:[%s3033_s13 + $0x118] sm:$0xf]  ;;  %s2401_s13 = sshll.u32 %s3759_s12, 1 }
 0x161   : > { %v1809_v8 = vrot.slane %v2599_v47, 5  ;;  %v1983_v51 = vrot.slane %v2599_v47, 6  ;;  %s582_s17 = sadd.s32 %s2402_s14, %s2401_s13 }
 0x162   : > { %v1228_v6 = vadd.f32 %v1201_v14, %v1069_v3  ;;  %v1386_v44 = vpop.f32.mrf.mxu0  ;;  %v2649_v14 = vrot.slane %v2598_v22, 9  ;;  %v1537_v4 = vpop.f32.mrf.mxu1  ;;  %s2403_s27 = sshll.u32 %s582_s17, 2 }
 0x163   : > { %v1811_v27 = vrot.slane %v1809_v8, 4  ;;  %v1985_v3 = vrot.slane %v1983_v51, 4  ;;  %s3664_s29 = scalar_lea.vmem %s3739_s5, %s2403_s27 }
 0x164   : > { %2639 = vmatmul.msk.bf16.gmra.mxu2 %vm721_vm3, %v2715_v48  ;;  %v3563_v1 = vadd.f32 %v1383_v37, %v1228_v6  ;;  %v1810_v34 = vsel %vm3024_vm4, %v2649_v14, %v1809_v8 }
 0x165   : > { %2673 = vmatmul.msk.bf16.gmra.mxu0 %vm721_vm3, %v2011_v62  ;;  %v1830_v52 = vunpack.c.l.b16 %v1810_v34 }
 0x166   : > { %v1206_v45 = vpop.f32.mrf.mxu3 }
 0x167   : > { %v1045_v10 = vpop.f32.mrf.mxu2 }
 0x168   : > { %v1070_v9 = vadd.f32 %v1045_v10, %v3372_v39  ;;  %v1812_v39 = vrot.slane %v2600_v23, 5 }
 0x16a   : > { %v1229_v58 = vadd.f32 %v1204_v57, %v1070_v9  ;;  %v1388_v24 = vpop.f32.mrf.mxu0  ;;  %v1813_v36 = vsel %vm3024_vm4, %v1811_v27, %v1812_v39  ;;  %v2666_v57 = vrot.slane %v2598_v22, 10 }
 0x16b   : > { %2657 = vmatmul.msk.bf16.gmra.mxu3 %vm721_vm3, %v1838_v19  ;;  %v1831_v20 = vunpack.c.l.b16 %v1813_v36 }
 0x16c   : > { %v3574_v53 = vadd.f32 %v1386_v44, %v1229_v58  ;;  %v1984_v62 = vsel %vm3206_vm7, %v2666_v57, %v1983_v51  ;;  %v1987_v44 = vsel %vm3206_vm7, %v1985_v3, %v1986_v42  ;;  %v1540_v58 = vpop.f32.mrf.mxu1 }
 0x16d   : > { %v1839_v60 = vpack.c.b16 %v1831_v20, %v1830_v52  ;;  %v2004_v7 = vunpack.c.l.b16 %v1984_v62  ;;  %v2005_v47 = vunpack.c.l.b16 %v1987_v44 }
 0x16e   : > { %v1209_v13 = vpop.f32.mrf.mxu3 }
 0x16f   : > { %v1047_v31 = vpop.f32.mrf.mxu2  ;;  %v2013_v5 = vpack.c.b16 %v2005_v47, %v2004_v7 }
 0x170   : > { %v1071_v32 = vadd.f32 %v1047_v31, %v3388_v49  ;;  %v1575_v31 = vadd.f32 %v1535_v43, %v3463_v41 }
 0x172   : > { %v1230_v37 = vadd.f32 %v1206_v45, %v1071_v32  ;;  %v1391_v40 = vpop.f32.mrf.mxu0 }
 0x174   : > { %2640 = vmatmul.msk.bf16.gmra.mxu2 %vm721_vm3, %v2716_v21  ;;  %v3584_v12 = vadd.f32 %v1388_v24, %v1230_v37  ;;  %v1542_v27 = vpop.f32.mrf.mxu1  ;;  %v1576_v37 = vadd.f32 %v1537_v4, %v3474_v56 }
 0x175   : > { %2674 = vmatmul.msk.bf16.gmra.mxu0 %vm721_vm3, %v2012_v35  ;;  %v1578_v4 = vadd.f32 %v1542_v27, %v3496_v55 }
 0x176   : > { %v1211_v54 = vpop.f32.mrf.mxu3 }
 0x177   : > { %v1050_v49 = vpop.f32.mrf.mxu2 }
 0x178   : > { %v1072_v48 = vadd.f32 %v1050_v49, %v3402_v16 }
 0x17a   : > { %v1231_v61 = vadd.f32 %v1209_v13, %v1072_v48  ;;  %v1393_v6 = vpop.f32.mrf.mxu0 }
 0x17b   : > { %2658 = vmatmul.msk.bf16.gmra.mxu3 %vm721_vm3, %v1839_v60 }
 0x17c   : > { %v3592_v63 = vadd.f32 %v1391_v40, %v1231_v61 }
 0x17e   : > { %v1214_v45 = vpop.f32.mrf.mxu3 }
 0x17f   : > { %v1052_v10 = vpop.f32.mrf.mxu2 }
 0x180   : > { %v1073_v16 = vadd.f32 %v1052_v10, %v3421_v30 }
 0x182   : > { %v1232_v33 = vadd.f32 %v1211_v54, %v1073_v16  ;;  %v1396_v9 = vpop.f32.mrf.mxu0  ;;  %v1577_v54 = vadd.f32 %v1540_v58, %v3485_v11 }
 0x184   : > { %2641 = vmatmul.msk.bf16.gmra.mxu2 %vm721_vm3, %v2717_v15  ;;  %v3598_v19 = vadd.f32 %v1393_v6, %v1232_v33 }
 0x185   : > { %2675 = vmatmul.msk.bf16.gmra.mxu0 %vm721_vm3, %v2013_v5 }
 0x186   : > { %v1216_v8 = vpop.f32.mrf.mxu3 }
 0x187   : > { %v1055_v2 = vpop.f32.mrf.mxu2 }
 0x188   : > { %v1074_v22 = vadd.f32 %v1055_v2, %v3432_v59  ;;  %v1545_v59 = vpop.f32.mrf.mxu1 }
 0x18a   : > { %v1233_v23 = vadd.f32 %v1214_v45, %v1074_v22  ;;  %v1398_v24 = vpop.f32.mrf.mxu0 }
 0x18c   : > { %v3602_v25 = vadd.f32 %v1396_v9, %v1233_v23  ;;  %v1579_v9 = vadd.f32 %v1545_v59, %v3507_v38 }
 0x18e   : > { %v1876_v26 = vpop.f32.mrf.mxu3 }
 0x18f   : > { %v1057_v30 = vpop.f32.mrf.mxu2 }
 0x190   : > { %v1075_v14 = vadd.f32 %v1057_v30, %v3446_v18  ;;  %v3612_v18 = vld [vmem:[%s3736_s2] ss:$0 sm:$0xff]  ;;  %v1547_v57 = vpop.f32.mrf.mxu1 }
 0x191   : > { %v1580_v27 = vadd.f32 %v1547_v57, %v3518_v17 }
 0x192   : > { %v1234_v39 = vadd.f32 %v1216_v8, %v1075_v14  ;;  %v2050_v28 = vpop.f32.mrf.mxu0 }
 0x194   : > { %v3605_v29 = vadd.f32 %v1398_v24, %v1234_v39 }
 0x196   : > { %v1878_v32 = vpop.f32.mrf.mxu3 }
 0x197   : > { %v1694_v13 = vpop.f32.mrf.mxu2 }
 0x198   : > { %v1734_v21 = vadd.f32 %v1694_v13, %v1575_v31  ;;  %v1550_v10 = vpop.f32.mrf.mxu1 }
 0x19a   : > { %v2052_v34 = vpop.f32.mrf.mxu0  ;;  %v1916_v36 = vadd.f32 %v1876_v26, %v1734_v21 }
 0x19c   : > { %v2090_v51 = vadd.f32 %v2050_v28, %v1916_v36  ;;  %v1581_v36 = vadd.f32 %v1550_v10, %v3532_v50 }
 0x19e   : > { %v1881_v40 = vpop.f32.mrf.mxu3  ;;  %v2110_v41 = vadd.f32 %v3612_v18, %v2090_v51 }
 0x19f   : > { %v1696_v35 = vpop.f32.mrf.mxu2 }
 0x1a0   : > { %v1735_v52 = vadd.f32 %v1696_v35, %v1576_v37  ;;  %v2126_v48 = vmax.f32 %v2110_v41, 0.0  ;;  %v1552_v55 = vpop.f32.mrf.mxu1 }
 0x1a2   : > { %v1917_v20 = vadd.f32 %v1878_v32, %v1735_v52  ;;  %v2055_v49 = vpop.f32.mrf.mxu0 }
 0x1a4   : > { %v2091_v43 = vadd.f32 %v2052_v34, %v1917_v20 }
 0x1a6   : > { %v2111_v3 = vadd.f32 %v3612_v18, %v2091_v43  ;;  %v1883_v42 = vpop.f32.mrf.mxu3  ;;  %v1582_v43 = vadd.f32 %v1552_v55, %v3542_v0 }
 0x1a7   : > { %v1699_v56 = vpop.f32.mrf.mxu2 }
 0x1a8   : > { %v2127_v60 = vmax.f32 %v2111_v3, 0.0  ;;  %v1736_v61 = vadd.f32 %v1699_v56, %v1577_v54  ;;  %v1555_v21 = vpop.f32.mrf.mxu1 }
 0x1aa   : > { %v2142_v6 = vpack.c.bf16 %v2127_v60, %v2126_v48  ;;  %v2057_v62 = vpop.f32.mrf.mxu0  ;;  %v1918_v44 = vadd.f32 %v1881_v40, %v1736_v61 }
 0x1ac   : > { %2684 = vmatmul.msk.bf16.vlgmr.msra.gmra.mxu1 %vm2170_vm8, %v2142_v6  ;;  %v2092_v11 = vadd.f32 %v2055_v49, %v1918_v44  ;;  %v1583_v6 = vadd.f32 %v1555_v21, %v3553_v46 }
 0x1ae   : > { %v1886_v47 = vpop.f32.mrf.mxu3  ;;  %v2112_v33 = vadd.f32 %v3612_v18, %v2092_v11 }
 0x1af   : > { %v1701_v7 = vpop.f32.mrf.mxu2 }
 0x1b0   : > { %v1737_v45 = vadd.f32 %v1701_v7, %v1578_v4  ;;  %v2128_v22 = vmax.f32 %v2112_v33, 0.0  ;;  %v1557_v54 = vpop.f32.mrf.mxu1 }
 0x1b2   : > { %v1919_v16 = vadd.f32 %v1883_v42, %v1737_v45  ;;  %v2060_v15 = vpop.f32.mrf.mxu0 }
 0x1b4   : > { %v2093_v5 = vadd.f32 %v2057_v62, %v1919_v16 }
 0x1b6   : > { %v2113_v2 = vadd.f32 %v3612_v18, %v2093_v5  ;;  %v1888_v58 = vpop.f32.mrf.mxu3 }
 0x1b7   : > { %v1704_v8 = vpop.f32.mrf.mxu2 }
 0x1b8   : > { %v2129_v23 = vmax.f32 %v2113_v2, 0.0  ;;  %v1738_v24 = vadd.f32 %v1704_v8, %v1579_v9  ;;  %v1560_v0 = vpop.f32.mrf.mxu1 }
 0x1ba   : > { %v2143_v30 = vpack.c.bf16 %v2129_v23, %v2128_v22  ;;  %v2062_v26 = vpop.f32.mrf.mxu0  ;;  %v1920_v14 = vadd.f32 %v1886_v47, %v1738_v24  ;;  %v1585_v24 = vadd.f32 %v1560_v0, %v3574_v53 }
 0x1bc   : > { %2685 = vmatmul.msk.bf16.gmra.mxu1 %vm2170_vm8, %v2143_v30  ;;  %v2094_v31 = vadd.f32 %v2060_v15, %v1920_v14  ;;  %v1584_v15 = vadd.f32 %v1557_v54, %v3563_v1 }
 0x1be   : > { %v1891_v28 = vpop.f32.mrf.mxu3  ;;  %v2114_v34 = vadd.f32 %v3612_v18, %v2094_v31 }
 0x1bf   : > { %v1706_v39 = vpop.f32.mrf.mxu2 }
 0x1c0   : > { %v1739_v13 = vadd.f32 %v1706_v39, %v1580_v27  ;;  %v2130_v51 = vmax.f32 %v2114_v34, 0.0  ;;  %v1562_v8 = vpop.f32.mrf.mxu1 }
 0x1c2   : > { %v1921_v38 = vadd.f32 %v1888_v58, %v1739_v13  ;;  %v2065_v32 = vpop.f32.mrf.mxu0 }
 0x1c4   : > { %v2095_v59 = vadd.f32 %v2062_v26, %v1921_v38  ;;  %v1586_v38 = vadd.f32 %v1562_v8, %v3584_v12 }
 0x1c6   : > { %v2115_v37 = vadd.f32 %v3612_v18, %v2095_v59  ;;  %v1893_v40 = vpop.f32.mrf.mxu3 }
 0x1c7   : > { %v1709_v35 = vpop.f32.mrf.mxu2 }
 0x1c8   : > { %v2131_v52 = vmax.f32 %v2115_v37, 0.0  ;;  %v1740_v20 = vadd.f32 %v1709_v35, %v1581_v36  ;;  %v1565_v13 = vpop.f32.mrf.mxu1 }
 0x1ca   : > { %v2144_v17 = vpack.c.bf16 %v2131_v52, %v2130_v51  ;;  %v2067_v49 = vpop.f32.mrf.mxu0  ;;  %v1922_v41 = vadd.f32 %v1891_v28, %v1740_v20 }
 0x1cc   : > { %2686 = vmatmul.msk.bf16.gmra.mxu1 %vm2170_vm8, %v2144_v17  ;;  %v2096_v56 = vadd.f32 %v2065_v32, %v1922_v41 }
 0x1ce   : > { %v1896_v3 = vpop.f32.mrf.mxu3  ;;  %v2116_v60 = vadd.f32 %v3612_v18, %v2096_v56 }
 0x1cf   : > { %v1711_v57 = vpop.f32.mrf.mxu2 }
 0x1d0   : > { %v1741_v42 = vadd.f32 %v1711_v57, %v1582_v43  ;;  %v2132_v7 = vmax.f32 %v2116_v60, 0.0  ;;  %v1567_v52 = vpop.f32.mrf.mxu1 }
 0x1d1   : > { %v1588_v57 = vadd.f32 %v1567_v52, %v3598_v19 }
 0x1d2   : > { %v1923_v50 = vadd.f32 %v1893_v40, %v1741_v42  ;;  %v2070_v48 = vpop.f32.mrf.mxu0  ;;  %v1587_v40 = vadd.f32 %v1565_v13, %v3592_v63 }
 0x1d4   : > { %v2097_v61 = vadd.f32 %v2067_v49, %v1923_v50 }
 0x1d6   : > { %v2117_v62 = vadd.f32 %v3612_v18, %v2097_v61  ;;  %v1898_v4 = vpop.f32.mrf.mxu3 }
 0x1d7   : > { %v1714_v44 = vpop.f32.mrf.mxu2 }
 0x1d8   : > { %v2133_v47 = vmax.f32 %v2117_v62, 0.0  ;;  %v1742_v10 = vadd.f32 %v1714_v44, %v1583_v6 }
 0x1da   : > { %v2145_v11 = vpack.c.bf16 %v2133_v47, %v2132_v7  ;;  %v2072_v45 = vpop.f32.mrf.mxu0  ;;  %v1924_v16 = vadd.f32 %v1896_v3, %v1742_v10 }
 0x1dc   : > { %2687 = vmatmul.msk.bf16.gmra.mxu1 %vm2170_vm8, %v2145_v11  ;;  %v2098_v9 = vadd.f32 %v2070_v48, %v1924_v16  ;;  %v1570_v48 = vpop.f32.mrf.mxu1 }
 0x1dd   : > { %v1589_v6 = vadd.f32 %v1570_v48, %v3602_v25 }
 0x1de   : > { %v1901_v5 = vpop.f32.mrf.mxu3  ;;  %v2118_v22 = vadd.f32 %v3612_v18, %v2098_v9 }
 0x1df   : > { %v1716_v33 = vpop.f32.mrf.mxu2 }
 0x1e0   : > { %v1743_v2 = vadd.f32 %v1716_v33, %v1584_v15  ;;  %v2134_v26 = vmax.f32 %v2118_v22, 0.0 }
 0x1e2   : > { %v1925_v46 = vadd.f32 %v1898_v4, %v1743_v2  ;;  %v2075_v58 = vpop.f32.mrf.mxu0 }
 0x1e4   : > { %v2099_v23 = vadd.f32 %v2072_v45, %v1925_v46  ;;  %v1572_v11 = vpop.f32.mrf.mxu1 }
 0x1e5   : > { %v1590_v16 = vadd.f32 %v1572_v11, %v3605_v29  ;;  %v3658_v29 = vld [vmem:[%s3738_s4] ss:$0 sm:$0xff] }
 0x1e6   : > { %v2119_v55 = vadd.f32 %v3612_v18, %v2099_v23  ;;  %v1903_v39 = vpop.f32.mrf.mxu3 }
 0x1e7   : > { %v1719_v30 = vpop.f32.mrf.mxu2 }
 0x1e8   : > { %v2135_v14 = vmax.f32 %v2119_v55, 0.0  ;;  %v1744_v27 = vadd.f32 %v1719_v30, %v1585_v24 }
 0x1ea   : > { %v2146_v1 = vpack.c.bf16 %v2135_v14, %v2134_v26  ;;  %v2077_v28 = vpop.f32.mrf.mxu0  ;;  %v1926_v31 = vadd.f32 %v1901_v5, %v1744_v27 }
 0x1ec   : > { %2688 = vmatmul.msk.bf16.gmra.mxu1 %vm2170_vm8, %v2146_v1  ;;  %v2100_v21 = vadd.f32 %v2075_v58, %v1926_v31 }
 0x1ee   : > { %v1906_v53 = vpop.f32.mrf.mxu3  ;;  %v2120_v36 = vadd.f32 %v3612_v18, %v2100_v21 }
 0x1ef   : > { %v1721_v32 = vpop.f32.mrf.mxu2 }
 0x1f0   : > { %v1745_v34 = vadd.f32 %v1721_v32, %v1586_v38  ;;  %v2136_v17 = vmax.f32 %v2120_v36, 0.0 }
 0x1f2   : > { %v1927_v59 = vadd.f32 %v1903_v39, %v1745_v34  ;;  %v2080_v35 = vpop.f32.mrf.mxu0 }
 0x1f4   : > { %v2101_v37 = vadd.f32 %v2077_v28, %v1927_v59 }
 0x1f6   : > { %v2121_v51 = vadd.f32 %v3612_v18, %v2101_v37  ;;  %v1908_v54 = vpop.f32.mrf.mxu3 }
 0x1f7   : > { %v1724_v20 = vpop.f32.mrf.mxu2 }
 0x1f8   : > { %v2137_v49 = vmax.f32 %v2121_v51, 0.0  ;;  %v1746_v41 = vadd.f32 %v1724_v20, %v1587_v40 }
 0x1fa   : > { %v2147_v43 = vpack.c.bf16 %v2137_v49, %v2136_v17  ;;  %v1928_v12 = vadd.f32 %v1906_v53, %v1746_v41  ;;  %v2082_v3 = vpop.f32.mrf.mxu0 }
 0x1fc   : > { %2689 = vmatmul.msk.bf16.gmra.mxu1 %vm2170_vm8, %v2147_v43  ;;  %v2102_v42 = vadd.f32 %v2080_v35, %v1928_v12 }
 0x1fe   : > { %v2122_v60 = vadd.f32 %v3612_v18, %v2102_v42  ;;  %v1911_v44 = vpop.f32.mrf.mxu3 }
 0x1ff   : > { %v1726_v56 = vpop.f32.mrf.mxu2 }
 0x200   : > { %v1747_v50 = vadd.f32 %v1726_v56, %v1588_v57  ;;  %v2138_v7 = vmax.f32 %v2122_v60, 0.0 }
 0x202   : > { %v1929_v63 = vadd.f32 %v1908_v54, %v1747_v50  ;;  %v2085_v0 = vpop.f32.mrf.mxu0 }
 0x204   : > { %v2103_v61 = vadd.f32 %v2082_v3, %v1929_v63 }
 0x206   : > { %v2123_v62 = vadd.f32 %v3612_v18, %v2103_v61  ;;  %v1913_v5 = vpop.f32.mrf.mxu3 }
 0x207   : > { %v1729_v4 = vpop.f32.mrf.mxu2 }
 0x208   : > { %v2139_v47 = vmax.f32 %v2123_v62, 0.0  ;;  %v1748_v10 = vadd.f32 %v1729_v4, %v1589_v6 }
 0x20a   : > { %v2148_v19 = vpack.c.bf16 %v2139_v47, %v2138_v7  ;;  %v1930_v45 = vadd.f32 %v1911_v44, %v1748_v10  ;;  %v2087_v2 = vpop.f32.mrf.mxu0 }
 0x20c   : > { %2690 = vmatmul.msk.bf16.gmra.mxu1 %vm2170_vm8, %v2148_v19  ;;  %v2104_v25 = vadd.f32 %v2085_v0, %v1930_v45 }
 0x20e   : > { %v2124_v46 = vadd.f32 %v3612_v18, %v2104_v25 }
 0x20f   : > { %v1731_v15 = vpop.f32.mrf.mxu2 }
 0x210   : > { %v1749_v33 = vadd.f32 %v1731_v15, %v1590_v16  ;;  %v2140_v22 = vmax.f32 %v2124_v46, 0.0 }
 0x212   : > { %v1931_v9 = vadd.f32 %v1913_v5, %v1749_v33 }
 0x214   : > { %v2105_v8 = vadd.f32 %v2087_v2, %v1931_v9 }
 0x216   : > { %v2125_v58 = vadd.f32 %v3612_v18, %v2105_v8 }
 0x218   : > { %v2141_v23 = vmax.f32 %v2125_v58, 0.0 }
 0x21a   : > { %v2149_v24 = vpack.c.bf16 %v2141_v23, %v2140_v22 }
 0x21c   : > { %2691 = vmatmul.msk.bf16.gmra.mxu1 %vm2170_vm8, %v2149_v24 }
 0x229   : > { %v2204_v55 = vpop.f32.mrf.mxu1 }
 0x22a   : > { %v2205_v18 = vadd.f32 %v3658_v29, %v2204_v55 }
 0x22c   : > { %v2244_v30 = vmax.f32 %v2205_v18, 0.0 }
 0x22e   : > { %v2260_v26 = vpack.c.bf16 %v2244_v30, %v2244_v30 }
 0x230   : > { %2277 = vst.msk [vmem:[%s3664_s29] sm:$0xf] %vm2276_vm9, %v2260_v26 }
 0x231   : > { %v2206_v14 = vpop.f32.mrf.mxu1 }
 0x232   : > { %v2207_v27 = vadd.f32 %v3658_v29, %v2206_v14 }
 0x234   : > { %v2245_v39 = vmax.f32 %v2207_v27, 0.0 }
 0x236   : > { %v2261_v1 = vpack.c.bf16 %v2245_v39, %v2245_v39 }
 0x238   : > { %2278 = vst.msk [vmem:[%s3664_s29 + $0x4] sm:$0xf] %vm2276_vm9, %v2261_v1 }
 0x239   : > { %v2209_v28 = vpop.f32.mrf.mxu1 }
 0x23a   : > { %v2210_v31 = vadd.f32 %v3658_v29, %v2209_v28 }
 0x23c   : > { %v2246_v13 = vmax.f32 %v2210_v31, 0.0 }
 0x23e   : > { %v2262_v38 = vpack.c.bf16 %v2246_v13, %v2246_v13 }
 0x240   : > { %2279 = vst.msk [vmem:[%s3664_s29 + $0x8] sm:$0xf] %vm2276_vm9, %v2262_v38 }
 0x241   : > { %v2211_v32 = vpop.f32.mrf.mxu1 }
 0x242   : > { %v2212_v21 = vadd.f32 %v3658_v29, %v2211_v32 }
 0x244   : > { %v2247_v34 = vmax.f32 %v2212_v21, 0.0 }
 0x246   : > { %v2263_v59 = vpack.c.bf16 %v2247_v34, %v2247_v34 }
 0x248   : > { %2280 = vst.msk [vmem:[%s3664_s29 + $0xc] sm:$0xf] %vm2276_vm9, %v2263_v59 }
 0x249   : > { %v2214_v53 = vpop.f32.mrf.mxu1 }
 0x24a   : > { %v2215_v36 = vadd.f32 %v3658_v29, %v2214_v53 }
 0x24c   : > { %v2248_v37 = vmax.f32 %v2215_v36, 0.0 }
 0x24e   : > { %v2264_v35 = vpack.c.bf16 %v2248_v37, %v2248_v37 }
 0x250   : > { %2281 = vst.msk [vmem:[%s3664_s29 + $0x10] sm:$0xf] %vm2276_vm9, %v2264_v35 }
 0x251   : > { %v2216_v40 = vpop.f32.mrf.mxu1 }
 0x252   : > { %v2217_v51 = vadd.f32 %v3658_v29, %v2216_v40 }
 0x254   : > { %v2249_v52 = vmax.f32 %v2217_v51, 0.0 }
 0x256   : > { %v2265_v20 = vpack.c.bf16 %v2249_v52, %v2249_v52 }
 0x258   : > { %2282 = vst.msk [vmem:[%s3664_s29 + $0x14] sm:$0xf] %vm2276_vm9, %v2265_v20 }
 0x259   : > { %v2219_v17 = vpop.f32.mrf.mxu1 }
 0x25a   : > { %v2220_v49 = vadd.f32 %v3658_v29, %v2219_v17 }
 0x25c   : > { %v2250_v41 = vmax.f32 %v2220_v49, 0.0 }
 0x25e   : > { %v2266_v43 = vpack.c.bf16 %v2250_v41, %v2250_v41 }
 0x260   : > { %2283 = vst.msk [vmem:[%s3664_s29 + $0x18] sm:$0xf] %vm2276_vm9, %v2266_v43 }
 0x261   : > { %v2221_v12 = vpop.f32.mrf.mxu1 }
 0x262   : > { %v2222_v54 = vadd.f32 %v3658_v29, %v2221_v12 }
 0x264   : > { %v2251_v57 = vmax.f32 %v2222_v54, 0.0 }
 0x266   : > { %v2267_v3 = vpack.c.bf16 %v2251_v57, %v2251_v57 }
 0x268   : > { %2284 = vst.msk [vmem:[%s3664_s29 + $0x1c] sm:$0xf] %vm2276_vm9, %v2267_v3 }
 0x269   : > { %v2224_v56 = vpop.f32.mrf.mxu1 }
 0x26a   : > { %v2225_v42 = vadd.f32 %v3658_v29, %v2224_v56 }
 0x26c   : > { %v2252_v50 = vmax.f32 %v2225_v42, 0.0 }
 0x26e   : > { %v2268_v48 = vpack.c.bf16 %v2252_v50, %v2252_v50 }
 0x270   : > { %2285 = vst.msk [vmem:[%s3664_s29 + $0x20] sm:$0xf] %vm2276_vm9, %v2268_v48 }
 0x271   : > { %v2226_v63 = vpop.f32.mrf.mxu1 }
 0x272   : > { %v2227_v60 = vadd.f32 %v3658_v29, %v2226_v63 }
 0x274   : > { %v2253_v61 = vmax.f32 %v2227_v60, 0.0 }
 0x276   : > { %v2269_v6 = vpack.c.bf16 %v2253_v61, %v2253_v61 }
 0x278   : > { %2286 = vst.msk [vmem:[%s3664_s29 + $0x24] sm:$0xf] %vm2276_vm9, %v2269_v6 }
 0x279   : > { %v2229_v62 = vpop.f32.mrf.mxu1 }
 0x27a   : > { %v2230_v44 = vadd.f32 %v3658_v29, %v2229_v62 }
 0x27c   : > { %v2254_v4 = vmax.f32 %v2230_v44, 0.0 }
 0x27e   : > { %v2270_v7 = vpack.c.bf16 %v2254_v4, %v2254_v4 }
 0x280   : > { %2287 = vst.msk [vmem:[%s3664_s29 + $0x28] sm:$0xf] %vm2276_vm9, %v2270_v7 }
 0x281   : > { %v2231_v47 = vpop.f32.mrf.mxu1 }
 0x282   : > { %v2232_v10 = vadd.f32 %v3658_v29, %v2231_v47 }
 0x284   : > { %v2255_v0 = vmax.f32 %v2232_v10, 0.0 }
 0x286   : > { %v2271_v19 = vpack.c.bf16 %v2255_v0, %v2255_v0 }
 0x288   : > { %2288 = vst.msk [vmem:[%s3664_s29 + $0x2c] sm:$0xf] %vm2276_vm9, %v2271_v19 }
 0x289   : > { %v2234_v11 = vpop.f32.mrf.mxu1 }
 0x28a   : > { %v2235_v45 = vadd.f32 %v3658_v29, %v2234_v11 }
 0x28c   : > { %v2256_v16 = vmax.f32 %v2235_v45, 0.0 }
 0x28e   : > { %v2272_v15 = vpack.c.bf16 %v2256_v16, %v2256_v16 }
 0x290   : > { %2289 = vst.msk [vmem:[%s3664_s29 + $0x30] sm:$0xf] %vm2276_vm9, %v2272_v15 }
 0x291   : > { %v2236_v25 = vpop.f32.mrf.mxu1 }
 0x292   : > { %v2237_v33 = vadd.f32 %v3658_v29, %v2236_v25 }
 0x294   : > { %v2257_v5 = vmax.f32 %v2237_v33, 0.0 }
 0x296   : > { %v2273_v9 = vpack.c.bf16 %v2257_v5, %v2257_v5 }
 0x298   : > { %2290 = vst.msk [vmem:[%s3664_s29 + $0x34] sm:$0xf] %vm2276_vm9, %v2273_v9 }
 0x299   : > { %v2239_v2 = vpop.f32.mrf.mxu1 }
 0x29a   : > { %v2240_v46 = vadd.f32 %v3658_v29, %v2239_v2 }
 0x29c   : > { %v2258_v8 = vmax.f32 %v2240_v46, 0.0 }
 0x29e   : > { %v2274_v58 = vpack.c.bf16 %v2258_v8, %v2258_v8 }
 0x2a0   : > { %2291 = vst.msk [vmem:[%s3664_s29 + $0x38] sm:$0xf] %vm2276_vm9, %v2274_v58 }
 0x2a1   : > { %v2241_v22 = vpop.f32.mrf.mxu1 }
 0x2a2   : > { %v2242_v23 = vadd.f32 %v3658_v29, %v2241_v22 }
 0x2a4   : > { %v2259_v24 = vmax.f32 %v2242_v23, 0.0 }
 0x2a6   : > { %v2275_v55 = vpack.c.bf16 %v2259_v24, %v2259_v24 }
 0x2a8   : > { %2292 = vst.msk [vmem:[%s3664_s29 + $0x3c] sm:$0xf] %vm2276_vm9, %v2275_v55 }
 0x2a9 PF: > { %s15_s24 = sadd.s32 1, %s2839_s24   ;;  %s3744_s18 = smov %s2819_s19 }
 0x2aa   : > { %p12_p12 = scmp.ge.s32.totalorder %s15_s24, 6   ;;  %s3745_s19 = smov %s2922_s6 }
 0x2ab   : > { %s3746_s20 = smov %s2831_s22  ;;  %s3747_s21 = smov %s2835_s23 }
 0x2ac   : > { %s3748_s22 = smov %s3751_s25  ;;  %s3749_s23 = smov %s3755_s26 }
 0x2ad   :  { %14 = sbr.rel (!%p12_p12) target bundleno = 4 (0x4), region = 126 }

</bundles_post_ra>
